<compile_context>
chip_gen: v7x
topology: tpu7x:2x2x1
jax: 0.10.0
libtpu: 0.0.40
codegen_flags: <defaults>
</compile_context>

<pallas_src>
import functools
from collections import namedtuple

import jax
import jax.numpy as jnp
import numpy as np
from jax import lax
from jax.experimental import pallas as pl
from jax.experimental.pallas import tpu as pltpu

Genotype = namedtuple("Genotype", "normal normal_concat reduce reduce_concat")

# Deterministic genotype (normal cell only).
GENOTYPE = Genotype(
    normal=[("sep_conv_3x3", 0), ("sep_conv_3x3", 1),
            ("sep_conv_3x3", 0), ("skip_connect", 1),
            ("skip_connect", 0), ("sep_conv_3x3", 1),
            ("skip_connect", 2), ("sep_conv_3x3", 0)],
    normal_concat=[2, 3, 4, 5],
    reduce=[], reduce_concat=[],
)

BN_EPS = 1e-5


# ------------------------------ fused Pallas kernel ------------------------------ #

def _cell_kernel(x0_ref, x1_ref, pre_w_ref, pre_b_ref, sep_w_ref, sep_b_ref,
                 out_ref, *, op_names, indices, concat, sep_slot, h_img):
    """One grid step = `imgs_per_block` images stacked on the sublane axis.

    Activations are (M, W*C) lane-dense f32 with M = imgs_per_block * H.
    """
    m_rows = x0_ref.shape[0]
    lanes = pre_w_ref.shape[-1]          # W * C (state lane width)

    # Per-image H-halo masks: row h==0 has no valid h-1 neighbour, h==H-1 no h+1.
    row = lax.broadcasted_iota(jnp.int32, (m_rows, lanes), 0) % h_img
    not_first = row > 0
    not_last = row < (h_img - 1)

    def relu_conv_bn(x, k):
        # ReLU -> 1x1 conv (block-diag weight, BN scale folded) -> +bias
        r = jnp.maximum(x, 0.0).astype(jnp.bfloat16)
        z = jnp.dot(r, pre_w_ref[k], preferred_element_type=jnp.float32)
        return z + pre_b_ref[k]

    def sep_stage(x, s):
        # ReLU -> dw3x3 -> pw1x1 -> BN as ONE (M, 3*lanes) @ (3*lanes, lanes) bf16
        # matmul.  W taps, the pointwise 1x1 and the BN scale are folded into
        # sep_w at pack time; the three H taps are the three lane-blocks of the LHS.
        r = jnp.maximum(x, 0.0)
        zrow = jnp.zeros((1, lanes), r.dtype)
        # up[i] = r[i-1] (zero at each image's first row); dn[i] = r[i+1] (zero at last).
        up = jnp.where(not_first, jnp.concatenate([zrow, r[:-1, :]], axis=0), 0.0)
        dn = jnp.where(not_last, jnp.concatenate([r[1:, :], zrow], axis=0), 0.0)
        lhs = jnp.concatenate(
            [up.astype(jnp.bfloat16), r.astype(jnp.bfloat16), dn.astype(jnp.bfloat16)],
            axis=1)                                                  # (M, 3*lanes)
        z = jnp.dot(lhs, sep_w_ref[s], preferred_element_type=jnp.float32)
        return z + sep_b_ref[s]

    def sep_conv(x, j):
        base = sep_slot[j]
        return sep_stage(sep_stage(x, base), base + 1)

    states = [relu_conv_bn(x0_ref[...], 0), relu_conv_bn(x1_ref[...], 1)]
    for i in range(len(op_names) // 2):
        outs = []
        for j in (2 * i, 2 * i + 1):
            h = states[indices[j]]
            if op_names[j] == "sep_conv_3x3":
                h = sep_conv(h, j)
            # skip_connect == Identity (Dropout2d only applies in training mode)
            outs.append(h)
        states.append(outs[0] + outs[1])            # partner add fused in-kernel
    for k, idx in enumerate(concat):                # concat written directly
        out_ref[k, :, :] = states[idx]


# ------------------------------- wrapper / launch -------------------------------- #

def cell_forward(packed, s0_nchw, s1_nchw):
    op_names, indices = zip(*GENOTYPE.normal)
    concat = tuple(GENOTYPE.normal_concat)
    n, c_pp, hh, ww = s0_nchw.shape
    c_p = s1_nchw.shape[1]
    lanes = packed["pre_w"].shape[-1]               # W * C
    pre_rows = packed["pre_w"].shape[1]             # W * C_in
    c = lanes // ww
    n_concat = len(concat)
    n_sep = packed["sep_w"].shape[0]

    # Small-config layout assumptions (lane-dense tiles).
    assert hh % 8 == 0 and lanes % 128 == 0
    assert (ww * c_pp) % 128 == 0 and (ww * c_p) % 128 == 0

    # Pick images-per-block so the matmul M dimension is ~128 rows, but keep at
    # least 2 grid steps so v7x's two TensorCores can split the batch.
    target_rows = 128
    imgs = max(1, min(n, target_rows // hh))
    while n % imgs:
        imgs -= 1
    blocks = n // imgs
    if blocks == 1 and n >= 2 and n % 2 == 0:
        imgs, blocks = n // 2, 2
    bm = imgs * hh                                   # sublane rows per grid step

    # NCHW -> (N*H, W*C) lane-dense layout (interface is NCHW per the module spec;
    # for a full network, keep activations in this packed layout across cells).
    x0 = jnp.transpose(s0_nchw, (0, 2, 3, 1)).reshape(n * hh, ww * c_pp)
    x1 = jnp.transpose(s1_nchw, (0, 2, 3, 1)).reshape(n * hh, ww * c_p)

    sep_slot, cnt = {}, 0
    for j, name in enumerate(op_names):
        if name == "sep_conv_3x3":
            sep_slot[j] = cnt
            cnt += 2

    kernel = functools.partial(
        _cell_kernel, op_names=op_names, indices=indices, concat=concat,
        sep_slot=sep_slot, h_img=hh)

    out = pl.pallas_call(
        kernel,
        grid=(blocks,),
        in_specs=[
            pl.BlockSpec((bm, ww * c_pp), lambda b: (b, 0)),
            pl.BlockSpec((bm, ww * c_p), lambda b: (b, 0)),
            # Grid-invariant bf16 weights: constant block index -> copied once,
            # revisited on later steps.
            pl.BlockSpec((2, pre_rows, lanes), lambda b: (0, 0, 0)),
            pl.BlockSpec((2, 1, lanes), lambda b: (0, 0, 0)),
            pl.BlockSpec((n_sep, 3 * lanes, lanes), lambda b: (0, 0, 0)),
            pl.BlockSpec((n_sep, 1, lanes), lambda b: (0, 0, 0)),
        ],
        out_specs=pl.BlockSpec((n_concat, bm, lanes), lambda b: (0, b, 0)),
        out_shape=jax.ShapeDtypeStruct((n_concat, n * hh, lanes), jnp.float32),
        compiler_params=pltpu.CompilerParams(dimension_semantics=("parallel",)),
    )(x0, x1, packed["pre_w"], packed["pre_b"], packed["sep_w"], packed["sep_b"])

    # (4, N*H, W*C) -> NCHW concat along channels.
    out = out.reshape(n_concat, n, hh, ww, c)
    out = jnp.transpose(out, (1, 0, 4, 2, 3)).reshape(n, n_concat * c, hh, ww)
    return out


# ----------------------------- parameter init / pack ------------------------------ #

def _fold_bn(key, c):
    kg, kb, km, kv = jax.random.split(key, 4)
    gamma = 1.0 + 0.1 * jax.random.normal(kg, (c,), jnp.float32)
    beta = 0.1 * jax.random.normal(kb, (c,), jnp.float32)
    mean = 0.1 * jax.random.normal(km, (c,), jnp.float32)
    var = jax.random.uniform(kv, (c,), jnp.float32, minval=0.5, maxval=1.5)
    scale = gamma / jnp.sqrt(var + BN_EPS)
    bias = beta - mean * scale
    return scale.reshape(1, c), bias.reshape(1, c)


def _init_relu_conv_bn(key, cin, cout):
    kw, kbn = jax.random.split(key)
    w = jax.random.normal(kw, (cin, cout), jnp.float32) / np.sqrt(cin)
    scale, bias = _fold_bn(kbn, cout)
    return {"w": w, "scale": scale, "bias": bias}


def _init_sepconv(key, c):
    params = {}
    for stage, k in zip(("s1", "s2"), jax.random.split(key)):
        kdw, kpw, kbn = jax.random.split(k, 3)
        dw = jax.random.normal(kdw, (3, 3, c), jnp.float32) / 3.0
        pw = jax.random.normal(kpw, (c, c), jnp.float32) / np.sqrt(c)
        scale, bias = _fold_bn(kbn, c)
        params[stage] = {"dw": dw, "pw": pw, "scale": scale, "bias": bias}
    return params


def init_cell_params(key, c_pp, c_p, c, genotype):
    op_names, _ = zip(*genotype.normal)
    keys = jax.random.split(key, 2 + len(op_names))
    params = {
        "pre0": _init_relu_conv_bn(keys[0], c_pp, c),   # reduction_prev=False
        "pre1": _init_relu_conv_bn(keys[1], c_p, c),
        "ops": [],
    }
    for name, k in zip(op_names, keys[2:]):
        if name == "sep_conv_3x3":
            params["ops"].append(_init_sepconv(k, c))
        elif name == "skip_connect":
            params["ops"].append({})                     # Identity (stride 1)
        else:
            raise NotImplementedError(name)
    return params


def pack_cell_params(params, genotype, h, w):
    """Fold BN into weights; bake W-taps + 1x1 into fused (3*W*C, W*C) bf16 matrices."""
    op_names, _ = zip(*genotype.normal)
    c = params["pre0"]["w"].shape[1]
    lanes = w * c
    assert params["pre0"]["w"].shape[0] == params["pre1"]["w"].shape[0]

    def fold_pre(p):
        wmat = np.asarray(p["w"], np.float32)                    # (Cin, C)
        scale = np.asarray(p["scale"], np.float32).reshape(-1)   # (C,)
        bias = np.asarray(p["bias"], np.float32).reshape(-1)
        wfold = np.kron(np.eye(w, dtype=np.float32), wmat * scale[None, :])
        return wfold.astype(np.float32), np.tile(bias, w).reshape(1, lanes)

    pre_w, pre_b = zip(*(fold_pre(params[k]) for k in ("pre0", "pre1")))

    def fold_stage(sp):
        dw = np.asarray(sp["dw"], np.float32)                    # (3, 3, C)
        pws = (np.asarray(sp["pw"], np.float32)
               * np.asarray(sp["scale"], np.float32).reshape(1, -1))
        bias = np.asarray(sp["bias"], np.float32).reshape(-1)
        m = np.zeros((3, lanes, lanes), np.float32)
        for kh in range(3):                   # H tap index (input row = h + kh - 1)
            for wo in range(w):               # output column
                for ow in (-1, 0, 1):         # W tap offset
                    wi = wo + ow
                    if 0 <= wi < w:           # implicit zero padding in W
                        m[kh, wi * c:(wi + 1) * c, wo * c:(wo + 1) * c] = (
                            dw[kh, ow + 1, :, None] * pws)
        # Stack the 3 H-taps along K so the stage is one K=3*lanes matmul.
        return m.reshape(3 * lanes, lanes), np.tile(bias, w).reshape(1, lanes)

    sep_w, sep_b = [], []
    for j, name in enumerate(op_names):
        if name == "sep_conv_3x3":
            for st in ("s1", "s2"):
                mm, b = fold_stage(params["ops"][j][st])
                sep_w.append(mm)
                sep_b.append(b)

    return {"pre_w": jnp.asarray(np.stack(pre_w), dtype=jnp.bfloat16),   # (2, W*Cin, W*C)
            "pre_b": jnp.asarray(np.stack(pre_b), dtype=jnp.float32),    # (2, 1, W*C)
            "sep_w": jnp.asarray(np.stack(sep_w), dtype=jnp.bfloat16),   # (10, 3*W*C, W*C)
            "sep_b": jnp.asarray(np.stack(sep_b), dtype=jnp.float32)}    # (10, 1, W*C)


# ------------------------------ pure-JAX reference -------------------------------- #

def _ref_conv1x1(x, w):
    return lax.conv_general_dilated(
        x, w.reshape(1, 1, *w.shape), (1, 1), "VALID",
        dimension_numbers=("NHWC", "HWIO", "NHWC"))


def ref_relu_conv1x1_bn(x, p):
    z = _ref_conv1x1(jnp.maximum(x, 0.0), p["w"])
    return z * p["scale"].reshape(1, 1, 1, -1) + p["bias"].reshape(1, 1, 1, -1)


def ref_sep_conv_3x3(x, p):
    y = x
    for stage in ("s1", "s2"):
        sp = p[stage]
        c = y.shape[-1]
        y = jnp.maximum(y, 0.0)
        y = lax.conv_general_dilated(
            y, sp["dw"][:, :, None, :], (1, 1), ((1, 1), (1, 1)),
            dimension_numbers=("NHWC", "HWIO", "NHWC"), feature_group_count=c)
        y = _ref_conv1x1(y, sp["pw"])
        y = y * sp["scale"].reshape(1, 1, 1, -1) + sp["bias"].reshape(1, 1, 1, -1)
    return y


def ref_cell_forward(params, s0_nchw, s1_nchw):
    op_names, indices = zip(*GENOTYPE.normal)
    steps = len(op_names) // 2
    s0 = jnp.transpose(s0_nchw, (0, 2, 3, 1))
    s1 = jnp.transpose(s1_nchw, (0, 2, 3, 1))
    s0 = ref_relu_conv1x1_bn(s0, params["pre0"])
    s1 = ref_relu_conv1x1_bn(s1, params["pre1"])
    states = [s0, s1]
    for i in range(steps):
        outs = []
        for j in (2 * i, 2 * i + 1):
            name, idx = op_names[j], indices[j]
            h = states[idx]
            if name == "sep_conv_3x3":
                h = ref_sep_conv_3x3(h, params["ops"][j])
            outs.append(h)
        states.append(outs[0] + outs[1])
    out = jnp.concatenate([states[i] for i in GENOTYPE.normal_concat], axis=-1)
    return jnp.transpose(out, (0, 3, 1, 2))


# -------------------------------------- main --------------------------------------- #

if __name__ == "__main__":
    N, H, W = 16, 8, 8
    C_PP, C_P, C = 16, 16, 16

    key = jax.random.PRNGKey(0)
    kp, k0, k1 = jax.random.split(key, 3)
    params = init_cell_params(kp, C_PP, C_P, C, GENOTYPE)
    packed = pack_cell_params(params, GENOTYPE, H, W)
    s0 = jax.random.normal(k0, (N, C_PP, H, W), jnp.float32)  # NCHW inputs
    s1 = jax.random.normal(k1, (N, C_P, H, W), jnp.float32)

    out = jax.block_until_ready(jax.jit(cell_forward)(packed, s0, s1))
    ref = jax.block_until_ready(ref_cell_forward(params, s0, s1))

    assert out.shape == (N, len(GENOTYPE.normal_concat) * C, H, W), out.shape
    # bf16 MXU inputs vs f32 reference -> loose-ish but meaningful tolerance.
    np.testing.assert_allclose(np.asarray(out), np.asarray(ref), rtol=5e-2, atol=5e-2)
    print("KERNEL_OK")
</pallas_src>

<mosaic_0001>
module attributes {stable_mosaic.version = 11 : i64} {
  func.func @_cell_kernel(%arg0: i32, %arg1: memref<64x128xf32, #tpu.memory_space<vmem>>, %arg2: memref<64x128xf32, #tpu.memory_space<vmem>>, %arg3: memref<2x128x128xbf16, #tpu.memory_space<vmem>>, %arg4: memref<2x1x128xf32, #tpu.memory_space<vmem>>, %arg5: memref<10x384x128xbf16, #tpu.memory_space<vmem>>, %arg6: memref<10x1x128xf32, #tpu.memory_space<vmem>>, %arg7: memref<4x64x128xf32, #tpu.memory_space<vmem>>) attributes {dimension_semantics = [#tpu.dimension_semantics<parallel>], iteration_bounds = array<i64: 2>, scalar_prefetch = 0 : i64, scratch_operands = 0 : i64, tpu.core_type = #tpu.core_type<tc>, window_params = [{transform_indices = @transform_0, window_bounds = array<i64: 64, 128>}, {transform_indices = @transform_1, window_bounds = array<i64: 64, 128>}, {pipeline_mode = #tpu.pipeline_mode<synchronous>, transform_indices = @transform_2, window_bounds = array<i64: 2, 128, 128>}, {pipeline_mode = #tpu.pipeline_mode<synchronous>, transform_indices = @transform_3, window_bounds = array<i64: 2, 1, 128>}, {pipeline_mode = #tpu.pipeline_mode<synchronous>, transform_indices = @transform_4, window_bounds = array<i64: 10, 384, 128>}, {pipeline_mode = #tpu.pipeline_mode<synchronous>, transform_indices = @transform_5, window_bounds = array<i64: 10, 1, 128>}, {transform_indices = @transform_6, window_bounds = array<i64: 4, 64, 128>}]} {
    %0 = tpu.iota {dimensions = array<i32: 0>} : vector<64x128xi32>
    %c8_i32 = arith.constant 8 : i32
    %c0_i32 = arith.constant 0 : i32
    %1 = arith.cmpi eq, %c8_i32, %c0_i32 : i32
    %c1_i32 = arith.constant 1 : i32
    %2 = arith.select %1, %c1_i32, %c8_i32 : i32
    %3 = vector.broadcast %2 : i32 to vector<64x128xi32>
    %4 = arith.remsi %0, %3 : vector<64x128xi32>
    %c0_i32_0 = arith.constant 0 : i32
    %5 = vector.broadcast %c0_i32_0 : i32 to vector<64x128xi32>
    %6 = arith.cmpi ne, %4, %5 : vector<64x128xi32>
    %c0_i32_1 = arith.constant 0 : i32
    %7 = vector.broadcast %c0_i32_1 : i32 to vector<64x128xi32>
    %8 = arith.cmpi slt, %4, %7 : vector<64x128xi32>
    %c0_i32_2 = arith.constant 0 : i32
    %9 = arith.cmpi slt, %2, %c0_i32_2 : i32
    %10 = vector.broadcast %9 : i1 to vector<64x128xi1>
    %11 = vector.broadcast %10 : vector<64x128xi1> to vector<64x128xi1>
    %12 = arith.xori %8, %11 : vector<64x128xi1>
    %13 = arith.andi %12, %6 : vector<64x128xi1>
    %14 = vector.broadcast %2 : i32 to vector<64x128xi32>
    %15 = arith.addi %4, %14 : vector<64x128xi32>
    %16 = arith.select %13, %15, %4 : vector<64x128xi1>, vector<64x128xi32>
    %c0_i32_3 = arith.constant 0 : i32
    %17 = vector.broadcast %c0_i32_3 : i32 to vector<64x128xi32>
    %18 = arith.cmpi sgt, %16, %17 : vector<64x128xi32>
    %c7_i32 = arith.constant 7 : i32
    %19 = vector.broadcast %c7_i32 : i32 to vector<64x128xi32>
    %20 = arith.cmpi slt, %16, %19 : vector<64x128xi32>
    %c0 = arith.constant 0 : index
    %c0_4 = arith.constant 0 : index
    %21 = vector.load %arg1[%c0, %c0_4] : memref<64x128xf32, #tpu.memory_space<vmem>>, vector<64x128xf32>
    %cst = arith.constant 0.000000e+00 : f32
    %22 = vector.broadcast %cst : f32 to vector<64x128xf32>
    %23 = arith.maximumf %21, %22 : vector<64x128xf32>
    %24 = arith.truncf %23 : vector<64x128xf32> to vector<64x128xbf16>
    %c0_5 = arith.constant 0 : index
    %c0_6 = arith.constant 0 : index
    %c0_7 = arith.constant 0 : index
    %25 = vector.load %arg3[%c0_5, %c0_6, %c0_7] : memref<2x128x128xbf16, #tpu.memory_space<vmem>>, vector<1x128x128xbf16>
    %26 = vector.shape_cast %25 : vector<1x128x128xbf16> to vector<128x128xbf16>
    %cst_8 = arith.constant dense<0.000000e+00> : vector<64x128xf32>
    %27 = tpu.matmul %24, %26, %cst_8 {dimension_numbers = #tpu.dot_dimension_numbers<[1], [0], [0], [1], [0, 0, 1, 1], [], []>} : vector<64x128xbf16>, vector<128x128xbf16>, vector<64x128xf32> -> vector<64x128xf32>
    %c0_9 = arith.constant 0 : index
    %c0_10 = arith.constant 0 : index
    %c0_11 = arith.constant 0 : index
    %28 = vector.load %arg4[%c0_9, %c0_10, %c0_11] : memref<2x1x128xf32, #tpu.memory_space<vmem>>, vector<1x1x128xf32>
    %29 = vector.shape_cast %28 : vector<1x1x128xf32> to vector<1x128xf32>
    %30 = vector.broadcast %29 : vector<1x128xf32> to vector<64x128xf32>
    %31 = arith.addf %27, %30 : vector<64x128xf32>
    %c0_12 = arith.constant 0 : index
    %c0_13 = arith.constant 0 : index
    %32 = vector.load %arg2[%c0_12, %c0_13] : memref<64x128xf32, #tpu.memory_space<vmem>>, vector<64x128xf32>
    %cst_14 = arith.constant 0.000000e+00 : f32
    %33 = vector.broadcast %cst_14 : f32 to vector<64x128xf32>
    %34 = arith.maximumf %32, %33 : vector<64x128xf32>
    %35 = arith.truncf %34 : vector<64x128xf32> to vector<64x128xbf16>
    %c1 = arith.constant 1 : index
    %c0_15 = arith.constant 0 : index
    %c0_16 = arith.constant 0 : index
    %36 = vector.load %arg3[%c1, %c0_15, %c0_16] : memref<2x128x128xbf16, #tpu.memory_space<vmem>>, vector<1x128x128xbf16>
    %37 = vector.shape_cast %36 : vector<1x128x128xbf16> to vector<128x128xbf16>
    %cst_17 = arith.constant dense<0.000000e+00> : vector<64x128xf32>
    %38 = tpu.matmul %35, %37, %cst_17 {dimension_numbers = #tpu.dot_dimension_numbers<[1], [0], [0], [1], [0, 0, 1, 1], [], []>} : vector<64x128xbf16>, vector<128x128xbf16>, vector<64x128xf32> -> vector<64x128xf32>
    %c1_18 = arith.constant 1 : index
    %c0_19 = arith.constant 0 : index
    %c0_20 = arith.constant 0 : index
    %39 = vector.load %arg4[%c1_18, %c0_19, %c0_20] : memref<2x1x128xf32, #tpu.memory_space<vmem>>, vector<1x1x128xf32>
    %40 = vector.shape_cast %39 : vector<1x1x128xf32> to vector<1x128xf32>
    %41 = vector.broadcast %40 : vector<1x128xf32> to vector<64x128xf32>
    %42 = arith.addf %38, %41 : vector<64x128xf32>
    %cst_21 = arith.constant 0.000000e+00 : f32
    %43 = vector.broadcast %cst_21 : f32 to vector<64x128xf32>
    %44 = arith.maximumf %31, %43 : vector<64x128xf32>
    %cst_22 = arith.constant 0.000000e+00 : f32
    %45 = vector.broadcast %cst_22 : f32 to vector<1x128xf32>
    %46 = vector.extract_strided_slice %44 {offsets = [0, 0], sizes = [63, 128], strides = [1, 1]} : vector<64x128xf32> to vector<63x128xf32>
    %47 = tpu.concatenate %45, %46 in 0 : vector<1x128xf32>, vector<63x128xf32> -> vector<64x128xf32>
    %cst_23 = arith.constant 0.000000e+00 : f32
    %48 = vector.broadcast %cst_23 : f32 to vector<64x128xf32>
    %49 = arith.select %18, %47, %48 : vector<64x128xi1>, vector<64x128xf32>
    %50 = vector.extract_strided_slice %44 {offsets = [1, 0], sizes = [63, 128], strides = [1, 1]} : vector<64x128xf32> to vector<63x128xf32>
    %51 = tpu.concatenate %50, %45 in 0 : vector<63x128xf32>, vector<1x128xf32> -> vector<64x128xf32>
    %cst_24 = arith.constant 0.000000e+00 : f32
    %52 = vector.broadcast %cst_24 : f32 to vector<64x128xf32>
    %53 = arith.select %20, %51, %52 : vector<64x128xi1>, vector<64x128xf32>
    %54 = arith.truncf %49 : vector<64x128xf32> to vector<64x128xbf16>
    %55 = arith.truncf %44 : vector<64x128xf32> to vector<64x128xbf16>
    %56 = arith.truncf %53 : vector<64x128xf32> to vector<64x128xbf16>
    %57 = tpu.concatenate %54, %55, %56 in 1 : vector<64x128xbf16>, vector<64x128xbf16>, vector<64x128xbf16> -> vector<64x384xbf16>
    %c0_25 = arith.constant 0 : index
    %c0_26 = arith.constant 0 : index
    %c0_27 = arith.constant 0 : index
    %58 = vector.load %arg5[%c0_25, %c0_26, %c0_27] : memref<10x384x128xbf16, #tpu.memory_space<vmem>>, vector<1x384x128xbf16>
    %59 = vector.shape_cast %58 : vector<1x384x128xbf16> to vector<384x128xbf16>
    %cst_28 = arith.constant dense<0.000000e+00> : vector<64x128xf32>
    %60 = tpu.matmul %57, %59, %cst_28 {dimension_numbers = #tpu.dot_dimension_numbers<[1], [0], [0], [1], [0, 0, 1, 1], [], []>} : vector<64x384xbf16>, vector<384x128xbf16>, vector<64x128xf32> -> vector<64x128xf32>
    %c0_29 = arith.constant 0 : index
    %c0_30 = arith.constant 0 : index
    %c0_31 = arith.constant 0 : index
    %61 = vector.load %arg6[%c0_29, %c0_30, %c0_31] : memref<10x1x128xf32, #tpu.memory_space<vmem>>, vector<1x1x128xf32>
    %62 = vector.shape_cast %61 : vector<1x1x128xf32> to vector<1x128xf32>
    %63 = vector.broadcast %62 : vector<1x128xf32> to vector<64x128xf32>
    %64 = arith.addf %60, %63 : vector<64x128xf32>
    %cst_32 = arith.constant 0.000000e+00 : f32
    %65 = vector.broadcast %cst_32 : f32 to vector<64x128xf32>
    %66 = arith.maximumf %64, %65 : vector<64x128xf32>
    %cst_33 = arith.constant 0.000000e+00 : f32
    %67 = vector.broadcast %cst_33 : f32 to vector<1x128xf32>
    %68 = vector.extract_strided_slice %66 {offsets = [0, 0], sizes = [63, 128], strides = [1, 1]} : vector<64x128xf32> to vector<63x128xf32>
    %69 = tpu.concatenate %67, %68 in 0 : vector<1x128xf32>, vector<63x128xf32> -> vector<64x128xf32>
    %cst_34 = arith.constant 0.000000e+00 : f32
    %70 = vector.broadcast %cst_34 : f32 to vector<64x128xf32>
    %71 = arith.select %18, %69, %70 : vector<64x128xi1>, vector<64x128xf32>
    %72 = vector.extract_strided_slice %66 {offsets = [1, 0], sizes = [63, 128], strides = [1, 1]} : vector<64x128xf32> to vector<63x128xf32>
    %73 = tpu.concatenate %72, %67 in 0 : vector<63x128xf32>, vector<1x128xf32> -> vector<64x128xf32>
    %cst_35 = arith.constant 0.000000e+00 : f32
    %74 = vector.broadcast %cst_35 : f32 to vector<64x128xf32>
    %75 = arith.select %20, %73, %74 : vector<64x128xi1>, vector<64x128xf32>
    %76 = arith.truncf %71 : vector<64x128xf32> to vector<64x128xbf16>
    %77 = arith.truncf %66 : vector<64x128xf32> to vector<64x128xbf16>
    %78 = arith.truncf %75 : vector<64x128xf32> to vector<64x128xbf16>
    %79 = tpu.concatenate %76, %77, %78 in 1 : vector<64x128xbf16>, vector<64x128xbf16>, vector<64x128xbf16> -> vector<64x384xbf16>
    %c1_36 = arith.constant 1 : index
    %c0_37 = arith.constant 0 : index
    %c0_38 = arith.constant 0 : index
    %80 = vector.load %arg5[%c1_36, %c0_37, %c0_38] : memref<10x384x128xbf16, #tpu.memory_space<vmem>>, vector<1x384x128xbf16>
    %81 = vector.shape_cast %80 : vector<1x384x128xbf16> to vector<384x128xbf16>
    %cst_39 = arith.constant dense<0.000000e+00> : vector<64x128xf32>
    %82 = tpu.matmul %79, %81, %cst_39 {dimension_numbers = #tpu.dot_dimension_numbers<[1], [0], [0], [1], [0, 0, 1, 1], [], []>} : vector<64x384xbf16>, vector<384x128xbf16>, vector<64x128xf32> -> vector<64x128xf32>
    %c1_40 = arith.constant 1 : index
    %c0_41 = arith.constant 0 : index
    %c0_42 = arith.constant 0 : index
    %83 = vector.load %arg6[%c1_40, %c0_41, %c0_42] : memref<10x1x128xf32, #tpu.memory_space<vmem>>, vector<1x1x128xf32>
    %84 = vector.shape_cast %83 : vector<1x1x128xf32> to vector<1x128xf32>
    %85 = vector.broadcast %84 : vector<1x128xf32> to vector<64x128xf32>
    %86 = arith.addf %82, %85 : vector<64x128xf32>
    %cst_43 = arith.constant 0.000000e+00 : f32
    %87 = vector.broadcast %cst_43 : f32 to vector<64x128xf32>
    %88 = arith.maximumf %42, %87 : vector<64x128xf32>
    %cst_44 = arith.constant 0.000000e+00 : f32
    %89 = vector.broadcast %cst_44 : f32 to vector<1x128xf32>
    %90 = vector.extract_strided_slice %88 {offsets = [0, 0], sizes = [63, 128], strides = [1, 1]} : vector<64x128xf32> to vector<63x128xf32>
    %91 = tpu.concatenate %89, %90 in 0 : vector<1x128xf32>, vector<63x128xf32> -> vector<64x128xf32>
    %cst_45 = arith.constant 0.000000e+00 : f32
    %92 = vector.broadcast %cst_45 : f32 to vector<64x128xf32>
    %93 = arith.select %18, %91, %92 : vector<64x128xi1>, vector<64x128xf32>
    %94 = vector.extract_strided_slice %88 {offsets = [1, 0], sizes = [63, 128], strides = [1, 1]} : vector<64x128xf32> to vector<63x128xf32>
    %95 = tpu.concatenate %94, %89 in 0 : vector<63x128xf32>, vector<1x128xf32> -> vector<64x128xf32>
    %cst_46 = arith.constant 0.000000e+00 : f32
    %96 = vector.broadcast %cst_46 : f32 to vector<64x128xf32>
    %97 = arith.select %20, %95, %96 : vector<64x128xi1>, vector<64x128xf32>
    %98 = arith.truncf %93 : vector<64x128xf32> to vector<64x128xbf16>
    %99 = arith.truncf %88 : vector<64x128xf32> to vector<64x128xbf16>
    %100 = arith.truncf %97 : vector<64x128xf32> to vector<64x128xbf16>
    %101 = tpu.concatenate %98, %99, %100 in 1 : vector<64x128xbf16>, vector<64x128xbf16>, vector<64x128xbf16> -> vector<64x384xbf16>
    %c2 = arith.constant 2 : index
    %c0_47 = arith.constant 0 : index
    %c0_48 = arith.constant 0 : index
    %102 = vector.load %arg5[%c2, %c0_47, %c0_48] : memref<10x384x128xbf16, #tpu.memory_space<vmem>>, vector<1x384x128xbf16>
    %103 = vector.shape_cast %102 : vector<1x384x128xbf16> to vector<384x128xbf16>
    %cst_49 = arith.constant dense<0.000000e+00> : vector<64x128xf32>
    %104 = tpu.matmul %101, %103, %cst_49 {dimension_numbers = #tpu.dot_dimension_numbers<[1], [0], [0], [1], [0, 0, 1, 1], [], []>} : vector<64x384xbf16>, vector<384x128xbf16>, vector<64x128xf32> -> vector<64x128xf32>
    %c2_50 = arith.constant 2 : index
    %c0_51 = arith.constant 0 : index
    %c0_52 = arith.constant 0 : index
    %105 = vector.load %arg6[%c2_50, %c0_51, %c0_52] : memref<10x1x128xf32, #tpu.memory_space<vmem>>, vector<1x1x128xf32>
    %106 = vector.shape_cast %105 : vector<1x1x128xf32> to vector<1x128xf32>
    %107 = vector.broadcast %106 : vector<1x128xf32> to vector<64x128xf32>
    %108 = arith.addf %104, %107 : vector<64x128xf32>
    %cst_53 = arith.constant 0.000000e+00 : f32
    %109 = vector.broadcast %cst_53 : f32 to vector<64x128xf32>
    %110 = arith.maximumf %108, %109 : vector<64x128xf32>
    %cst_54 = arith.constant 0.000000e+00 : f32
    %111 = vector.broadcast %cst_54 : f32 to vector<1x128xf32>
    %112 = vector.extract_strided_slice %110 {offsets = [0, 0], sizes = [63, 128], strides = [1, 1]} : vector<64x128xf32> to vector<63x128xf32>
    %113 = tpu.concatenate %111, %112 in 0 : vector<1x128xf32>, vector<63x128xf32> -> vector<64x128xf32>
    %cst_55 = arith.constant 0.000000e+00 : f32
    %114 = vector.broadcast %cst_55 : f32 to vector<64x128xf32>
    %115 = arith.select %18, %113, %114 : vector<64x128xi1>, vector<64x128xf32>
    %116 = vector.extract_strided_slice %110 {offsets = [1, 0], sizes = [63, 128], strides = [1, 1]} : vector<64x128xf32> to vector<63x128xf32>
    %117 = tpu.concatenate %116, %111 in 0 : vector<63x128xf32>, vector<1x128xf32> -> vector<64x128xf32>
    %cst_56 = arith.constant 0.000000e+00 : f32
    %118 = vector.broadcast %cst_56 : f32 to vector<64x128xf32>
    %119 = arith.select %20, %117, %118 : vector<64x128xi1>, vector<64x128xf32>
    %120 = arith.truncf %115 : vector<64x128xf32> to vector<64x128xbf16>
    %121 = arith.truncf %110 : vector<64x128xf32> to vector<64x128xbf16>
    %122 = arith.truncf %119 : vector<64x128xf32> to vector<64x128xbf16>
    %123 = tpu.concatenate %120, %121, %122 in 1 : vector<64x128xbf16>, vector<64x128xbf16>, vector<64x128xbf16> -> vector<64x384xbf16>
    %c3 = arith.constant 3 : index
    %c0_57 = arith.constant 0 : index
    %c0_58 = arith.constant 0 : index
    %124 = vector.load %arg5[%c3, %c0_57, %c0_58] : memref<10x384x128xbf16, #tpu.memory_space<vmem>>, vector<1x384x128xbf16>
    %125 = vector.shape_cast %124 : vector<1x384x128xbf16> to vector<384x128xbf16>
    %cst_59 = arith.constant dense<0.000000e+00> : vector<64x128xf32>
    %126 = tpu.matmul %123, %125, %cst_59 {dimension_numbers = #tpu.dot_dimension_numbers<[1], [0], [0], [1], [0, 0, 1, 1], [], []>} : vector<64x384xbf16>, vector<384x128xbf16>, vector<64x128xf32> -> vector<64x128xf32>
    %c3_60 = arith.constant 3 : index
    %c0_61 = arith.constant 0 : index
    %c0_62 = arith.constant 0 : index
    %127 = vector.load %arg6[%c3_60, %c0_61, %c0_62] : memref<10x1x128xf32, #tpu.memory_space<vmem>>, vector<1x1x128xf32>
    %128 = vector.shape_cast %127 : vector<1x1x128xf32> to vector<1x128xf32>
    %129 = vector.broadcast %128 : vector<1x128xf32> to vector<64x128xf32>
    %130 = arith.addf %126, %129 : vector<64x128xf32>
    %131 = arith.addf %86, %130 : vector<64x128xf32>
    %cst_63 = arith.constant 0.000000e+00 : f32
    %132 = vector.broadcast %cst_63 : f32 to vector<64x128xf32>
    %133 = arith.maximumf %31, %132 : vector<64x128xf32>
    %cst_64 = arith.constant 0.000000e+00 : f32
    %134 = vector.broadcast %cst_64 : f32 to vector<1x128xf32>
    %135 = vector.extract_strided_slice %133 {offsets = [0, 0], sizes = [63, 128], strides = [1, 1]} : vector<64x128xf32> to vector<63x128xf32>
    %136 = tpu.concatenate %134, %135 in 0 : vector<1x128xf32>, vector<63x128xf32> -> vector<64x128xf32>
    %cst_65 = arith.constant 0.000000e+00 : f32
    %137 = vector.broadcast %cst_65 : f32 to vector<64x128xf32>
    %138 = arith.select %18, %136, %137 : vector<64x128xi1>, vector<64x128xf32>
    %139 = vector.extract_strided_slice %133 {offsets = [1, 0], sizes = [63, 128], strides = [1, 1]} : vector<64x128xf32> to vector<63x128xf32>
    %140 = tpu.concatenate %139, %134 in 0 : vector<63x128xf32>, vector<1x128xf32> -> vector<64x128xf32>
    %cst_66 = arith.constant 0.000000e+00 : f32
    %141 = vector.broadcast %cst_66 : f32 to vector<64x128xf32>
    %142 = arith.select %20, %140, %141 : vector<64x128xi1>, vector<64x128xf32>
    %143 = arith.truncf %138 : vector<64x128xf32> to vector<64x128xbf16>
    %144 = arith.truncf %133 : vector<64x128xf32> to vector<64x128xbf16>
    %145 = arith.truncf %142 : vector<64x128xf32> to vector<64x128xbf16>
    %146 = tpu.concatenate %143, %144, %145 in 1 : vector<64x128xbf16>, vector<64x128xbf16>, vector<64x128xbf16> -> vector<64x384xbf16>
    %c4 = arith.constant 4 : index
    %c0_67 = arith.constant 0 : index
    %c0_68 = arith.constant 0 : index
    %147 = vector.load %arg5[%c4, %c0_67, %c0_68] : memref<10x384x128xbf16, #tpu.memory_space<vmem>>, vector<1x384x128xbf16>
    %148 = vector.shape_cast %147 : vector<1x384x128xbf16> to vector<384x128xbf16>
    %cst_69 = arith.constant dense<0.000000e+00> : vector<64x128xf32>
    %149 = tpu.matmul %146, %148, %cst_69 {dimension_numbers = #tpu.dot_dimension_numbers<[1], [0], [0], [1], [0, 0, 1, 1], [], []>} : vector<64x384xbf16>, vector<384x128xbf16>, vector<64x128xf32> -> vector<64x128xf32>
    %c4_70 = arith.constant 4 : index
    %c0_71 = arith.constant 0 : index
    %c0_72 = arith.constant 0 : index
    %150 = vector.load %arg6[%c4_70, %c0_71, %c0_72] : memref<10x1x128xf32, #tpu.memory_space<vmem>>, vector<1x1x128xf32>
    %151 = vector.shape_cast %150 : vector<1x1x128xf32> to vector<1x128xf32>
    %152 = vector.broadcast %151 : vector<1x128xf32> to vector<64x128xf32>
    %153 = arith.addf %149, %152 : vector<64x128xf32>
    %cst_73 = arith.constant 0.000000e+00 : f32
    %154 = vector.broadcast %cst_73 : f32 to vector<64x128xf32>
    %155 = arith.maximumf %153, %154 : vector<64x128xf32>
    %cst_74 = arith.constant 0.000000e+00 : f32
    %156 = vector.broadcast %cst_74 : f32 to vector<1x128xf32>
    %157 = vector.extract_strided_slice %155 {offsets = [0, 0], sizes = [63, 128], strides = [1, 1]} : vector<64x128xf32> to vector<63x128xf32>
    %158 = tpu.concatenate %156, %157 in 0 : vector<1x128xf32>, vector<63x128xf32> -> vector<64x128xf32>
    %cst_75 = arith.constant 0.000000e+00 : f32
    %159 = vector.broadcast %cst_75 : f32 to vector<64x128xf32>
    %160 = arith.select %18, %158, %159 : vector<64x128xi1>, vector<64x128xf32>
    %161 = vector.extract_strided_slice %155 {offsets = [1, 0], sizes = [63, 128], strides = [1, 1]} : vector<64x128xf32> to vector<63x128xf32>
    %162 = tpu.concatenate %161, %156 in 0 : vector<63x128xf32>, vector<1x128xf32> -> vector<64x128xf32>
    %cst_76 = arith.constant 0.000000e+00 : f32
    %163 = vector.broadcast %cst_76 : f32 to vector<64x128xf32>
    %164 = arith.select %20, %162, %163 : vector<64x128xi1>, vector<64x128xf32>
    %165 = arith.truncf %160 : vector<64x128xf32> to vector<64x128xbf16>
    %166 = arith.truncf %155 : vector<64x128xf32> to vector<64x128xbf16>
    %167 = arith.truncf %164 : vector<64x128xf32> to vector<64x128xbf16>
    %168 = tpu.concatenate %165, %166, %167 in 1 : vector<64x128xbf16>, vector<64x128xbf16>, vector<64x128xbf16> -> vector<64x384xbf16>
    %c5 = arith.constant 5 : index
    %c0_77 = arith.constant 0 : index
    %c0_78 = arith.constant 0 : index
    %169 = vector.load %arg5[%c5, %c0_77, %c0_78] : memref<10x384x128xbf16, #tpu.memory_space<vmem>>, vector<1x384x128xbf16>
    %170 = vector.shape_cast %169 : vector<1x384x128xbf16> to vector<384x128xbf16>
    %cst_79 = arith.constant dense<0.000000e+00> : vector<64x128xf32>
    %171 = tpu.matmul %168, %170, %cst_79 {dimension_numbers = #tpu.dot_dimension_numbers<[1], [0], [0], [1], [0, 0, 1, 1], [], []>} : vector<64x384xbf16>, vector<384x128xbf16>, vector<64x128xf32> -> vector<64x128xf32>
    %c5_80 = arith.constant 5 : index
    %c0_81 = arith.constant 0 : index
    %c0_82 = arith.constant 0 : index
    %172 = vector.load %arg6[%c5_80, %c0_81, %c0_82] : memref<10x1x128xf32, #tpu.memory_space<vmem>>, vector<1x1x128xf32>
    %173 = vector.shape_cast %172 : vector<1x1x128xf32> to vector<1x128xf32>
    %174 = vector.broadcast %173 : vector<1x128xf32> to vector<64x128xf32>
    %175 = arith.addf %171, %174 : vector<64x128xf32>
    %176 = arith.addf %175, %42 : vector<64x128xf32>
    %cst_83 = arith.constant 0.000000e+00 : f32
    %177 = vector.broadcast %cst_83 : f32 to vector<64x128xf32>
    %178 = arith.maximumf %42, %177 : vector<64x128xf32>
    %cst_84 = arith.constant 0.000000e+00 : f32
    %179 = vector.broadcast %cst_84 : f32 to vector<1x128xf32>
    %180 = vector.extract_strided_slice %178 {offsets = [0, 0], sizes = [63, 128], strides = [1, 1]} : vector<64x128xf32> to vector<63x128xf32>
    %181 = tpu.concatenate %179, %180 in 0 : vector<1x128xf32>, vector<63x128xf32> -> vector<64x128xf32>
    %cst_85 = arith.constant 0.000000e+00 : f32
    %182 = vector.broadcast %cst_85 : f32 to vector<64x128xf32>
    %183 = arith.select %18, %181, %182 : vector<64x128xi1>, vector<64x128xf32>
    %184 = vector.extract_strided_slice %178 {offsets = [1, 0], sizes = [63, 128], strides = [1, 1]} : vector<64x128xf32> to vector<63x128xf32>
    %185 = tpu.concatenate %184, %179 in 0 : vector<63x128xf32>, vector<1x128xf32> -> vector<64x128xf32>
    %cst_86 = arith.constant 0.000000e+00 : f32
    %186 = vector.broadcast %cst_86 : f32 to vector<64x128xf32>
    %187 = arith.select %20, %185, %186 : vector<64x128xi1>, vector<64x128xf32>
    %188 = arith.truncf %183 : vector<64x128xf32> to vector<64x128xbf16>
    %189 = arith.truncf %178 : vector<64x128xf32> to vector<64x128xbf16>
    %190 = arith.truncf %187 : vector<64x128xf32> to vector<64x128xbf16>
    %191 = tpu.concatenate %188, %189, %190 in 1 : vector<64x128xbf16>, vector<64x128xbf16>, vector<64x128xbf16> -> vector<64x384xbf16>
    %c6 = arith.constant 6 : index
    %c0_87 = arith.constant 0 : index
    %c0_88 = arith.constant 0 : index
    %192 = vector.load %arg5[%c6, %c0_87, %c0_88] : memref<10x384x128xbf16, #tpu.memory_space<vmem>>, vector<1x384x128xbf16>
    %193 = vector.shape_cast %192 : vector<1x384x128xbf16> to vector<384x128xbf16>
    %cst_89 = arith.constant dense<0.000000e+00> : vector<64x128xf32>
    %194 = tpu.matmul %191, %193, %cst_89 {dimension_numbers = #tpu.dot_dimension_numbers<[1], [0], [0], [1], [0, 0, 1, 1], [], []>} : vector<64x384xbf16>, vector<384x128xbf16>, vector<64x128xf32> -> vector<64x128xf32>
    %c6_90 = arith.constant 6 : index
    %c0_91 = arith.constant 0 : index
    %c0_92 = arith.constant 0 : index
    %195 = vector.load %arg6[%c6_90, %c0_91, %c0_92] : memref<10x1x128xf32, #tpu.memory_space<vmem>>, vector<1x1x128xf32>
    %196 = vector.shape_cast %195 : vector<1x1x128xf32> to vector<1x128xf32>
    %197 = vector.broadcast %196 : vector<1x128xf32> to vector<64x128xf32>
    %198 = arith.addf %194, %197 : vector<64x128xf32>
    %cst_93 = arith.constant 0.000000e+00 : f32
    %199 = vector.broadcast %cst_93 : f32 to vector<64x128xf32>
    %200 = arith.maximumf %198, %199 : vector<64x128xf32>
    %cst_94 = arith.constant 0.000000e+00 : f32
    %201 = vector.broadcast %cst_94 : f32 to vector<1x128xf32>
    %202 = vector.extract_strided_slice %200 {offsets = [0, 0], sizes = [63, 128], strides = [1, 1]} : vector<64x128xf32> to vector<63x128xf32>
    %203 = tpu.concatenate %201, %202 in 0 : vector<1x128xf32>, vector<63x128xf32> -> vector<64x128xf32>
    %cst_95 = arith.constant 0.000000e+00 : f32
    %204 = vector.broadcast %cst_95 : f32 to vector<64x128xf32>
    %205 = arith.select %18, %203, %204 : vector<64x128xi1>, vector<64x128xf32>
    %206 = vector.extract_strided_slice %200 {offsets = [1, 0], sizes = [63, 128], strides = [1, 1]} : vector<64x128xf32> to vector<63x128xf32>
    %207 = tpu.concatenate %206, %201 in 0 : vector<63x128xf32>, vector<1x128xf32> -> vector<64x128xf32>
    %cst_96 = arith.constant 0.000000e+00 : f32
    %208 = vector.broadcast %cst_96 : f32 to vector<64x128xf32>
    %209 = arith.select %20, %207, %208 : vector<64x128xi1>, vector<64x128xf32>
    %210 = arith.truncf %205 : vector<64x128xf32> to vector<64x128xbf16>
    %211 = arith.truncf %200 : vector<64x128xf32> to vector<64x128xbf16>
    %212 = arith.truncf %209 : vector<64x128xf32> to vector<64x128xbf16>
    %213 = tpu.concatenate %210, %211, %212 in 1 : vector<64x128xbf16>, vector<64x128xbf16>, vector<64x128xbf16> -> vector<64x384xbf16>
    %c7 = arith.constant 7 : index
    %c0_97 = arith.constant 0 : index
    %c0_98 = arith.constant 0 : index
    %214 = vector.load %arg5[%c7, %c0_97, %c0_98] : memref<10x384x128xbf16, #tpu.memory_space<vmem>>, vector<1x384x128xbf16>
    %215 = vector.shape_cast %214 : vector<1x384x128xbf16> to vector<384x128xbf16>
    %cst_99 = arith.constant dense<0.000000e+00> : vector<64x128xf32>
    %216 = tpu.matmul %213, %215, %cst_99 {dimension_numbers = #tpu.dot_dimension_numbers<[1], [0], [0], [1], [0, 0, 1, 1], [], []>} : vector<64x384xbf16>, vector<384x128xbf16>, vector<64x128xf32> -> vector<64x128xf32>
    %c7_100 = arith.constant 7 : index
    %c0_101 = arith.constant 0 : index
    %c0_102 = arith.constant 0 : index
    %217 = vector.load %arg6[%c7_100, %c0_101, %c0_102] : memref<10x1x128xf32, #tpu.memory_space<vmem>>, vector<1x1x128xf32>
    %218 = vector.shape_cast %217 : vector<1x1x128xf32> to vector<1x128xf32>
    %219 = vector.broadcast %218 : vector<1x128xf32> to vector<64x128xf32>
    %220 = arith.addf %216, %219 : vector<64x128xf32>
    %221 = arith.addf %31, %220 : vector<64x128xf32>
    %cst_103 = arith.constant 0.000000e+00 : f32
    %222 = vector.broadcast %cst_103 : f32 to vector<64x128xf32>
    %223 = arith.maximumf %31, %222 : vector<64x128xf32>
    %cst_104 = arith.constant 0.000000e+00 : f32
    %224 = vector.broadcast %cst_104 : f32 to vector<1x128xf32>
    %225 = vector.extract_strided_slice %223 {offsets = [0, 0], sizes = [63, 128], strides = [1, 1]} : vector<64x128xf32> to vector<63x128xf32>
    %226 = tpu.concatenate %224, %225 in 0 : vector<1x128xf32>, vector<63x128xf32> -> vector<64x128xf32>
    %cst_105 = arith.constant 0.000000e+00 : f32
    %227 = vector.broadcast %cst_105 : f32 to vector<64x128xf32>
    %228 = arith.select %18, %226, %227 : vector<64x128xi1>, vector<64x128xf32>
    %229 = vector.extract_strided_slice %223 {offsets = [1, 0], sizes = [63, 128], strides = [1, 1]} : vector<64x128xf32> to vector<63x128xf32>
    %230 = tpu.concatenate %229, %224 in 0 : vector<63x128xf32>, vector<1x128xf32> -> vector<64x128xf32>
    %cst_106 = arith.constant 0.000000e+00 : f32
    %231 = vector.broadcast %cst_106 : f32 to vector<64x128xf32>
    %232 = arith.select %20, %230, %231 : vector<64x128xi1>, vector<64x128xf32>
    %233 = arith.truncf %228 : vector<64x128xf32> to vector<64x128xbf16>
    %234 = arith.truncf %223 : vector<64x128xf32> to vector<64x128xbf16>
    %235 = arith.truncf %232 : vector<64x128xf32> to vector<64x128xbf16>
    %236 = tpu.concatenate %233, %234, %235 in 1 : vector<64x128xbf16>, vector<64x128xbf16>, vector<64x128xbf16> -> vector<64x384xbf16>
    %c8 = arith.constant 8 : index
    %c0_107 = arith.constant 0 : index
    %c0_108 = arith.constant 0 : index
    %237 = vector.load %arg5[%c8, %c0_107, %c0_108] : memref<10x384x128xbf16, #tpu.memory_space<vmem>>, vector<1x384x128xbf16>
    %238 = vector.shape_cast %237 : vector<1x384x128xbf16> to vector<384x128xbf16>
    %cst_109 = arith.constant dense<0.000000e+00> : vector<64x128xf32>
    %239 = tpu.matmul %236, %238, %cst_109 {dimension_numbers = #tpu.dot_dimension_numbers<[1], [0], [0], [1], [0, 0, 1, 1], [], []>} : vector<64x384xbf16>, vector<384x128xbf16>, vector<64x128xf32> -> vector<64x128xf32>
    %c8_110 = arith.constant 8 : index
    %c0_111 = arith.constant 0 : index
    %c0_112 = arith.constant 0 : index
    %240 = vector.load %arg6[%c8_110, %c0_111, %c0_112] : memref<10x1x128xf32, #tpu.memory_space<vmem>>, vector<1x1x128xf32>
    %241 = vector.shape_cast %240 : vector<1x1x128xf32> to vector<1x128xf32>
    %242 = vector.broadcast %241 : vector<1x128xf32> to vector<64x128xf32>
    %243 = arith.addf %239, %242 : vector<64x128xf32>
    %cst_113 = arith.constant 0.000000e+00 : f32
    %244 = vector.broadcast %cst_113 : f32 to vector<64x128xf32>
    %245 = arith.maximumf %243, %244 : vector<64x128xf32>
    %cst_114 = arith.constant 0.000000e+00 : f32
    %246 = vector.broadcast %cst_114 : f32 to vector<1x128xf32>
    %247 = vector.extract_strided_slice %245 {offsets = [0, 0], sizes = [63, 128], strides = [1, 1]} : vector<64x128xf32> to vector<63x128xf32>
    %248 = tpu.concatenate %246, %247 in 0 : vector<1x128xf32>, vector<63x128xf32> -> vector<64x128xf32>
    %cst_115 = arith.constant 0.000000e+00 : f32
    %249 = vector.broadcast %cst_115 : f32 to vector<64x128xf32>
    %250 = arith.select %18, %248, %249 : vector<64x128xi1>, vector<64x128xf32>
    %251 = vector.extract_strided_slice %245 {offsets = [1, 0], sizes = [63, 128], strides = [1, 1]} : vector<64x128xf32> to vector<63x128xf32>
    %252 = tpu.concatenate %251, %246 in 0 : vector<63x128xf32>, vector<1x128xf32> -> vector<64x128xf32>
    %cst_116 = arith.constant 0.000000e+00 : f32
    %253 = vector.broadcast %cst_116 : f32 to vector<64x128xf32>
    %254 = arith.select %20, %252, %253 : vector<64x128xi1>, vector<64x128xf32>
    %255 = arith.truncf %250 : vector<64x128xf32> to vector<64x128xbf16>
    %256 = arith.truncf %245 : vector<64x128xf32> to vector<64x128xbf16>
    %257 = arith.truncf %254 : vector<64x128xf32> to vector<64x128xbf16>
    %258 = tpu.concatenate %255, %256, %257 in 1 : vector<64x128xbf16>, vector<64x128xbf16>, vector<64x128xbf16> -> vector<64x384xbf16>
    %c9 = arith.constant 9 : index
    %c0_117 = arith.constant 0 : index
    %c0_118 = arith.constant 0 : index
    %259 = vector.load %arg5[%c9, %c0_117, %c0_118] : memref<10x384x128xbf16, #tpu.memory_space<vmem>>, vector<1x384x128xbf16>
    %260 = vector.shape_cast %259 : vector<1x384x128xbf16> to vector<384x128xbf16>
    %cst_119 = arith.constant dense<0.000000e+00> : vector<64x128xf32>
    %261 = tpu.matmul %258, %260, %cst_119 {dimension_numbers = #tpu.dot_dimension_numbers<[1], [0], [0], [1], [0, 0, 1, 1], [], []>} : vector<64x384xbf16>, vector<384x128xbf16>, vector<64x128xf32> -> vector<64x128xf32>
    %c9_120 = arith.constant 9 : index
    %c0_121 = arith.constant 0 : index
    %c0_122 = arith.constant 0 : index
    %262 = vector.load %arg6[%c9_120, %c0_121, %c0_122] : memref<10x1x128xf32, #tpu.memory_space<vmem>>, vector<1x1x128xf32>
    %263 = vector.shape_cast %262 : vector<1x1x128xf32> to vector<1x128xf32>
    %264 = vector.broadcast %263 : vector<1x128xf32> to vector<64x128xf32>
    %265 = arith.addf %261, %264 : vector<64x128xf32>
    %266 = arith.addf %131, %265 : vector<64x128xf32>
    %c0_123 = arith.constant 0 : index
    %c0_124 = arith.constant 0 : index
    %c0_125 = arith.constant 0 : index
    %267 = vector.load %arg7[%c0_123, %c0_124, %c0_125] : memref<4x64x128xf32, #tpu.memory_space<vmem>>, vector<1x64x128xf32>
    %268 = vector.shape_cast %267 : vector<1x64x128xf32> to vector<64x128xf32>
    %269 = vector.shape_cast %131 : vector<64x128xf32> to vector<1x64x128xf32>
    tpu.vector_store %arg7[%c0_123, %c0_124, %c0_125], %269 {strides = array<i32>} : memref<4x64x128xf32, #tpu.memory_space<vmem>>, vector<1x64x128xf32>,
    %c1_126 = arith.constant 1 : index
    %c0_127 = arith.constant 0 : index
    %c0_128 = arith.constant 0 : index
    %270 = vector.load %arg7[%c1_126, %c0_127, %c0_128] : memref<4x64x128xf32, #tpu.memory_space<vmem>>, vector<1x64x128xf32>
    %271 = vector.shape_cast %270 : vector<1x64x128xf32> to vector<64x128xf32>
    %272 = vector.shape_cast %176 : vector<64x128xf32> to vector<1x64x128xf32>
    tpu.vector_store %arg7[%c1_126, %c0_127, %c0_128], %272 {strides = array<i32>} : memref<4x64x128xf32, #tpu.memory_space<vmem>>, vector<1x64x128xf32>,
    %c2_129 = arith.constant 2 : index
    %c0_130 = arith.constant 0 : index
    %c0_131 = arith.constant 0 : index
    %273 = vector.load %arg7[%c2_129, %c0_130, %c0_131] : memref<4x64x128xf32, #tpu.memory_space<vmem>>, vector<1x64x128xf32>
    %274 = vector.shape_cast %273 : vector<1x64x128xf32> to vector<64x128xf32>
    %275 = vector.shape_cast %221 : vector<64x128xf32> to vector<1x64x128xf32>
    tpu.vector_store %arg7[%c2_129, %c0_130, %c0_131], %275 {strides = array<i32>} : memref<4x64x128xf32, #tpu.memory_space<vmem>>, vector<1x64x128xf32>,
    %c3_132 = arith.constant 3 : index
    %c0_133 = arith.constant 0 : index
    %c0_134 = arith.constant 0 : index
    %276 = vector.load %arg7[%c3_132, %c0_133, %c0_134] : memref<4x64x128xf32, #tpu.memory_space<vmem>>, vector<1x64x128xf32>
    %277 = vector.shape_cast %276 : vector<1x64x128xf32> to vector<64x128xf32>
    %278 = vector.shape_cast %266 : vector<64x128xf32> to vector<1x64x128xf32>
    tpu.vector_store %arg7[%c3_132, %c0_133, %c0_134], %278 {strides = array<i32>} : memref<4x64x128xf32, #tpu.memory_space<vmem>>, vector<1x64x128xf32>,
    return
  }
  func.func @transform_0(%arg0: i32) -> (i32, i32) {
    %c0_i32 = arith.constant 0 : i32
    %c0_i32_0 = arith.constant 0 : i32
    return %arg0, %c0_i32 : i32, i32
  }
  func.func @transform_1(%arg0: i32) -> (i32, i32) {
    %c0_i32 = arith.constant 0 : i32
    %c0_i32_0 = arith.constant 0 : i32
    return %arg0, %c0_i32 : i32, i32
  }
  func.func @transform_2(%arg0: i32) -> (i32, i32, i32) {
    %c0_i32 = arith.constant 0 : i32
    %c0_i32_0 = arith.constant 0 : i32
    %c0_i32_1 = arith.constant 0 : i32
    %c0_i32_2 = arith.constant 0 : i32
    return %c0_i32, %c0_i32_0, %c0_i32_1 : i32, i32, i32
  }
  func.func @transform_3(%arg0: i32) -> (i32, i32, i32) {
    %c0_i32 = arith.constant 0 : i32
    %c0_i32_0 = arith.constant 0 : i32
    %c0_i32_1 = arith.constant 0 : i32
    %c0_i32_2 = arith.constant 0 : i32
    return %c0_i32, %c0_i32_0, %c0_i32_1 : i32, i32, i32
  }
  func.func @transform_4(%arg0: i32) -> (i32, i32, i32) {
    %c0_i32 = arith.constant 0 : i32
    %c0_i32_0 = arith.constant 0 : i32
    %c0_i32_1 = arith.constant 0 : i32
    %c0_i32_2 = arith.constant 0 : i32
    return %c0_i32, %c0_i32_0, %c0_i32_1 : i32, i32, i32
  }
  func.func @transform_5(%arg0: i32) -> (i32, i32, i32) {
    %c0_i32 = arith.constant 0 : i32
    %c0_i32_0 = arith.constant 0 : i32
    %c0_i32_1 = arith.constant 0 : i32
    %c0_i32_2 = arith.constant 0 : i32
    return %c0_i32, %c0_i32_0, %c0_i32_1 : i32, i32, i32
  }
  func.func @transform_6(%arg0: i32) -> (i32, i32, i32) {
    %c0_i32 = arith.constant 0 : i32
    %c0_i32_0 = arith.constant 0 : i32
    %c0_i32_1 = arith.constant 0 : i32
    return %c0_i32, %arg0, %c0_i32_0 : i32, i32, i32
  }
}

</mosaic_0001>

<bundles_post_ra>
// kernel: cell_forward.1
= control target key start
LH: loop header
LB: loop body
LE: loop exit
PB: predicated region body
PF: predicated region fallthrough
CT: control target
= control target key end

     0   :  { %11 = vsyncpa [#allocation3], 0  ;;  %s8091_s0 = inlined_call_operand.vmem [shape: f32[128,128], index: 0, kind: input, shape index: {}]   ;;  %s8092_s1 = inlined_call_operand.vmem [shape: f32[128,128], index: 1, kind: input, shape index: {}]   ;;  %s8093_s2 = inlined_call_operand.hbm [shape: bf16[2,128,128], index: 2, kind: input, shape index: {}]   ;;  %s8094_s3 = inlined_call_operand.hbm [shape: f32[2,1,128], index: 3, kind: input, shape index: {}]   ;;  %s8095_s4 = inlined_call_operand.hbm [shape: bf16[10,384,128], index: 4, kind: input, shape index: {}]   ;;  %s8096_s5 = inlined_call_operand.hbm [shape: f32[10,1,128], index: 5, kind: input, shape index: {}]   ;;  %s8097_s6 = inlined_call_operand.vmem [shape: f32[4,128,128], index: 6, kind: output, shape index: {}]  }
   0x1   :  { %12 = vsyncpa [#allocation5], 0 }
   0x2   :  { %13 = vsyncpa [#allocation8], 0  ;;  %s6992_s21 = smov 0   ;;  %s6994_s22 = smov 0  }
   0x3   :  { %s6996_s23 = smov 0  }
   0x4 LB: > { %s7005_s24 = sadd.s32 4294967295, %s6947_s23   ;;  %s7007_s25 = sadd.s32 1, %s6947_s23   ;;  %s6947_s23 = sphi %s6996_s23, %s8230_s23   ;;  %s6943_s22 = sphi %s6994_s22, %s8229_s22   ;;  %s6939_s21 = sphi %s6992_s21, %s8228_s21  }
   0x5   : > { %s159_s26 = ssub.s32 %s6947_s23, %s7007_s25  ;;  %s162_s27 = sadd.s32 1, %s6943_s22 }
   0x6   : > { %p160_p0 = scmp.eq.s32.totalorder %s159_s26, 0  ;;  %p172_p1 = scmp.ne.s32.totalorder %s6943_s22, %s6939_s21 }
   0x7   : > { %p173_p2 = scmp.eq.s32.totalorder %s7005_s24, 1  ;;  %p5058_p3 = scmp.ge.s32.totalorder %s6947_s23, 1 }
   0x8   : > { %s7015_s28 = scalar_select %p160_p0, %s6943_s22, %s162_s27  }
   0x9   : > { %p7017_p4 = por %p173_p2, %p172_p1  ;;  %p186_p5 = scmp.lt.s32.totalorder %s6947_s23, 3 }
   0xa   : > { %p8098_p6 = scmp.eq.s32.totalorder %s7005_s24, 0  ;;  %s6949_s7 = smov [#allocation4]  }
   0xb   : > { %s8127_s29 = scalar_select %p7017_p4, 1, 0 }
   0xc   : > { %p7022_p7 = pnand %p5058_p3, %p186_p5  ;;  %s211_s8 = sshll.u32 %s6949_s7, 4  ;;  %s212_s8 = int_to_ptr.vmem [resolvable:$true] %s211_s8 }
   0xd   : > { %s6950_s10 = smov [#allocation2]   ;;  %s6801_s14 = scalar_lea.hbm %s8094_s3, 32 }
   0xe   : > { %s8128_s30 = scalar_select %p7022_p7, 1, 0 }
   0xf   : > { %p6484_p8 = pneg %p7022_p7  ;;  %s198_s11 = sshll.u32 %s6950_s10, 4  ;;  %s7034_s11 = int_to_ptr.vmem [resolvable:$true] %s198_s11 }
  0x10   : > { %p6802_p10 = scmp.ne.s32.totalorder %s8094_s3, %s6801_s14  ;;  %p6808_p0 = scmp.lt.u32.totalorder %s6801_s14, %s8094_s3 }
  0x11   : > { %p7030_p9 = pnand %p8098_p6, %p6484_p8 }
  0x13   : > { %p7044_p11 = pneg %p7030_p9 }
  0x15   : > { %p6804_p12 = pnand %p7044_p11, %p6802_p10 }
  0x17   : > { %p6805_p13 = pneg %p6804_p12 }
  0x19   : > { %p6810_p1 = pnand %p6808_p0, %p6805_p13 }
  0x1b   : > { %6813 = shalt.err (!%p6810_p1)
}
  0x1c   : > { %s6814_s20 = scalar_lea.vmem %s212_s8, 32  ;;  %p6822_p8 = scmp.lt.s32.totalorder %s212_s8, %s212_s8 }
  0x1d   : > { %p6815_p2 = scmp.ne.s32.totalorder %s212_s8, %s6814_s20  ;;  %p6823_p6 = scmp.lt.s32.totalorder %s6814_s20, %s6814_s20 }
  0x1f   : > { %p6817_p3 = pnand %p6815_p2, %p7044_p11  ;;  %p6824_p4 = por %p6823_p6, %p6822_p8 }
  0x21   : > { %p6818_p5 = pneg %p6817_p3 }
  0x23   : > { %p6825_p7 = pnand %p6824_p4, %p6818_p5 }
  0x25   : > { %6828 = shalt.err (!%p6825_p7)
}
  0x26   : > { %s8100_s23 = smov 16   ;;  %s6952_s26 = smov 1  }
  0x27   : > { %6490 = dma.hbm_to_vmem [thread:$0]  (!%p7030_p9), %s8094_s3, 32, %s212_s8, [#allocation5], %s8100_s23, %s8100_s23, %s6952_s26  }
  0x28   : > { %s6829_s13 = scalar_lea.hbm %s8093_s2, 2048 }
  0x29   : > { %p6830_p4 = scmp.ne.s32.totalorder %s8093_s2, %s6829_s13  ;;  %p6836_p10 = scmp.lt.u32.totalorder %s6829_s13, %s8093_s2 }
  0x2b   : > { %p6832_p6 = pnand %p6830_p4, %p7044_p11 }
  0x2d   : > { %p6833_p7 = pneg %p6832_p6 }
  0x2f   : > { %p6838_p12 = pnand %p6836_p10, %p6833_p7 }
  0x31   : > { %6841 = shalt.err (!%p6838_p12)
}
  0x32   : > { %s6842_s8 = scalar_lea.vmem %s7034_s11, 2048  ;;  %p6850_p2 = scmp.lt.s32.totalorder %s7034_s11, %s7034_s11 }
  0x33   : > { %p6843_p13 = scmp.ne.s32.totalorder %s7034_s11, %s6842_s8  ;;  %p6851_p3 = scmp.lt.s32.totalorder %s6842_s8, %s6842_s8 }
  0x35   : > { %p6845_p0 = pnand %p6843_p13, %p7044_p11  ;;  %p6852_p5 = por %p6851_p3, %p6850_p2 }
  0x37   : > { %p6846_p1 = pneg %p6845_p0 }
  0x39   : > { %p6853_p8 = pnand %p6852_p5, %p6846_p1 }
  0x3b   : > { %6856 = shalt.err (!%p6853_p8)
}
  0x3c   : > { %s6953_s19 = smov 64   ;;  %s6954_s20 = smov 4  }
  0x3d   : > { %6487 = dma.hbm_to_vmem [thread:$0]  (!%p7030_p9), %s8093_s2, 2048, %s7034_s11, [#allocation3], %s6953_s19, %s6953_s19, %s6954_s20  }
  0x3e   : > { %s6955_s10 = smov [#allocation6]   ;;  %s6956_s13 = smov [#allocation7]  }
  0x3f   : > { %s224_s12 = sshll.u32 %s6955_s10, 4  ;;  %s237_s14 = sshll.u32 %s6956_s13, 4  ;;  %s225_s12 = int_to_ptr.vmem [resolvable:$true] %s224_s12  ;;  %s7086_s14 = int_to_ptr.vmem [resolvable:$true] %s237_s14 }
  0x40   : > { %s6857_s18 = scalar_lea.hbm %s8095_s4, 30720 }
  0x41   : > { %p6858_p4 = scmp.ne.s32.totalorder %s8095_s4, %s6857_s18  ;;  %p6864_p10 = scmp.lt.u32.totalorder %s6857_s18, %s8095_s4 }
  0x43   : > { %p6860_p6 = pnand %p6858_p4, %p7044_p11 }
  0x45   : > { %p6861_p7 = pneg %p6860_p6 }
  0x47   : > { %p6866_p12 = pnand %p6864_p10, %p6861_p7 }
  0x49   : > { %6869 = shalt.err (!%p6866_p12)
}
  0x4a   : > { %s6870_s7 = scalar_lea.vmem %s225_s12, 30720  ;;  %p6878_p2 = scmp.lt.s32.totalorder %s225_s12, %s225_s12 }
  0x4b   : > { %p6871_p13 = scmp.ne.s32.totalorder %s225_s12, %s6870_s7  ;;  %p6879_p3 = scmp.lt.s32.totalorder %s6870_s7, %s6870_s7 }
  0x4d   : > { %p6873_p0 = pnand %p6871_p13, %p7044_p11  ;;  %p6880_p5 = por %p6879_p3, %p6878_p2 }
  0x4f   : > { %p6874_p1 = pneg %p6873_p0 }
  0x51   : > { %p6881_p8 = pnand %p6880_p5, %p6874_p1 }
  0x53   : > { %6884 = shalt.err (!%p6881_p8)
}
  0x54   : > { %6493 = dma.hbm_to_vmem [thread:$0]  (!%p7030_p9), %s8095_s4, 30720, %s225_s12, [#allocation5], %s6953_s19, %s6953_s19, %s6954_s20  }
  0x55   : > { %s6885_s16 = scalar_lea.hbm %s8096_s5, 160 }
  0x56   : > { %p6886_p4 = scmp.ne.s32.totalorder %s8096_s5, %s6885_s16  ;;  %p6892_p10 = scmp.lt.u32.totalorder %s6885_s16, %s8096_s5 }
  0x58   : > { %p6888_p6 = pnand %p6886_p4, %p7044_p11 }
  0x5a   : > { %p6889_p7 = pneg %p6888_p6 }
  0x5c   : > { %p6894_p12 = pnand %p6892_p10, %p6889_p7 }
  0x5e   : > { %6897 = shalt.err (!%p6894_p12)
}
  0x5f   : > { %s6898_s19 = scalar_lea.vmem %s7086_s14, 160  ;;  %p6906_p2 = scmp.lt.s32.totalorder %s7086_s14, %s7086_s14 }
  0x60   : > { %p6899_p13 = scmp.ne.s32.totalorder %s7086_s14, %s6898_s19  ;;  %p6907_p3 = scmp.lt.s32.totalorder %s6898_s19, %s6898_s19 }
  0x62   : > { %p6901_p0 = pnand %p6899_p13, %p7044_p11  ;;  %p6908_p5 = por %p6907_p3, %p6906_p2 }
  0x64   : > { %p6902_p1 = pneg %p6901_p0 }
  0x66   : > { %p6909_p8 = pnand %p6908_p5, %p6902_p1 }
  0x68   : > { %6912 = shalt.err (!%p6909_p8)
}
  0x69   : > { %s8131_s20 = smov 16   ;;  %p8132_p4 = scmp.ne.s32.totalorder %s8128_s30, 0 }
  0x6a   : > { %6496 = dma.hbm_to_vmem [thread:$0]  (!%p7030_p9), %s8096_s5, 160, %s7086_s14, [#allocation8], %s8131_s20, %s8131_s20, %s6952_s26  }
  0x6b   : > { %271 = sbr.rel (%p8132_p4) target bundleno = 1929 (0x789), region = 44 }
  0x72   : > { %p8133_p11 = scmp.eq.s32.totalorder %s7005_s24, 0 }
  0x74   : > { %6926 = dma.done.wait (%p8133_p11), [#allocation3], 2048   ;;  %p8134_p6 = pmov %p8133_p11 }
  0x76   : > { %6928 = vsyncadd (%p8134_p6), [#allocation3], 4294965248  ;;  %p8135_p7 = pmov %p8134_p6 }
  0x77   : > { %p8136_p10 = pmov %p8134_p6 }
  0x78   : > { %6930 = dma.done.wait (%p8135_p7), [#allocation5], 30752  }
  0x79   : > { %6932 = vsyncadd (%p8136_p10), [#allocation5], 4294936544  ;;  %p8137_p12 = pmov %p8134_p6 }
  0x7a   : > { %p8138_p9 = pmov %p8134_p6 }
  0x7b   : > { %6934 = dma.done.wait (%p8137_p12), [#allocation8], 160  }
  0x7c   : > { %6936 = vsyncadd (%p8138_p9), [#allocation8], 4294967136  ;;  %s5070_s30 = sshll.u32 %s7005_s24, 3  ;;  %v6537_v0 = vld [vmem:[#allocation2] sm:$0xff]   ;;  %v6538_v1 = vld [vmem:[#allocation2 + $0x8] sm:$0xff]   ;;  %vm782_vm0 = vcmask 1040384  }
  0x7d   : > { %p318_p13 = scmp.lt.s32.totalorder %s5070_s30, 15  ;;  %6156 = vmatprep.subr.bf16.mxu0 %v6537_v0  ;;  %v6539_v2 = vld [vmem:[#allocation2 + $0x10] sm:$0xff]   ;;  %v6540_v3 = vld [vmem:[#allocation2 + $0x18] sm:$0xff]   ;;  %v6545_v8 = vld [vmem:[#allocation2 + $0x40] sm:$0xff]   ;;  %vm815_vm1 = vcmask 1046528   ;;  %s314_s15 = sand.u32 1, %s6939_s21  }
  0x7e   : > { %6157 = vmatpush3.bf16.msra.mxu0 %v6537_v0  ;;  %v6541_v9 = vld [vmem:[#allocation2 + $0x20] sm:$0xff]   ;;  %6180 = vmatprep.subr.bf16.mxu1 %v6545_v8  ;;  %v6546_v11 = vld [vmem:[#allocation2 + $0x48] sm:$0xff]   ;;  %v6547_v12 = vld [vmem:[#allocation2 + $0x50] sm:$0xff]   ;;  %s5069_s16 = sshll.u32 %s314_s15, 8  ;;  %p8227_p0 = scmp.ne.s32.totalorder %s8127_s29, 0 }
  0x7f   : > { %s8232_s30 = smov (!%p318_p13, %s5070_s30), 15  ;;  %6158 = vmatprep.subr.bf16.mxu0 %v6538_v1  ;;  %6181 = vmatpush3.bf16.msra.mxu1 %v6545_v8  ;;  %v6542_v13 = vld [vmem:[#allocation2 + $0x28] sm:$0xff]   ;;  %v6548_v14 = vld [vmem:[#allocation2 + $0x58] sm:$0xff]   ;;  %v6543_v17 = vld [vmem:[#allocation2 + $0x30] sm:$0xff]   ;;  %s7740_s21 = scalar_lea.vmem [#allocation9], %s5069_s16 }
  0x80   : > { %s5071_s9 = sshll.u32 %s8232_s30, 3  ;;  %6182 = vmatprep.subr.bf16.mxu1 %v6546_v11  ;;  %v6549_v22 = vld [vmem:[#allocation2 + $0x60] sm:$0xff]   ;;  %v6544_v25 = vld [vmem:[#allocation2 + $0x38] sm:$0xff]   ;;  %v6550_v32 = vld [vmem:[#allocation2 + $0x68] sm:$0xff]   ;;  %s5611_s18 = sshll.u32 (%p8227_p0), %s7005_s24, 6 }
  0x81   : > { %s7153_s14 = scalar_lea.vmem %s8091_s0, %s5071_s9  ;;  %s7160_s13 = scalar_lea.vmem %s8092_s1, %s5071_s9  ;;  %v6551_v35 = vld [vmem:[#allocation2 + $0x70] sm:$0xff]   ;;  %v6553_v37 = vld [vmem:[#allocation6 + $0x40] sm:$0xff]   ;;  %v6552_v46 = vld [vmem:[#allocation2 + $0x78] sm:$0xff]  }
  0x82   : > { %6159 = vmatpush3.bf16.msra.mxu0 %v6538_v1  ;;  %v452_v4 = vld [vmem:[%s7153_s14] sm:$0xff]  ;;  %v453_v5 = vld [vmem:[%s7153_s14 + $0x8] sm:$0xff]  ;;  %v454_v18 = vld [vmem:[%s7153_s14 + $0x10] sm:$0xff]  ;;  %s8018_s11 = scalar_lea.vmem (%p8227_p0), %s8097_s6, %s5611_s18 }
  0x83   : > { %6160 = vmatprep.subr.bf16.mxu0 %v6539_v2  ;;  %v460_v6 = vmax.f32 %v452_v4, 0.0  ;;  %v461_v7 = vmax.f32 %v453_v5, 0.0  ;;  %6183 = vmatpush3.bf16.msra.mxu1 %v6546_v11  ;;  %v608_v15 = vld [vmem:[%s7160_s13] sm:$0xff]  ;;  %v609_v16 = vld [vmem:[%s7160_s13 + $0x8] sm:$0xff]  ;;  %v455_v21 = vld [vmem:[%s7153_s14 + $0x18] sm:$0xff]  ;;  %v462_v26 = vmax.f32 %v454_v18, 0.0  ;;  %v331_v18 = vlaneseq }
  0x84   : > { %6184 = vmatprep.subr.bf16.mxu1 %v6547_v12  ;;  %v616_v19 = vmax.f32 %v608_v15, 0.0  ;;  %v617_v20 = vmax.f32 %v609_v16, 0.0  ;;  %v456_v24 = vld [vmem:[%s7153_s14 + $0x20] sm:$0xff]  ;;  %v463_v27 = vmax.f32 %v455_v21, 0.0  ;;  %v457_v28 = vld [vmem:[%s7153_s14 + $0x28] sm:$0xff]  ;;  %v458_v29 = vld [vmem:[%s7153_s14 + $0x30] sm:$0xff] }
  0x85   : > { %v468_v10 = vpack.c.bf16 %v461_v7, %v460_v6  ;;  %v464_v30 = vmax.f32 %v456_v24, 0.0  ;;  %v459_v31 = vld [vmem:[%s7153_s14 + $0x38] sm:$0xff]  ;;  %v465_v33 = vmax.f32 %v457_v28, 0.0  ;;  %v610_v34 = vld [vmem:[%s7160_s13 + $0x10] sm:$0xff]  ;;  %v6554_v38 = vld [vmem:[#allocation6] sm:$0xff]   ;;  %v466_v41 = vmax.f32 %v458_v29, 0.0 }
  0x86   : > { %6161 = vmatpush3.bf16.msra.mxu0 %v6539_v2  ;;  %v624_v23 = vpack.c.bf16 %v617_v20, %v616_v19  ;;  %v611_v36 = vld [vmem:[%s7160_s13 + $0x18] sm:$0xff]  ;;  %v612_v39 = vld [vmem:[%s7160_s13 + $0x20] sm:$0xff]  ;;  %v469_v40 = vpack.c.bf16 %v463_v27, %v462_v26  ;;  %v613_v42 = vld [vmem:[%s7160_s13 + $0x28] sm:$0xff]  ;;  %v467_v44 = vmax.f32 %v459_v31, 0.0  ;;  %v618_v47 = vmax.f32 %v610_v34, 0.0 }
  0x87   : > { %6162 = vmatprep.subr.bf16.mxu0 %v6540_v3  ;;  %6172 = vmatprep.mubr.bf16.mxu0 %v468_v10  ;;  %v470_v43 = vpack.c.bf16 %v465_v33, %v464_v30  ;;  %v614_v45 = vld [vmem:[%s7160_s13 + $0x30] sm:$0xff]  ;;  %v619_v49 = vmax.f32 %v611_v36, 0.0  ;;  %v615_v50 = vld [vmem:[%s7160_s13 + $0x38] sm:$0xff]  ;;  %v620_v51 = vmax.f32 %v612_v39, 0.0  ;;  %v621_v52 = vmax.f32 %v613_v42, 0.0  ;;  %v6557_v56 = vld [vmem:[#allocation6 + $0x80] sm:$0xff]  }
  0x88   : > { %6185 = vmatpush3.bf16.msra.mxu1 %v6547_v12  ;;  %6196 = vmatprep.mubr.bf16.mxu1 %v624_v23  ;;  %v6555_v48 = vld [vmem:[#allocation6 + $0x48] sm:$0xff]   ;;  %v622_v53 = vmax.f32 %v614_v45, 0.0  ;;  %v623_v55 = vmax.f32 %v615_v50, 0.0  ;;  %v6558_v57 = vld [vmem:[#allocation6 + $0x50] sm:$0xff]   ;;  %v471_v59 = vpack.c.bf16 %v467_v44, %v466_v41  ;;  %v6561_v60 = vld [vmem:[#allocation6 + $0x58] sm:$0xff]   ;;  %v7179_v19 = vshrl.u32 %v331_v18, 7 }
  0x89   : > { %6186 = vmatprep.subr.bf16.mxu1 %v6548_v14  ;;  %v6556_v54 = vld [vmem:[#allocation6 + $0x8] sm:$0xff]   ;;  %v6559_v58 = vld [vmem:[#allocation6 + $0x10] sm:$0xff]   ;;  %v625_v61 = vpack.c.bf16 %v619_v49, %v618_v47  ;;  %v626_v63 = vpack.c.bf16 %v621_v52, %v620_v51  ;;  %v6562_v0 = vld [vmem:[#allocation6 + $0x18] sm:$0xff]  }
  0x8a   : > { %6163 = vmatpush3.bf16.msra.mxu0 %v6540_v3  ;;  %v6560_v62 = vld [vmem:[#allocation6 + $0x88] sm:$0xff]   ;;  %v6564_v1 = vld [vmem:[#allocation6 + $0x60] sm:$0xff]   ;;  %v6563_v2 = vld [vmem:[#allocation6 + $0x90] sm:$0xff]   ;;  %v627_v4 = vpack.c.bf16 %v623_v55, %v622_v53  ;;  %v333_v20 = vadd.s32 8, %v7179_v19  ;;  %v7186_v23 = vadd.s32 24, %v7179_v19  ;;  %v344_v27 = vand.u32 7, %v7179_v19 }
  0x8b   : > { %6164 = vmatprep.subr.bf16.mxu0 %v6541_v9  ;;  %v6565_v3 = vld [vmem:[#allocation6 + $0x20] sm:$0xff]   ;;  %v6566_v5 = vld [vmem:[#allocation6 + $0x98] sm:$0xff]   ;;  %v6567_v6 = vld [vmem:[#allocation6 + $0x68] sm:$0xff]   ;;  %v7201_v36 = vadd.s32 32, %v7179_v19  ;;  %v7218_v42 = vadd.s32 40, %v7179_v19 }
  0x8c   : > { %6187 = vmatpush3.bf16.msra.mxu1 %v6548_v14  ;;  %v6568_v7 = vld [vmem:[#allocation6 + $0x28] sm:$0xff]   ;;  %v6569_v8 = vld [vmem:[#allocation6 + $0xa0] sm:$0xff]   ;;  %v6571_v10 = vld [vmem:[#allocation6 + $0x30] sm:$0xff]   ;;  %v351_v28 = vand.u32 7, %v333_v20  ;;  %vm7209_vm2 = vcmp.gt.s32.totalorder %v344_v27, 0  ;;  %vm7223_vm4 = vcmp.lt.s32.totalorder %v344_v27, 7 }
  0x8d   : > { %6188 = vmatprep.subr.bf16.mxu1 %v6549_v22  ;;  %v6572_v11 = vld [vmem:[#allocation6 + $0xa8] sm:$0xff]   ;;  %v6573_v12 = vld [vmem:[#allocation6 + $0x78] sm:$0xff]   ;;  %v6575_v14 = vld [vmem:[#allocation6 + $0xb0] sm:$0xff]   ;;  %v372_v50 = vand.u32 7, %v7201_v36 }
  0x8e   : > { %6165 = vmatpush3.bf16.msra.mxu0 %v6541_v9  ;;  %v6570_v9 = vld [vmem:[#allocation6 + $0x70] sm:$0xff]   ;;  %v6576_v15 = vld [vmem:[#allocation6 + $0xb8] sm:$0xff]   ;;  %v6577_v16 = vld [vmem:[#allocation6 + $0x100] sm:$0xff]   ;;  %vm7213_vm3 = vcmp.gt.s32.totalorder %v351_v28, 0  ;;  %vm7227_vm5 = vcmp.lt.s32.totalorder %v351_v28, 7 }
  0x8f   : > { %6166 = vmatprep.subr.bf16.mxu0 %v6542_v13  ;;  %v5074_v21 = vld [vmem:[#allocation4] ss:$0 sm:$0xff]  ;;  %vm7254_vm8 = vmpackc.low %vm7213_vm3, %vm7209_vm2  ;;  %vm7335_vm12 = vcmp.lt.s32.totalorder %v372_v50, 7  ;;  %v6581_v45 = vld [vmem:[#allocation6 + $0x110] sm:$0xff]  }
  0x90   : > { %6189 = vmatpush3.bf16.msra.mxu1 %v6549_v22  ;;  %v7183_v22 = vadd.s32 16, %v7179_v19  ;;  %vm7269_vm9 = vmpackc.low %vm7227_vm5, %vm7223_vm4  ;;  %vm440_vm5 = vcmp.gt.s32.totalorder %v372_v50, 0 }
  0x91   : > { %6190 = vmatprep.subr.bf16.mxu1 %v6550_v32 }
  0x92   : > { %6167 = vmatpush3.bf16.msra.mxu0 %v6542_v13  ;;  %v6574_v13 = vld [vmem:[#allocation6 + $0x38] sm:$0xff]   ;;  %v358_v31 = vand.u32 7, %v7183_v22 }
  0x93   : > { %6168 = vmatprep.subr.bf16.mxu0 %v6543_v17 }
  0x94   : > { %6191 = vmatpush3.bf16.msra.mxu1 %v6550_v32  ;;  %vm7232_vm6 = vcmp.lt.s32.totalorder %v358_v31, 7  ;;  %vm7305_vm10 = vcmp.gt.s32.totalorder %v358_v31, 0  ;;  %v6580_v31 = vld [vmem:[#allocation6 + $0xc8] sm:$0xff]  }
  0x95   : > { %6192 = vmatprep.subr.bf16.mxu1 %v6551_v35 }
  0x96   : > { %6169 = vmatpush3.bf16.msra.mxu0 %v6543_v17  ;;  %v7176_v17 = vld [vmem:[#allocation6 + $0x140] sm:$0xff]  }
  0x97   : > { %6170 = vmatprep.subr.bf16.mxu0 %v6544_v25 }
  0x98   : > { %6193 = vmatpush3.bf16.msra.mxu1 %v6551_v35  ;;  %v365_v35 = vand.u32 7, %v7186_v23  ;;  %v7313_v23 = vadd.s32 56, %v7179_v19 }
  0x99   : > { %6194 = vmatprep.subr.bf16.mxu1 %v6552_v46 }
  0x9a   : > { %6171 = vmatpush3.bf16.msra.mxu0 %v6544_v25  ;;  %vm7236_vm7 = vcmp.lt.s32.totalorder %v365_v35, 7  ;;  %vm7325_vm11 = vcmp.gt.s32.totalorder %v365_v35, 0  ;;  %v393_v49 = vand.u32 7, %v7313_v23  ;;  %v6590_v35 = vld [vmem:[#allocation6 + $0x150] sm:$0xff]  }
  0x9b   : > { %5636 = vmatprep.subr.bf16.mxu0 %v6553_v37  ;;  %vm7352_vm14 = vmpackc.low %vm7236_vm7, %vm7232_vm6 }
  0x9c   : > { %6195 = vmatpush3.bf16.msra.mxu1 %v6552_v46  ;;  %vm7363_vm15 = vmpackc.low %vm7325_vm11, %vm7305_vm10  ;;  %vm451_vm4 = vcmp.lt.s32.totalorder %v393_v49, 7 }
  0x9d   : > { %6173 = vmatmul.mubr.bf16.vlgmr.msra.gmra.mrb[0].mxu0 %v469_v40  ;;  %6204 = vmatprep.subr.bf16.mxu1 %v6557_v56 }
  0x9e   : > { %6176 = vmatprep.mubr.bf16.mxu0 %v470_v43  ;;  %5637 = vmatpush3.bf16.msra.mxu0 %v6554_v38 }
  0x9f   : > { %5638 = vmatprep.subr.bf16.mxu0 %v6555_v48  ;;  %6197 = vmatmul.mubr.bf16.vlgmr.msra.gmra.mrb[0].mxu1 %v625_v61  ;;  %v379_v61 = vand.u32 7, %v7218_v42 }
  0xa0   : > { %6200 = vmatprep.mubr.bf16.mxu1 %v626_v63  ;;  %6205 = vmatpush3.bf16.msra.mxu1 %v6557_v56 }
  0xa1   : > { %6206 = vmatprep.subr.bf16.mxu1 %v6560_v62  ;;  %vm7341_vm13 = vcmp.lt.s32.totalorder %v379_v61, 7  ;;  %vm441_vm6 = vcmp.gt.s32.totalorder %v379_v61, 0 }
  0xa2   : > { %5639 = vmatpush3.bf16.msra.mxu0 %v6556_v54  ;;  %vm7376_vm2 = vmpackc.low %vm7341_vm13, %vm7335_vm12  ;;  %vm443_vm12 = vcmp.gt.s32.totalorder %v393_v49, 0  ;;  %v6597_v49 = vld [vmem:[#allocation6 + $0xf8] sm:$0xff]  }
  0xa3   : > { %5640 = vmatprep.subr.bf16.mxu0 %v6558_v57  ;;  %vm7425_vm10 = vmpackc.low %vm441_vm6, %vm440_vm5 }
  0xa4   : > { %6207 = vmatpush3.bf16.msra.mxu1 %v6560_v62 }
  0xa5   : > { %6177 = vmatmul.mubr.bf16.gmra.mrb[4].mxu0 %v471_v59  ;;  %6208 = vmatprep.subr.bf16.mxu1 %v6563_v2 }
  0xa6   : > { %5641 = vmatpush3.bf16.msra.mxu0 %v6559_v58 }
  0xa7   : > { %5642 = vmatprep.subr.bf16.mxu0 %v6561_v60  ;;  %6201 = vmatmul.mubr.bf16.gmra.mrb[4].mxu1 %v627_v4 }
  0xa8   : > { %6209 = vmatpush3.bf16.msra.mxu1 %v6563_v2 }
  0xa9   : > { %6210 = vmatprep.subr.bf16.mxu1 %v6566_v5 }
  0xaa   : > { %5643 = vmatpush3.bf16.msra.mxu0 %v6562_v0 }
  0xab   : > { %5644 = vmatprep.subr.bf16.mxu0 %v6564_v1 }
  0xac   : > { %6211 = vmatpush3.bf16.msra.mxu1 %v6566_v5  ;;  %v6578_v5 = vld [vmem:[#allocation6 + $0xc0] sm:$0xff]  }
  0xad   : > { %6212 = vmatprep.subr.bf16.mxu1 %v6569_v8 }
  0xae   : > { %5645 = vmatpush3.bf16.msra.mxu0 %v6565_v3 }
  0xaf   : > { %5646 = vmatprep.subr.bf16.mxu0 %v6567_v6 }
  0xb0   : > { %6213 = vmatpush3.bf16.msra.mxu1 %v6569_v8 }
  0xb1   : > { %6214 = vmatprep.subr.bf16.mxu1 %v6572_v11 }
  0xb2   : > { %5647 = vmatpush3.bf16.msra.mxu0 %v6568_v7 }
  0xb3   : > { %5648 = vmatprep.subr.bf16.mxu0 %v6570_v9 }
  0xb4   : > { %6215 = vmatpush3.bf16.msra.mxu1 %v6572_v11 }
  0xb5   : > { %6216 = vmatprep.subr.bf16.mxu1 %v6575_v14 }
  0xb6   : > { %5649 = vmatpush3.bf16.msra.mxu0 %v6571_v10 }
  0xb7   : > { %5650 = vmatprep.subr.bf16.mxu0 %v6573_v12  ;;  %v6579_v12 = vld [vmem:[#allocation6 + $0x108] sm:$0xff]  }
  0xb8   : > { %6217 = vmatpush3.bf16.msra.mxu1 %v6575_v14 }
  0xb9   : > { %6218 = vmatprep.subr.bf16.mxu1 %v6576_v15 }
  0xba   : > { %5651 = vmatpush3.bf16.msra.mxu0 %v6574_v13 }
  0xbb   : > { %5688 = vmatprep.subr.bf16.mxu0 %v6577_v16 }
  0xbc   : > { %6219 = vmatpush3.bf16.msra.mxu1 %v6576_v15 }
  0xbd   : > { %6228 = vmatprep.subr.bf16.mxu1 %v7176_v17 }
 0x170   : > { %v6174_v24 = vpop.f32.mrb[0].mxu0 }
 0x171   : > { %v7188_v25 = vadd.f32 %v6174_v24, %v5074_v21  ;;  %v577_v26 = vpop.f32.mrb[1].mxu0 }
 0x172   : > { %v7191_v29 = vadd.f32 %v5074_v21, %v577_v26  ;;  %v6175_v30 = vpop.f32.mrb[2].mxu0  ;;  %v7273_v4 = vpop.f32.mrb[0].mxu1 }
 0x173   : > { %8139 = vst [vmem:[#allocation13_spill] sm:$0xff] %v7188_v25  ;;  %v7195_v32 = vmax.f32 %v7188_v25, 0.0  ;;  %v7197_v33 = vadd.f32 %v6175_v30, %v5074_v21  ;;  %v580_v34 = vpop.f32.mrb[3].mxu0  ;;  %v7282_v11 = vpop.f32.mrb[1].mxu1 }
 0x174   : > { %8140 = vst [vmem:[#allocation14_spill] sm:$0xff] %v7191_v29  ;;  %v766_v37 = vmax.f32 %v7191_v29, 0.0  ;;  %v7204_v38 = vadd.f32 %v5074_v21, %v580_v34  ;;  %v7296_v18 = vpop.f32.mrb[2].mxu1  ;;  %v6589_v34 = vld [vmem:[#allocation6 + $0x128] sm:$0xff]   ;;  %v7655_v29 = vld [vmem:[#allocation7 + $0x2] ss:$0 sm:$0xff] }
 0x175   : > { %8141 = vst [vmem:[#allocation15_spill] sm:$0xff] %v7197_v33  ;;  %v7207_v39 = vmax.f32 %v7197_v33, 0.0  ;;  %v819_v47 = vrot.slane %v7195_v32, 1  ;;  %v786_v20 = vrot.slane %v7195_v32, 7  ;;  %v7315_v24 = vpop.f32.mrb[3].mxu1 }
 0x176   : > { %8142 = vst [vmem:[#allocation16_spill] sm:$0xff] %v7204_v38  ;;  %v783_v43 = vrot.slane %v766_v37, 7  ;;  %v7221_v44 = vmax.f32 %v7204_v38, 0.0  ;;  %v816_v51 = vrot.slane %v766_v37, 1 }
 0x177   : > { %v788_v57 = vrot.slane %v7207_v39, 7  ;;  %v821_v6 = vrot.slane %v7207_v39, 1  ;;  %v7294_v16 = vpack.c.bf16 %v7207_v39, %v7195_v32 }
 0x178   : > { %v784_v52 = vrot.slane %v7221_v44, 7  ;;  %v817_v53 = vrot.slane %v7221_v44, 1  ;;  %v6178_v54 = vpop.f32.mrb[4].mxu0  ;;  %v7244_v55 = vpack.c.bf16 %v7221_v44, %v766_v37  ;;  %v806_v56 = vsel %vm782_vm0, 0.0, %v783_v43 }
 0x179   : > { %v7248_v58 = vadd.f32 %v6178_v54, %v5074_v21  ;;  %v593_v59 = vpop.f32.mrb[5].mxu0  ;;  %v789_v32 = vsel %vm782_vm0, %v786_v20, %v788_v57 }
 0x17a   : > { %v785_v62 = vsel %vm782_vm0, %v783_v43, %v784_v52  ;;  %v7260_v63 = vadd.f32 %v5074_v21, %v593_v59  ;;  %v6179_v0 = vpop.f32.mrb[6].mxu0  ;;  %1091 = vmatprep.mubr.bf16.mxu0 %v7244_v55  ;;  %v818_v1 = vsel %vm815_vm1, %v816_v51, %v817_v53  ;;  %v820_v2 = vsel %vm815_vm1, %v817_v53, %v819_v47  ;;  %v6582_v59 = vld [vmem:[#allocation6 + $0xd0] sm:$0xff]  }
 0x17b   : > { %8155 = vst [vmem:[#allocation17_spill] sm:$0xff] %v7248_v58  ;;  %v7276_v7 = vpack.c.bf16 %v785_v62, %v806_v56  ;;  %v7278_v8 = vadd.f32 %v6179_v0, %v5074_v21  ;;  %v596_v9 = vpop.f32.mrb[7].mxu0  ;;  %v7280_v10 = vpack.c.bf16 %v820_v2, %v818_v1  ;;  %v7285_v13 = vmax.f32 %v7248_v58, 0.0  ;;  %v7380_v56 = vpop.f32.mrb[4].mxu1  ;;  %v6583_v2 = vld [vmem:[#allocation6 + $0x118] sm:$0xff]  }
 0x17c   : > { %8158 = vst [vmem:[#allocation18_spill] sm:$0xff] %v7260_v63  ;;  %v7288_v14 = vmax.f32 %v7260_v63, 0.0  ;;  %v7290_v15 = vadd.f32 %v5074_v21, %v596_v9  ;;  %v7310_v21 = vadd.s32 48, %v7179_v19  ;;  %v822_v19 = vsel %vm815_vm1, %v819_v47, %v821_v6  ;;  %v7389_v1 = vpop.f32.mrb[5].mxu1 }
 0x17d   : > { %8161 = vst [vmem:[#allocation19_spill] sm:$0xff] %v7278_v8  ;;  %5119 = vmatmul.mubr.msk.bf16.vlgmr.msra.gmra.mrb[8].mxu0 %vm7254_vm8, %v7276_v7  ;;  %6220 = vmatprep.mubr.msk.bf16.mxu1 %vm7269_vm9, %v7280_v10  ;;  %v7319_v27 = vmax.f32 %v7278_v8, 0.0  ;;  %v827_v37 = vrot.slane %v7285_v13, 1  ;;  %v787_v44 = vsel %vm782_vm0, %v784_v52, %v786_v20  ;;  %v7396_v9 = vpop.f32.mrb[6].mxu1  ;;  %v794_v39 = vrot.slane %v7285_v13, 7 }
 0x17e   : > { %8162 = vst [vmem:[#allocation20_spill] sm:$0xff] %v7290_v15  ;;  %v823_v26 = vrot.slane %v7288_v14, 1  ;;  %v7322_v28 = vmax.f32 %v7290_v15, 0.0  ;;  %1099 = vmatprep.mubr.bf16.mxu0 %v7294_v16  ;;  %5689 = vmatpush3.bf16.msra.mxu0 %v6578_v5  ;;  %v386_v48 = vand.u32 7, %v7310_v21  ;;  %v7385_v62 = vpack.c.bf16 %v789_v32, %v787_v44  ;;  %v6585_v21 = vld [vmem:[#allocation6 + $0xd8] sm:$0xff]   ;;  %v6588_v32 = vld [vmem:[#allocation6 + $0xe0] sm:$0xff]  }
 0x17f   : > { %5690 = vmatprep.subr.bf16.mxu0 %v6579_v12  ;;  %v829_v51 = vrot.slane %v7319_v27, 1  ;;  %v7405_v12 = vpop.f32.mrb[7].mxu1  ;;  %v790_v20 = vrot.slane %v7288_v14, 7  ;;  %v796_v42 = vrot.slane %v7319_v27, 7  ;;  %v7437_v50 = vpack.c.bf16 %v7319_v27, %v7285_v13  ;;  %v6587_v13 = vld [vmem:[#allocation6 + $0x148] sm:$0xff]   ;;  %v6594_v44 = vld [vmem:[#allocation6 + $0xf0] sm:$0xff]  }
 0x180   : > { %v824_v40 = vsel %vm815_vm1, %v821_v6, %v823_v26  ;;  %v825_v41 = vrot.slane %v7322_v28, 1  ;;  %v792_v5 = vrot.slane %v7322_v28, 7  ;;  %v7394_v6 = vpack.c.bf16 %v7322_v28, %v7288_v14  ;;  %v7471_v8 = vld [vmem:[#allocation4 + $0x1] ss:$0 sm:$0xff]  ;;  %v6605_v15 = vld [vmem:[#allocation6 + $0x1d0] sm:$0xff]  }
 0x181   : > { %v7357_v46 = vpack.c.bf16 %v824_v40, %v822_v19  ;;  %vm450_vm3 = vcmp.lt.s32.totalorder %v386_v48, 7  ;;  %v830_v22 = vsel %vm815_vm1, %v827_v37, %v829_v51  ;;  %v791_v28 = vsel %vm782_vm0, %v788_v57, %v790_v20  ;;  %v6586_v19 = vld [vmem:[#allocation6 + $0x120] sm:$0xff]   ;;  %v6593_v40 = vld [vmem:[#allocation6 + $0x158] sm:$0xff]  }
 0x182   : > { %v826_v53 = vsel %vm815_vm1, %v823_v26, %v825_v41  ;;  %v828_v52 = vsel %vm815_vm1, %v825_v41, %v827_v37  ;;  %5691 = vmatpush3.bf16.msra.mxu0 %v6580_v31  ;;  %vm7415_vm7 = vmpackc.low %vm451_vm4, %vm450_vm3  ;;  %v793_v14 = vsel %vm782_vm0, %v790_v20, %v792_v5  ;;  %vm442_vm11 = vcmp.gt.s32.totalorder %v386_v48, 0  ;;  %v6591_v37 = vld [vmem:[#allocation6 + $0xe8] sm:$0xff]   ;;  %v6592_v41 = vld [vmem:[#allocation6 + $0x130] sm:$0xff]  }
 0x183   : > { %6221 = vmatmul.mubr.msk.bf16.vlgmr.msra.gmra.mrb[8].mxu1 %vm7352_vm14, %v7357_v46  ;;  %v7387_v0 = vpack.c.bf16 %v828_v52, %v826_v53  ;;  %5692 = vmatprep.subr.bf16.mxu0 %v6581_v45  ;;  %v7432_v36 = vpack.c.bf16 %v793_v14, %v791_v28  ;;  %v795_v57 = vsel %vm782_vm0, %v792_v5, %v794_v39  ;;  %vm7446_vm13 = vmpackc.low %vm443_vm12, %vm442_vm11  ;;  %v6596_v45 = vld [vmem:[#allocation6 + $0x160] sm:$0xff]   ;;  %v6595_v48 = vld [vmem:[#allocation6 + $0x138] sm:$0xff]  }
 0x184   : > { %6229 = vmatpush3.bf16.msra.mxu1 %v7176_v17  ;;  %v839_v17 = vsel %vm815_vm1, %v829_v51, 0.0  ;;  %v797_v61 = vsel %vm782_vm0, %v794_v39, %v796_v42  ;;  %v6598_v51 = vld [vmem:[#allocation6 + $0x168] sm:$0xff]   ;;  %v6599_v53 = vld [vmem:[#allocation6 + $0x1c0] sm:$0xff]   ;;  %v6601_v52 = vld [vmem:[#allocation6 + $0x170] sm:$0xff]  }
 0x185   : > { %5122 = vmatmul.mubr.msk.bf16.gmra.mrb[12].mxu0 %vm7363_vm15, %v7385_v62  ;;  %6224 = vmatprep.mubr.msk.bf16.mxu1 %vm7376_vm2, %v7387_v0  ;;  %v7420_v26 = vpack.c.bf16 %v839_v17, %v830_v22  ;;  %v7450_v27 = vpack.c.bf16 %v797_v61, %v795_v57  ;;  %v7458_v14 = vld [vmem:[#allocation7] ss:$0 sm:$0xff] }
 0x186   : > { %1107 = vmatprep.mubr.bf16.mxu0 %v7394_v6  ;;  %5693 = vmatpush3.bf16.msra.mxu0 %v6582_v59  ;;  %v6604_v59 = vld [vmem:[#allocation6 + $0x178] sm:$0xff]  }
 0x187   : > { %5694 = vmatprep.subr.bf16.mxu0 %v6583_v2  ;;  %6230 = vmatprep.subr.bf16.mxu1 %v6587_v13  ;;  %v7455_v2 = vld [vmem:[#allocation6 + $0x200] sm:$0xff]  }
 0x188   : > { %6231 = vmatpush3.bf16.msra.mxu1 %v6587_v13 }
 0x189   : > { %6232 = vmatprep.subr.bf16.mxu1 %v6590_v35 }
 0x18a   : > { %5695 = vmatpush3.bf16.msra.mxu0 %v6585_v21 }
 0x18b   : > { %6225 = vmatmul.mubr.msk.bf16.gmra.mrb[12].mxu1 %vm7415_vm7, %v7420_v26  ;;  %5696 = vmatprep.subr.bf16.mxu0 %v6586_v19 }
 0x18c   : > { %6233 = vmatpush3.bf16.msra.mxu1 %v6590_v35 }
 0x18d   : > { %5125 = vmatmul.mubr.msk.bf16.gmra.mrb[16].mxu0 %vm7425_vm10, %v7432_v36  ;;  %6234 = vmatprep.subr.bf16.mxu1 %v6593_v40 }
 0x18e   : > { %1115 = vmatprep.mubr.bf16.mxu0 %v7437_v50  ;;  %5697 = vmatpush3.bf16.msra.mxu0 %v6588_v32 }
 0x18f   : > { %5698 = vmatprep.subr.bf16.mxu0 %v6589_v34 }
 0x190   : > { %6235 = vmatpush3.bf16.msra.mxu1 %v6593_v40 }
 0x191   : > { %6236 = vmatprep.subr.bf16.mxu1 %v6596_v45 }
 0x192   : > { %5699 = vmatpush3.bf16.msra.mxu0 %v6591_v37 }
 0x193   : > { %5700 = vmatprep.subr.bf16.mxu0 %v6592_v41 }
 0x194   : > { %6237 = vmatpush3.bf16.msra.mxu1 %v6596_v45 }
 0x195   : > { %5128 = vmatmul.mubr.msk.bf16.gmra.mrb[20].mxu0 %vm7446_vm13, %v7450_v27  ;;  %6238 = vmatprep.subr.bf16.mxu1 %v6598_v51 }
 0x196   : > { %5701 = vmatpush3.bf16.msra.mxu0 %v6594_v44 }
 0x197   : > { %5702 = vmatprep.subr.bf16.mxu0 %v6595_v48 }
 0x198   : > { %6239 = vmatpush3.bf16.msra.mxu1 %v6598_v51 }
 0x199   : > { %6240 = vmatprep.subr.bf16.mxu1 %v6601_v52 }
 0x19a   : > { %5703 = vmatpush3.bf16.msra.mxu0 %v6597_v49 }
 0x19b   : > { %5740 = vmatprep.subr.bf16.mxu0 %v6599_v53 }
 0x19c   : > { %6241 = vmatpush3.bf16.msra.mxu1 %v6601_v52 }
 0x19d   : > { %6242 = vmatprep.subr.bf16.mxu1 %v6604_v59 }
 0x1a0   : > { %6243 = vmatpush3.bf16.msra.mxu1 %v6604_v59 }
 0x1a1   : > { %6252 = vmatprep.subr.bf16.mxu1 %v7455_v2 }
 0x250   : > { %v5652_v5 = vpop.f32.mrb[8].mxu0 }
 0x251   : > { %v5653_v20 = vpop.f32.mrb[9].mxu0 }
 0x252   : > { %v5654_v22 = vadd.f32 %v5653_v20, %v5652_v5  ;;  %v5655_v17 = vpop.f32.mrb[10].mxu0 }
 0x253   : > { %v5656_v21 = vpop.f32.mrb[11].mxu0 }
 0x254   : > { %v5657_v28 = vadd.f32 %v5656_v21, %v5655_v17  ;;  %v1094_v39 = vadd.f32 %v5654_v22, %v7458_v14 }
 0x256   : > { %v6222_v42 = vpop.f32.mrb[8].mxu1  ;;  %v1097_v32 = vadd.f32 %v5657_v28, %v7458_v14 }
 0x257   : > { %v1158_v57 = vpop.f32.mrb[9].mxu1 }
 0x258   : > { %v1159_v61 = vadd.f32 %v1158_v57, %v1094_v39  ;;  %v5658_v19 = vpop.f32.mrb[12].mxu0  ;;  %v6223_v13 = vpop.f32.mrb[10].mxu1 }
 0x259   : > { %v5659_v34 = vpop.f32.mrb[13].mxu0  ;;  %v1161_v35 = vpop.f32.mrb[11].mxu1 }
 0x25a   : > { %v1189_v37 = vmax.f32 %v1159_v61, 0.0  ;;  %v5660_v40 = vadd.f32 %v5659_v34, %v5658_v19  ;;  %v1162_v41 = vadd.f32 %v1161_v35, %v1097_v32  ;;  %v5661_v44 = vpop.f32.mrb[14].mxu0  ;;  %v6600_v34 = vld [vmem:[#allocation6 + $0x180] sm:$0xff]  }
 0x25b   : > { %v5662_v45 = vpop.f32.mrb[15].mxu0 }
 0x25c   : > { %v1205_v48 = vrot.slane %v1189_v37, 7  ;;  %v1102_v49 = vadd.f32 %v5660_v40, %v7458_v14  ;;  %v1190_v51 = vmax.f32 %v1162_v41, 0.0  ;;  %v5663_v53 = vadd.f32 %v5662_v45, %v5661_v44  ;;  %v6602_v45 = vld [vmem:[#allocation6 + $0x1c8] sm:$0xff]  }
 0x25d   : > { %v1237_v52 = vrot.slane %v1189_v37, 1 }
 0x25e   : > { %v1167_v59 = vadd.f32 %v6222_v42, %v1102_v49  ;;  %v1206_v5 = vrot.slane %v1190_v51, 7  ;;  %v1238_v20 = vrot.slane %v1190_v51, 1  ;;  %v7463_v22 = vpop.f32.mrb[12].mxu1  ;;  %v1105_v17 = vadd.f32 %v5663_v53, %v7458_v14 }
 0x25f   : > { %v1174_v21 = vpop.f32.mrb[13].mxu1  ;;  %v1273_v28 = vpack.c.bf16 %v1190_v51, %v1189_v37  ;;  %v1228_v39 = vsel %vm782_vm0, 0.0, %v1205_v48 }
 0x260   : > { %v1191_v57 = vmax.f32 %v1167_v59, 0.0  ;;  %v1207_v61 = vsel %vm782_vm0, %v1205_v48, %v1206_v5  ;;  %v5664_v19 = vpop.f32.mrb[16].mxu0  ;;  %v7468_v32 = vpop.f32.mrb[14].mxu1  ;;  %v1239_v35 = vsel %vm815_vm1, %v1237_v52, %v1238_v20  ;;  %v1170_v40 = vadd.f32 %v6223_v13, %v1105_v17  ;;  %v6603_v17 = vld [vmem:[#allocation6 + $0x188] sm:$0xff]  }
 0x261   : > { %v5167_v42 = vpack.c.bf16 %v1207_v61, %v1228_v39  ;;  %1514 = vmatprep.mubr.bf16.mxu0 %v1273_v28  ;;  %v5665_v41 = vpop.f32.mrb[17].mxu0  ;;  %v1177_v44 = vpop.f32.mrb[15].mxu1 }
 0x262   : > { %v1208_v49 = vrot.slane %v1191_v57, 7  ;;  %v1240_v53 = vrot.slane %v1191_v57, 1  ;;  %v5666_v37 = vadd.f32 %v5665_v41, %v5664_v19  ;;  %v5667_v51 = vpop.f32.mrb[18].mxu0  ;;  %v1192_v59 = vmax.f32 %v1170_v40, 0.0 }
 0x263   : > { %v5668_v48 = vpop.f32.mrb[19].mxu0  ;;  %5168 = vmatmul.mubr.msk.bf16.vlgmr.msra.gmra.mrb[24].mxu0 %vm7254_vm8, %v5167_v42  ;;  %v7480_v40 = vadd.f32 %v7273_v4, %v7471_v8 }
 0x264   : > { %v1110_v58 = vadd.f32 %v5666_v37, %v7458_v14  ;;  %v5669_v52 = vadd.f32 %v5668_v48, %v5667_v51  ;;  %5741 = vmatpush3.bf16.msra.mxu0 %v6600_v34  ;;  %v1241_v13 = vsel %vm815_vm1, %v1238_v20, %v1240_v53  ;;  %v1209_v28 = vsel %vm782_vm0, %v1206_v5, %v1208_v49  ;;  %v6607_v51 = vld [vmem:[#allocation6 + $0x1d8] sm:$0xff]  }
 0x265   : > { %v1210_v39 = vrot.slane %v1192_v59, 7  ;;  %v1242_v61 = vrot.slane %v1192_v59, 1  ;;  %v1274_v19 = vpack.c.bf16 %v1192_v59, %v1191_v57  ;;  %5742 = vmatprep.subr.bf16.mxu0 %v6602_v45  ;;  %v5179_v41 = vpack.c.bf16 %v1241_v13, %v1239_v35  ;;  %8183 = vst [vmem:[#allocation21_spill] sm:$0xff] %v7480_v40 }
 0x266   : > { %v1175_v42 = vadd.f32 %v1174_v21, %v1110_v58  ;;  %v1113_v37 = vadd.f32 %v5669_v52, %v7458_v14  ;;  %v7485_v34 = vadd.f32 %v7471_v8, %v7282_v11  ;;  %v6606_v58 = vld [vmem:[#allocation6 + $0x190] sm:$0xff]   ;;  %v7493_v21 = vadd.f32 %v7471_v8, %v7315_v24 }
 0x267   : > { %v1243_v20 = vsel %vm815_vm1, %v1240_v53, %v1242_v61  ;;  %1522 = vmatprep.mubr.bf16.mxu0 %v1274_v19  ;;  %6244 = vmatprep.mubr.msk.bf16.mxu1 %vm7269_vm9, %v5179_v41  ;;  %v1211_v5 = vsel %vm782_vm0, %v1208_v49, %v1210_v39  ;;  %v7496_v49 = vmax.f32 %v7480_v40, 0.0  ;;  %v6609_v41 = vld [vmem:[#allocation6 + $0x198] sm:$0xff]  }
 0x268   : > { %8184 = vst [vmem:[#allocation22_spill] sm:$0xff] %v7485_v34  ;;  %v1193_v57 = vmax.f32 %v1175_v42, 0.0  ;;  %v1178_v35 = vadd.f32 %v1177_v44, %v1113_v37  ;;  %5743 = vmatpush3.bf16.msra.mxu0 %v6603_v17  ;;  %v5670_v4 = vpop.f32.mrb[20].mxu0  ;;  %v5170_v45 = vpack.c.bf16 %v1211_v5, %v1209_v28  ;;  %8185 = vst [vmem:[#allocation23_spill] sm:$0xff] %v7493_v21  ;;  %v7499_v44 = vmax.f32 %v7485_v34, 0.0 }
 0x269   : > { %v5671_v11 = vpop.f32.mrb[21].mxu0  ;;  %5744 = vmatprep.subr.bf16.mxu0 %v6605_v15  ;;  %v7507_v63 = vmax.f32 %v7493_v21, 0.0 }
 0x26a   : > { %v1212_v53 = vrot.slane %v1193_v57, 7  ;;  %v1244_v59 = vrot.slane %v1193_v57, 1  ;;  %v1194_v48 = vmax.f32 %v1178_v35, 0.0  ;;  %v5672_v52 = vadd.f32 %v5671_v11, %v5670_v4  ;;  %v5673_v13 = vpop.f32.mrb[22].mxu0  ;;  %v6610_v35 = vld [vmem:[#allocation6 + $0x1e0] sm:$0xff]   ;;  %v6611_v4 = vld [vmem:[#allocation6 + $0x208] sm:$0xff]  }
 0x26b   : > { %v5674_v17 = vpop.f32.mrb[23].mxu0  ;;  %5171 = vmatmul.mubr.msk.bf16.gmra.mrb[28].mxu0 %vm7363_vm15, %v5170_v45 }
 0x26c   : > { %v1245_v24 = vsel %vm815_vm1, %v1242_v61, %v1244_v59  ;;  %v1214_v28 = vrot.slane %v1194_v48, 7  ;;  %v1246_v15 = vrot.slane %v1194_v48, 1  ;;  %v1118_v19 = vadd.f32 %v5672_v52, %v7458_v14  ;;  %5745 = vmatpush3.bf16.msra.mxu0 %v6606_v58 }
 0x26d   : > { %v5182_v42 = vpack.c.bf16 %v1245_v24, %v1243_v20  ;;  %v5675_v37 = vadd.f32 %v5674_v17, %v5673_v13  ;;  %v1275_v5 = vpack.c.bf16 %v1194_v48, %v1193_v57  ;;  %5746 = vmatprep.subr.bf16.mxu0 %v6607_v51  ;;  %v1213_v11 = vsel %vm782_vm0, %v1210_v39, %v1212_v53  ;;  %v6612_v39 = vld [vmem:[#allocation6 + $0x1a0] sm:$0xff]   ;;  %v6615_v24 = vld [vmem:[#allocation6 + $0x1a8] sm:$0xff]  }
 0x26e   : > { %v1183_v45 = vadd.f32 %v7463_v22, %v1118_v19  ;;  %v1215_v61 = vsel %vm782_vm0, %v1212_v53, %v1214_v28  ;;  %v1247_v33 = vsel %vm815_vm1, %v1244_v59, %v1246_v15  ;;  %v1663_v51 = vrot.slane %v7496_v49, 1  ;;  %v6613_v53 = vld [vmem:[#allocation6 + $0x1e8] sm:$0xff]   ;;  %v6614_v59 = vld [vmem:[#allocation6 + $0x210] sm:$0xff]  }
 0x26f   : > { %v1121_v58 = vadd.f32 %v5675_v37, %v7458_v14  ;;  %1530 = vmatprep.mubr.bf16.mxu0 %v1275_v5  ;;  %6245 = vmatmul.mubr.msk.bf16.vlgmr.msra.gmra.mrb[16].mxu1 %vm7352_vm14, %v5182_v42  ;;  %v5173_v20 = vpack.c.bf16 %v1215_v61, %v1213_v11  ;;  %v1660_v14 = vrot.slane %v7499_v44, 1  ;;  %v1661_v48 = vrot.slane %v7507_v63, 1  ;;  %v6616_v5 = vld [vmem:[#allocation6 + $0x1f0] sm:$0xff]  }
 0x270   : > { %v1195_v57 = vmax.f32 %v1183_v45, 0.0  ;;  %5747 = vmatpush3.bf16.msra.mxu0 %v6609_v41  ;;  %6253 = vmatpush3.bf16.msra.mxu1 %v7455_v2 }
 0x271   : > { %v1186_v22 = vadd.f32 %v7468_v32, %v1121_v58  ;;  %5748 = vmatprep.subr.bf16.mxu0 %v6610_v35  ;;  %6254 = vmatprep.subr.bf16.mxu1 %v6611_v4  ;;  %v6617_v35 = vld [vmem:[#allocation6 + $0x218] sm:$0xff]   ;;  %v1662_v11 = vsel %vm815_vm1, %v1660_v14, %v1661_v48  ;;  %v1664_v45 = vsel %vm815_vm1, %v1661_v48, %v1663_v51  ;;  %v6618_v58 = vld [vmem:[#allocation6 + $0x1b0] sm:$0xff]   ;;  %v6622_v48 = vld [vmem:[#allocation6 + $0x228] sm:$0xff]  }
 0x272   : > { %v1216_v52 = vrot.slane %v1195_v57, 7  ;;  %v1248_v13 = vrot.slane %v1195_v57, 1  ;;  %v7550_v14 = vpack.c.bf16 %v7507_v63, %v7499_v44 }
 0x273   : > { %v1196_v17 = vmax.f32 %v1186_v22, 0.0  ;;  %5174 = vmatmul.mubr.msk.bf16.gmra.mrb[32].mxu0 %vm7425_vm10, %v5173_v20  ;;  %v7533_v20 = vpack.c.bf16 %v1664_v45, %v1662_v11  ;;  %v7538_v22 = vadd.f32 %v7296_v18, %v7471_v8  ;;  %v6621_v18 = vld [vmem:[#allocation6 + $0x1b8] sm:$0xff]  }
 0x274   : > { %5749 = vmatpush3.bf16.msra.mxu0 %v6612_v39  ;;  %6255 = vmatpush3.bf16.msra.mxu1 %v6611_v4  ;;  %v1249_v2 = vsel %vm815_vm1, %v1246_v15, %v1248_v13  ;;  %v1217_v32 = vsel %vm782_vm0, %v1214_v28, %v1216_v52  ;;  %v1628_v39 = vrot.slane %v7499_v44, 7 }
 0x275   : > { %v1218_v19 = vrot.slane %v1196_v17, 7  ;;  %v1250_v41 = vrot.slane %v1196_v17, 1  ;;  %v1276_v42 = vpack.c.bf16 %v1196_v17, %v1195_v57  ;;  %5750 = vmatprep.subr.bf16.mxu0 %v6613_v53  ;;  %6256 = vmatprep.subr.bf16.mxu1 %v6614_v59  ;;  %v5185_v37 = vpack.c.bf16 %v1249_v2, %v1247_v33  ;;  %v6619_v57 = vld [vmem:[#allocation6 + $0x1f8] sm:$0xff]   ;;  %8186 = vst [vmem:[#allocation24_spill] sm:$0xff] %v7538_v22 }
 0x276   : > { %v1629_v53 = vrot.slane %v7507_v63, 7  ;;  %v7558_v2 = vadd.f32 %v7471_v8, %v7389_v1  ;;  %v7562_v63 = vadd.f32 %v7380_v56, %v7471_v8 }
 0x277   : > { %1538 = vmatprep.mubr.bf16.mxu0 %v1276_v42  ;;  %6248 = vmatprep.mubr.msk.bf16.mxu1 %vm7376_vm2, %v5185_v37  ;;  %v1251_v28 = vsel %vm815_vm1, %v1248_v13, %v1250_v41  ;;  %v1260_v15 = vsel %vm815_vm1, %v1250_v41, 0.0  ;;  %v1219_v4 = vsel %vm782_vm0, %v1216_v52, %v1218_v19  ;;  %v1651_v52 = vsel %vm782_vm0, 0.0, %v1628_v39 }
 0x278   : > { %5751 = vmatpush3.bf16.msra.mxu0 %v6615_v24  ;;  %6257 = vmatpush3.bf16.msra.mxu1 %v6614_v59  ;;  %v5188_v33 = vpack.c.bf16 %v1260_v15, %v1251_v28  ;;  %v5176_v61 = vpack.c.bf16 %v1219_v4, %v1217_v32  ;;  %v6620_v59 = vld [vmem:[#allocation6 + $0x220] sm:$0xff]   ;;  %v1615_v13 = vmax.f32 %v7538_v22, 0.0  ;;  %v1630_v17 = vsel %vm782_vm0, %v1628_v39, %v1629_v53  ;;  %v6623_v32 = vld [vmem:[#allocation6 + $0x230] sm:$0xff]  }
 0x279   : > { %5752 = vmatprep.subr.bf16.mxu0 %v6616_v5  ;;  %6258 = vmatprep.subr.bf16.mxu1 %v6617_v35  ;;  %8187 = vst [vmem:[#allocation25_spill] sm:$0xff] %v7558_v2  ;;  %8188 = vst [vmem:[#allocation26_spill] sm:$0xff] %v7562_v63  ;;  %v7564_v44 = vpack.c.bf16 %v1630_v17, %v1651_v52  ;;  %v7568_v24 = vadd.f32 %v7471_v8, %v7405_v12  ;;  %v1631_v19 = vrot.slane %v7496_v49, 7  ;;  %v6624_v5 = vld [vmem:[#allocation6 + $0x238] sm:$0xff]  }
 0x27a   : > { %6249 = vmatmul.mubr.msk.bf16.gmra.mrb[20].mxu1 %vm7415_vm7, %v5188_v33  ;;  %v1633_v41 = vrot.slane %v1615_v13, 7  ;;  %v1616_v1 = vmax.f32 %v7558_v2, 0.0  ;;  %v7573_v42 = vpack.c.bf16 %v1615_v13, %v7496_v49  ;;  %v1618_v56 = vmax.f32 %v7562_v63, 0.0 }
 0x27b   : > { %6268 = vmatprep.mubr.msk.bf16.mxu1 %vm7269_vm9, %v7533_v20  ;;  %5177 = vmatmul.mubr.msk.bf16.gmra.mrb[36].mxu0 %vm7446_vm13, %v5176_v61  ;;  %8189 = vst [vmem:[#allocation27_spill] sm:$0xff] %v7564_v44  ;;  %8190 = vst [vmem:[#allocation28_spill] sm:$0xff] %v7568_v24  ;;  %v7582_v12 = vadd.f32 %v7396_v9, %v7471_v8  ;;  %v1617_v37 = vmax.f32 %v7568_v24, 0.0  ;;  %v1632_v45 = vsel %vm782_vm0, %v1629_v53, %v1631_v19 }
 0x27c   : > { %5753 = vmatpush3.bf16.msra.mxu0 %v6618_v58  ;;  %6259 = vmatpush3.bf16.msra.mxu1 %v6617_v35  ;;  %8191 = vst [vmem:[#allocation29_spill] sm:$0xff] %v7573_v42  ;;  %v1665_v35 = vrot.slane %v1615_v13, 1  ;;  %v1667_v11 = vrot.slane %v1616_v1, 1  ;;  %v1634_v28 = vsel %vm782_vm0, %v1631_v19, %v1633_v41  ;;  %v1671_v15 = vrot.slane %v1618_v56, 1 }
 0x27d   : > { %1937 = vmatprep.mubr.bf16.mxu0 %v7550_v14  ;;  %5754 = vmatprep.subr.bf16.mxu0 %v6619_v57  ;;  %8192 = vst [vmem:[#allocation30_spill] sm:$0xff] %v7582_v12  ;;  %v1669_v4 = vrot.slane %v1617_v37, 1  ;;  %v1635_v33 = vrot.slane %v1616_v1, 7  ;;  %v1619_v61 = vmax.f32 %v7582_v12, 0.0  ;;  %v7588_v58 = vpack.c.bf16 %v1634_v28, %v1632_v45  ;;  %v6626_v45 = vld [vmem:[#allocation6 + $0x240] sm:$0xff]   ;;  %v6627_v28 = vld [vmem:[#allocation6 + $0x288] sm:$0xff]  }
 0x27e   : > { %6260 = vmatprep.subr.bf16.mxu1 %v6620_v59  ;;  %v1666_v8 = vsel %vm815_vm1, %v1663_v51, %v1665_v35  ;;  %v1668_v9 = vsel %vm815_vm1, %v1665_v35, %v1667_v11  ;;  %v1637_v57 = vrot.slane %v1617_v37, 7  ;;  %v7594_v39 = vpack.c.bf16 %v1617_v37, %v1616_v1 }
 0x27f   : > { %8193 = vst [vmem:[#allocation31_spill] sm:$0xff] %v7588_v58  ;;  %v1670_v53 = vsel %vm815_vm1, %v1667_v11, %v1669_v4  ;;  %v1673_v49 = vrot.slane %v1619_v61, 1  ;;  %v1639_v13 = vrot.slane %v1618_v56, 7  ;;  %v7616_v19 = vpack.c.bf16 %v1619_v61, %v1618_v56  ;;  %v6625_v11 = vld [vmem:[#allocation6 + $0x280] sm:$0xff]  }
 0x280   : > { %5755 = vmatpush3.bf16.msra.mxu0 %v6621_v18  ;;  %6261 = vmatpush3.bf16.msra.mxu1 %v6620_v59  ;;  %8194 = vst [vmem:[#allocation32_spill] sm:$0xff] %v7594_v39  ;;  %v1672_v59 = vsel %vm815_vm1, %v1669_v4, %v1671_v15  ;;  %v7602_v18 = vpack.c.bf16 %v1668_v9, %v1666_v8  ;;  %v6629_v4 = vld [vmem:[#allocation6 + $0x2c0] sm:$0xff]   ;;  %v6632_v8 = vld [vmem:[#allocation6 + $0x2c8] sm:$0xff]   ;;  %v6633_v9 = vld [vmem:[#allocation6 + $0x298] sm:$0xff]  }
 0x281   : > { %6262 = vmatprep.subr.bf16.mxu1 %v6622_v48  ;;  %v7604_v51 = vpack.c.bf16 %v1672_v59, %v1670_v53  ;;  %v1638_v52 = vsel %vm782_vm0, %v1635_v33, %v1637_v57  ;;  %8198 = vst [vmem:[#allocation36_spill] sm:$0xff] %v7616_v19  ;;  %v1674_v1 = vsel %vm815_vm1, %v1671_v15, %v1673_v49  ;;  %v6628_v15 = vld [vmem:[#allocation6 + $0x248] sm:$0xff]   ;;  %v6635_v53 = vld [vmem:[#allocation6 + $0x2d0] sm:$0xff]   ;;  %v6636_v59 = vld [vmem:[#allocation6 + $0x2a0] sm:$0xff]  }
 0x282   : > { %8195 = vst [vmem:[#allocation33_spill] sm:$0xff] %v7602_v18  ;;  %5792 = vmatprep.subr.bf16.mxu0 %v6625_v11  ;;  %v6646_v11 = vld [vmem:[#allocation6 + $0x278] sm:$0xff]  }
 0x283   : > { %5217 = vmatmul.mubr.msk.bf16.vlgmr.msra.gmra.mrb[40].mxu0 %vm7254_vm8, %v7564_v44  ;;  %8196 = vst [vmem:[#allocation34_spill] sm:$0xff] %v7604_v51 }
 0x284   : > { %6263 = vmatpush3.bf16.msra.mxu1 %v6622_v48  ;;  %1945 = vmatprep.mubr.bf16.mxu0 %v7573_v42  ;;  %v1636_v48 = vsel %vm782_vm0, %v1633_v41, %v1635_v33  ;;  %v1683_v41 = vsel %vm815_vm1, %v1673_v49, 0.0  ;;  %v6630_v33 = vld [vmem:[#allocation6 + $0x290] sm:$0xff]   ;;  %v6637_v49 = vld [vmem:[#allocation6 + $0x260] sm:$0xff]  }
 0x285   : > { %6264 = vmatprep.subr.bf16.mxu1 %v6623_v32  ;;  %v7614_v17 = vpack.c.bf16 %v1638_v52, %v1636_v48  ;;  %v7624_v37 = vpack.c.bf16 %v1683_v41, %v1674_v1  ;;  %5793 = vmatpush3.bf16.msra.mxu0 %v6626_v45  ;;  %v6638_v48 = vld [vmem:[#allocation6 + $0x2d8] sm:$0xff]   ;;  %v6639_v52 = vld [vmem:[#allocation6 + $0x2a8] sm:$0xff]   ;;  %v6642_v1 = vld [vmem:[#allocation6 + $0x2b0] sm:$0xff]  }
 0x286   : > { %5794 = vmatprep.subr.bf16.mxu0 %v6627_v28  ;;  %v6643_v41 = vld [vmem:[#allocation6 + $0x270] sm:$0xff]   ;;  %v6648_v28 = vld [vmem:[#allocation6 + $0x340] sm:$0xff]  }
 0x287   : > { %8197 = vst [vmem:[#allocation35_spill] sm:$0xff] %v7614_v17  ;;  %8199 = vst [vmem:[#allocation37_spill] sm:$0xff] %v7624_v37  ;;  %v6647_v45 = vld [vmem:[#allocation6 + $0x2f0] sm:$0xff]  }
 0x288   : > { %6265 = vmatpush3.bf16.msra.mxu1 %v6623_v32  ;;  %v1641_v32 = vrot.slane %v1619_v61, 7  ;;  %v6631_v61 = vld [vmem:[#allocation6 + $0x250] sm:$0xff]  }
 0x289   : > { %6266 = vmatprep.subr.bf16.mxu1 %v6624_v5  ;;  %5795 = vmatpush3.bf16.msra.mxu0 %v6628_v15  ;;  %v6650_v15 = vld [vmem:[#allocation6 + $0x2f8] sm:$0xff]  }
 0x28a   : > { %v1642_v35 = vsel %vm782_vm0, %v1639_v13, %v1641_v32  ;;  %5796 = vmatprep.subr.bf16.mxu0 %v6630_v33  ;;  %v6641_v32 = vld [vmem:[#allocation6 + $0x2e0] sm:$0xff]  }
 0x28b   : > { %5220 = vmatmul.mubr.msk.bf16.gmra.mrb[44].mxu0 %vm7363_vm15, %v7588_v58 }
 0x28c   : > { %6267 = vmatpush3.bf16.msra.mxu1 %v6624_v5  ;;  %1953 = vmatprep.mubr.bf16.mxu0 %v7594_v39  ;;  %v1640_v5 = vsel %vm782_vm0, %v1637_v57, %v1639_v13  ;;  %v6634_v57 = vld [vmem:[#allocation6 + $0x258] sm:$0xff]   ;;  %v6640_v13 = vld [vmem:[#allocation6 + $0x268] sm:$0xff]  }
 0x28d   : > { %v7631_v56 = vpack.c.bf16 %v1642_v35, %v1640_v5  ;;  %6276 = vmatprep.subr.bf16.mxu1 %v6629_v4  ;;  %5797 = vmatpush3.bf16.msra.mxu0 %v6631_v61  ;;  %v6644_v5 = vld [vmem:[#allocation6 + $0x2e8] sm:$0xff]   ;;  %v6645_v35 = vld [vmem:[#allocation6 + $0x2b8] sm:$0xff]  }
 0x28e   : > { %5798 = vmatprep.subr.bf16.mxu0 %v6633_v9 }
 0x28f   : > { %6269 = vmatmul.mubr.msk.bf16.vlgmr.msra.gmra.mrb[24].mxu1 %vm7352_vm14, %v7602_v18  ;;  %8200 = vst [vmem:[#allocation38_spill] sm:$0xff] %v7631_v56  ;;  %v6649_v18 = vld [vmem:[#allocation6 + $0x300] sm:$0xff]  }
 0x290   : > { %6272 = vmatprep.mubr.msk.bf16.mxu1 %vm7376_vm2, %v7604_v51  ;;  %6277 = vmatpush3.bf16.msra.mxu1 %v6629_v4  ;;  %v7636_v4 = vld [vmem:[#allocation6 + $0x380] sm:$0xff]  }
 0x291   : > { %6278 = vmatprep.subr.bf16.mxu1 %v6632_v8  ;;  %5799 = vmatpush3.bf16.msra.mxu0 %v6634_v57 }
 0x292   : > { %5800 = vmatprep.subr.bf16.mxu0 %v6636_v59 }
 0x293   : > { %5223 = vmatmul.mubr.msk.bf16.gmra.mrb[48].mxu0 %vm7425_vm10, %v7614_v17 }
 0x294   : > { %1961 = vmatprep.mubr.bf16.mxu0 %v7616_v19  ;;  %6279 = vmatpush3.bf16.msra.mxu1 %v6632_v8 }
 0x295   : > { %6280 = vmatprep.subr.bf16.mxu1 %v6635_v53  ;;  %5801 = vmatpush3.bf16.msra.mxu0 %v6637_v49 }
 0x296   : > { %5802 = vmatprep.subr.bf16.mxu0 %v6639_v52 }
 0x297   : > { %6273 = vmatmul.mubr.msk.bf16.gmra.mrb[28].mxu1 %vm7415_vm7, %v7624_v37 }
 0x298   : > { %6281 = vmatpush3.bf16.msra.mxu1 %v6635_v53 }
 0x299   : > { %6282 = vmatprep.subr.bf16.mxu1 %v6638_v48  ;;  %5803 = vmatpush3.bf16.msra.mxu0 %v6640_v13 }
 0x29a   : > { %5804 = vmatprep.subr.bf16.mxu0 %v6642_v1 }
 0x29b   : > { %5226 = vmatmul.mubr.msk.bf16.gmra.mrb[52].mxu0 %vm7446_vm13, %v7631_v56 }
 0x29c   : > { %6283 = vmatpush3.bf16.msra.mxu1 %v6638_v48 }
 0x29d   : > { %6284 = vmatprep.subr.bf16.mxu1 %v6641_v32  ;;  %5805 = vmatpush3.bf16.msra.mxu0 %v6643_v41 }
 0x29e   : > { %5806 = vmatprep.subr.bf16.mxu0 %v6645_v35 }
 0x2a0   : > { %6285 = vmatpush3.bf16.msra.mxu1 %v6641_v32 }
 0x2a1   : > { %6286 = vmatprep.subr.bf16.mxu1 %v6644_v5  ;;  %5807 = vmatpush3.bf16.msra.mxu0 %v6646_v11 }
 0x2a2   : > { %5844 = vmatprep.subr.bf16.mxu0 %v6648_v28 }
 0x2a4   : > { %6287 = vmatpush3.bf16.msra.mxu1 %v6644_v5 }
 0x2a5   : > { %6288 = vmatprep.subr.bf16.mxu1 %v6647_v45 }
 0x2a8   : > { %6289 = vmatpush3.bf16.msra.mxu1 %v6647_v45 }
 0x2a9   : > { %6290 = vmatprep.subr.bf16.mxu1 %v6650_v15 }
 0x2ac   : > { %6291 = vmatpush3.bf16.msra.mxu1 %v6650_v15 }
 0x2ad   : > { %6300 = vmatprep.subr.bf16.mxu1 %v7636_v4 }
 0x336   : > { %v5704_v33 = vpop.f32.mrb[24].mxu0 }
 0x337   : > { %v5705_v61 = vpop.f32.mrb[25].mxu0 }
 0x338   : > { %v7639_v8 = vadd.f32 %v5705_v61, %v5704_v33  ;;  %v5707_v9 = vpop.f32.mrb[26].mxu0 }
 0x339   : > { %v5708_v57 = vpop.f32.mrb[27].mxu0 }
 0x33a   : > { %v7641_v53 = vadd.f32 %v5708_v57, %v5707_v9 }
 0x33e   : > { %v5710_v59 = vpop.f32.mrb[28].mxu0 }
 0x33f   : > { %v5711_v49 = vpop.f32.mrb[29].mxu0 }
 0x340   : > { %v7643_v48 = vadd.f32 %v5711_v49, %v5710_v59  ;;  %v5713_v52 = vpop.f32.mrb[30].mxu0 }
 0x341   : > { %v5714_v13 = vpop.f32.mrb[31].mxu0 }
 0x342   : > { %v7645_v32 = vadd.f32 %v5714_v13, %v5713_v52 }
 0x346   : > { %v5716_v1 = vpop.f32.mrb[32].mxu0 }
 0x347   : > { %v5717_v41 = vpop.f32.mrb[33].mxu0 }
 0x348   : > { %v7647_v5 = vadd.f32 %v5717_v41, %v5716_v1  ;;  %v5719_v35 = vpop.f32.mrb[34].mxu0 }
 0x349   : > { %v5720_v11 = vpop.f32.mrb[35].mxu0 }
 0x34a   : > { %v7649_v45 = vadd.f32 %v5720_v11, %v5719_v35 }
 0x34e   : > { %v5722_v28 = vpop.f32.mrb[36].mxu0 }
 0x34f   : > { %v5723_v15 = vpop.f32.mrb[37].mxu0 }
 0x350   : > { %v7651_v33 = vadd.f32 %v5723_v15, %v5722_v28  ;;  %v5725_v61 = vpop.f32.mrb[38].mxu0 }
 0x351   : > { %v5726_v9 = vpop.f32.mrb[39].mxu0 }
 0x352   : > { %v7653_v57 = vadd.f32 %v5726_v9, %v5725_v61 }
 0x356   : > { %v5756_v59 = vpop.f32.mrb[40].mxu0 }
 0x357   : > { %v5757_v49 = vpop.f32.mrb[41].mxu0 }
 0x358   : > { %v5758_v52 = vadd.f32 %v5757_v49, %v5756_v59  ;;  %v5759_v13 = vpop.f32.mrb[42].mxu0 }
 0x359   : > { %v5760_v25 = vpop.f32.mrb[43].mxu0 }
 0x35a   : > { %v5761_v38 = vadd.f32 %v5760_v25, %v5759_v13  ;;  %v1940_v61 = vadd.f32 %v5758_v52, %v7655_v29 }
 0x35c   : > { %v1943_v25 = vadd.f32 %v5761_v38, %v7655_v29 }
 0x35e   : > { %v5762_v1 = vpop.f32.mrb[44].mxu0 }
 0x35f   : > { %v5763_v41 = vpop.f32.mrb[45].mxu0 }
 0x360   : > { %v5764_v35 = vadd.f32 %v5763_v41, %v5762_v1  ;;  %v5765_v11 = vpop.f32.mrb[46].mxu0 }
 0x361   : > { %v5766_v12 = vpop.f32.mrb[47].mxu0 }
 0x362   : > { %v5767_v63 = vadd.f32 %v5766_v12, %v5765_v11  ;;  %v1948_v28 = vadd.f32 %v5764_v35, %v7655_v29  ;;  %v6270_v15 = vpop.f32.mrb[24].mxu1 }
 0x363   : > { %v2004_v9 = vpop.f32.mrb[25].mxu1 }
 0x364   : > { %v2013_v24 = vadd.f32 %v6270_v15, %v1948_v28  ;;  %v2005_v2 = vadd.f32 %v2004_v9, %v1940_v61  ;;  %v1951_v59 = vadd.f32 %v5767_v63, %v7655_v29  ;;  %v6271_v49 = vpop.f32.mrb[26].mxu1 }
 0x365   : > { %v2007_v13 = vpop.f32.mrb[27].mxu1 }
 0x366   : > { %v2037_v21 = vmax.f32 %v2013_v24, 0.0  ;;  %v2035_v22 = vmax.f32 %v2005_v2, 0.0  ;;  %v2016_v1 = vadd.f32 %v6271_v49, %v1951_v59  ;;  %v2008_v41 = vadd.f32 %v2007_v13, %v1943_v25  ;;  %v5768_v34 = vpop.f32.mrb[48].mxu0 }
 0x367   : > { %v5769_v12 = vpop.f32.mrb[49].mxu0 }
 0x368   : > { %v2051_v11 = vrot.slane %v2035_v22, 7  ;;  %v5771_v35 = vpop.f32.mrb[50].mxu0  ;;  %v2086_v40 = vrot.slane %v2037_v21, 1  ;;  %v2038_v56 = vmax.f32 %v2016_v1, 0.0  ;;  %v2036_v52 = vmax.f32 %v2008_v41, 0.0 }
 0x369   : > { %v5770_v37 = vadd.f32 %v5769_v12, %v5768_v34  ;;  %v5772_v28 = vpop.f32.mrb[51].mxu0  ;;  %v2054_v15 = vrot.slane %v2037_v21, 7  ;;  %v2083_v61 = vrot.slane %v2035_v22, 1 }
 0x36a   : > { %v2074_v63 = vsel %vm782_vm0, 0.0, %v2051_v11  ;;  %v5773_v9 = vadd.f32 %v5772_v28, %v5771_v35  ;;  %v6274_v38 = vpop.f32.mrb[28].mxu1  ;;  %v2056_v19 = vrot.slane %v2038_v56, 7  ;;  %v2088_v24 = vrot.slane %v2038_v56, 1 }
 0x36b   : > { %v2052_v2 = vrot.slane %v2036_v52, 7  ;;  %v2084_v59 = vrot.slane %v2036_v52, 1  ;;  %v2020_v49 = vpop.f32.mrb[29].mxu1  ;;  %v1956_v25 = vadd.f32 %v5770_v37, %v7655_v29  ;;  %v2119_v17 = vpack.c.bf16 %v2036_v52, %v2035_v22  ;;  %v6651_v22 = vld [vmem:[#allocation6 + $0x348] sm:$0xff]  }
 0x36c   : > { %v6275_v13 = vpop.f32.mrb[30].mxu1  ;;  %v1959_v1 = vadd.f32 %v5773_v9, %v7655_v29  ;;  %v2120_v41 = vpack.c.bf16 %v2038_v56, %v2037_v21  ;;  %v2089_v34 = vsel %vm815_vm1, %v2086_v40, %v2088_v24  ;;  %v2057_v56 = vsel %vm782_vm0, %v2054_v15, %v2056_v19 }
 0x36d   : > { %v2053_v12 = vsel %vm782_vm0, %v2051_v11, %v2052_v2  ;;  %v2023_v51 = vpop.f32.mrb[31].mxu1  ;;  %v2085_v35 = vsel %vm815_vm1, %v2083_v61, %v2084_v59  ;;  %v2087_v28 = vsel %vm815_vm1, %v2084_v59, %v2086_v40  ;;  %v2021_v58 = vadd.f32 %v2020_v49, %v1956_v25  ;;  %2360 = vmatprep.mubr.bf16.mxu0 %v2119_v17  ;;  %v6652_v61 = vld [vmem:[#allocation6 + $0x308] sm:$0xff]  }
 0x36e   : > { %v5265_v39 = vpack.c.bf16 %v2053_v12, %v2074_v63  ;;  %v2024_v42 = vadd.f32 %v2023_v51, %v1959_v1  ;;  %v5774_v37 = vpop.f32.mrb[52].mxu0  ;;  %v5277_v44 = vpack.c.bf16 %v2087_v28, %v2085_v35  ;;  %v2055_v21 = vsel %vm782_vm0, %v2052_v2, %v2054_v15 }
 0x36f   : > { %v5775_v52 = vpop.f32.mrb[53].mxu0  ;;  %v2039_v9 = vmax.f32 %v2021_v58, 0.0  ;;  %v5268_v17 = vpack.c.bf16 %v2057_v56, %v2055_v21  ;;  %v6654_v58 = vld [vmem:[#allocation6 + $0x350] sm:$0xff]   ;;  %v6657_v21 = vld [vmem:[#allocation6 + $0x358] sm:$0xff]  }
 0x370   : > { %v2040_v11 = vmax.f32 %v2024_v42, 0.0  ;;  %5266 = vmatmul.mubr.msk.bf16.vlgmr.msra.gmra.mrb[56].mxu0 %vm7254_vm8, %v5265_v39  ;;  %6292 = vmatprep.mubr.msk.bf16.mxu1 %vm7269_vm9, %v5277_v44  ;;  %v5776_v40 = vadd.f32 %v5775_v52, %v5774_v37  ;;  %v5777_v63 = vpop.f32.mrb[54].mxu0  ;;  %v6655_v37 = vld [vmem:[#allocation6 + $0x310] sm:$0xff]   ;;  %v6656_v52 = vld [vmem:[#allocation6 + $0x388] sm:$0xff]  }
 0x371   : > { %2368 = vmatprep.mubr.bf16.mxu0 %v2120_v41  ;;  %5845 = vmatpush3.bf16.msra.mxu0 %v6649_v18  ;;  %v5778_v51 = vpop.f32.mrb[55].mxu0  ;;  %v2058_v59 = vrot.slane %v2039_v9, 7  ;;  %v2090_v49 = vrot.slane %v2039_v9, 1 }
 0x372   : > { %v2060_v2 = vrot.slane %v2040_v11, 7  ;;  %v2092_v25 = vrot.slane %v2040_v11, 1  ;;  %5846 = vmatprep.subr.bf16.mxu0 %v6651_v22  ;;  %v1964_v42 = vadd.f32 %v5776_v40, %v7655_v29  ;;  %v5779_v15 = vadd.f32 %v5778_v51, %v5777_v63 }
 0x373   : > { %v2121_v39 = vpack.c.bf16 %v2040_v11, %v2039_v9  ;;  %v2091_v1 = vsel %vm815_vm1, %v2088_v24, %v2090_v49  ;;  %v2059_v12 = vsel %vm782_vm0, %v2056_v19, %v2058_v59  ;;  %v6660_v11 = vld [vmem:[#allocation6 + $0x360] sm:$0xff]  }
 0x374   : > { %v2093_v44 = vsel %vm815_vm1, %v2090_v49, %v2092_v25  ;;  %v2061_v18 = vsel %vm782_vm0, %v2058_v59, %v2060_v2  ;;  %v5280_v41 = vpack.c.bf16 %v2091_v1, %v2089_v34  ;;  %v2029_v35 = vadd.f32 %v6274_v38, %v1964_v42  ;;  %v6659_v34 = vld [vmem:[#allocation6 + $0x390] sm:$0xff]   ;;  %v6661_v42 = vld [vmem:[#allocation6 + $0x320] sm:$0xff]   ;;  %v6664_v1 = vld [vmem:[#allocation6 + $0x328] sm:$0xff]  }
 0x375   : > { %v1967_v28 = vadd.f32 %v5779_v15, %v7655_v29  ;;  %5847 = vmatpush3.bf16.msra.mxu0 %v6652_v61  ;;  %v5271_v22 = vpack.c.bf16 %v2061_v18, %v2059_v12  ;;  %v6658_v29 = vld [vmem:[#allocation6 + $0x318] sm:$0xff]   ;;  %v6668_v12 = vld [vmem:[#allocation6 + $0x3a8] sm:$0xff]   ;;  %v6667_v18 = vld [vmem:[#allocation6 + $0x330] sm:$0xff]  }
 0x376   : > { %5848 = vmatprep.subr.bf16.mxu0 %v6654_v58  ;;  %v2041_v56 = vmax.f32 %v2029_v35, 0.0  ;;  %6293 = vmatmul.mubr.msk.bf16.vlgmr.msra.gmra.mrb[16].mxu1 %vm7352_vm14, %v5280_v41  ;;  %v6669_v41 = vld [vmem:[#allocation6 + $0x378] sm:$0xff]   ;;  %v6671_v35 = vld [vmem:[#allocation6 + $0x3b0] sm:$0xff]  }
 0x377   : > { %v2032_v9 = vadd.f32 %v6275_v13, %v1967_v28  ;;  %6301 = vmatpush3.bf16.msra.mxu1 %v7636_v4  ;;  %v6670_v28 = vld [vmem:[#allocation6 + $0x338] sm:$0xff]  }
 0x378   : > { %5269 = vmatmul.mubr.msk.bf16.gmra.mrb[60].mxu0 %vm7363_vm15, %v5268_v17  ;;  %v2062_v19 = vrot.slane %v2041_v56, 7  ;;  %v2094_v38 = vrot.slane %v2041_v56, 1  ;;  %6302 = vmatprep.subr.bf16.mxu1 %v6656_v52 }
 0x379   : > { %v2042_v24 = vmax.f32 %v2032_v9, 0.0  ;;  %2376 = vmatprep.mubr.bf16.mxu0 %v2121_v39  ;;  %5849 = vmatpush3.bf16.msra.mxu0 %v6655_v37  ;;  %v6663_v39 = vld [vmem:[#allocation6 + $0x368] sm:$0xff]   ;;  %v6672_v37 = vld [vmem:[#allocation6 + $0x3b8] sm:$0xff]   ;;  %v6677_v9 = vld [vmem:[#allocation6 + $0x410] sm:$0xff]  }
 0x37a   : > { %5850 = vmatprep.subr.bf16.mxu0 %v6657_v21  ;;  %v2095_v63 = vsel %vm815_vm1, %v2092_v25, %v2094_v38  ;;  %v2063_v61 = vsel %vm782_vm0, %v2060_v2, %v2062_v19  ;;  %v6662_v25 = vld [vmem:[#allocation6 + $0x398] sm:$0xff]   ;;  %v6665_v2 = vld [vmem:[#allocation6 + $0x3a0] sm:$0xff]   ;;  %v6675_v21 = vld [vmem:[#allocation6 + $0x408] sm:$0xff]  }
 0x37b   : > { %v2064_v40 = vrot.slane %v2042_v24, 7  ;;  %v2096_v13 = vrot.slane %v2042_v24, 1  ;;  %v2122_v51 = vpack.c.bf16 %v2042_v24, %v2041_v56  ;;  %6303 = vmatpush3.bf16.msra.mxu1 %v6656_v52  ;;  %v5283_v4 = vpack.c.bf16 %v2095_v63, %v2093_v44  ;;  %v6666_v44 = vld [vmem:[#allocation6 + $0x370] sm:$0xff]   ;;  %v6674_v52 = vld [vmem:[#allocation6 + $0x3c0] sm:$0xff]   ;;  %v6676_v56 = vld [vmem:[#allocation6 + $0x3c8] sm:$0xff]  }
 0x37c   : > { %6304 = vmatprep.subr.bf16.mxu1 %v6659_v34  ;;  %v6679_v24 = vld [vmem:[#allocation6 + $0x418] sm:$0xff]   ;;  %v6685_v63 = vld [vmem:[#allocation6 + $0x428] sm:$0xff]  }
 0x37d   : > { %5851 = vmatpush3.bf16.msra.mxu0 %v6658_v29  ;;  %v2097_v17 = vsel %vm815_vm1, %v2094_v38, %v2096_v13  ;;  %v2106_v59 = vsel %vm815_vm1, %v2096_v13, 0.0  ;;  %v2065_v49 = vsel %vm782_vm0, %v2062_v19, %v2064_v40  ;;  %6296 = vmatprep.mubr.msk.bf16.mxu1 %vm7376_vm2, %v5283_v4  ;;  %v6678_v19 = vld [vmem:[#allocation6 + $0x3d0] sm:$0xff]   ;;  %v6680_v38 = vld [vmem:[#allocation6 + $0x440] sm:$0xff]   ;;  %v6681_v29 = vld [vmem:[#allocation6 + $0x3d8] sm:$0xff]  }
 0x37e   : > { %5852 = vmatprep.subr.bf16.mxu0 %v6660_v11  ;;  %v5286_v58 = vpack.c.bf16 %v2106_v59, %v2097_v17  ;;  %v5274_v15 = vpack.c.bf16 %v2065_v49, %v2063_v61  ;;  %v6682_v11 = vld [vmem:[#allocation6 + $0x420] sm:$0xff]   ;;  %v6686_v13 = vld [vmem:[#allocation6 + $0x450] sm:$0xff]   ;;  %v6689_v4 = vld [vmem:[#allocation6 + $0x458] sm:$0xff]  }
 0x37f   : > { %6305 = vmatpush3.bf16.msra.mxu1 %v6659_v34  ;;  %v6683_v34 = vld [vmem:[#allocation6 + $0x448] sm:$0xff]   ;;  %v6684_v40 = vld [vmem:[#allocation6 + $0x3e0] sm:$0xff]   ;;  %v6688_v61 = vld [vmem:[#allocation6 + $0x430] sm:$0xff]  }
 0x380   : > { %5272 = vmatmul.mubr.msk.bf16.gmra.mrb[64].mxu0 %vm7425_vm10, %v5271_v22  ;;  %6297 = vmatmul.mubr.msk.bf16.gmra.mrb[20].mxu1 %vm7415_vm7, %v5286_v58  ;;  %v6673_v22 = vld [vmem:[#allocation6 + $0x400] sm:$0xff]   ;;  %v6690_v17 = vld [vmem:[#allocation6 + $0x3f0] sm:$0xff]   ;;  %v6691_v49 = vld [vmem:[#allocation6 + $0x438] sm:$0xff]  }
 0x381   : > { %2384 = vmatprep.mubr.bf16.mxu0 %v2122_v51  ;;  %5853 = vmatpush3.bf16.msra.mxu0 %v6661_v42  ;;  %v6687_v51 = vld [vmem:[#allocation6 + $0x3e8] sm:$0xff]   ;;  %v6692_v59 = vld [vmem:[#allocation6 + $0x460] sm:$0xff]   ;;  %v6693_v58 = vld [vmem:[#allocation6 + $0x3f8] sm:$0xff]  }
 0x382   : > { %6306 = vmatprep.subr.bf16.mxu1 %v6662_v25  ;;  %6316 = vmatprep.mubr.msk.bf16.mxu1 %vm7269_vm9, %v7280_v10  ;;  %v6694_v42 = vld [vmem:[#allocation6 + $0x468] sm:$0xff]  }
 0x383   : > { %5854 = vmatprep.subr.bf16.mxu0 %v6663_v39  ;;  %6307 = vmatpush3.bf16.msra.mxu1 %v6662_v25  ;;  %v6695_v25 = vld [vmem:[#allocation6 + $0x4c0] sm:$0xff]   ;;  %v6700_v39 = vld [vmem:[#allocation6 + $0x478] sm:$0xff]  }
 0x384   : > { %6308 = vmatprep.subr.bf16.mxu1 %v6665_v2 }
 0x385   : > { %5855 = vmatpush3.bf16.msra.mxu0 %v6664_v1 }
 0x386   : > { %5856 = vmatprep.subr.bf16.mxu0 %v6666_v44  ;;  %v7729_v44 = vld [vmem:[#allocation7 + $0x1] ss:$0 sm:$0xff] }
 0x387   : > { %6309 = vmatpush3.bf16.msra.mxu1 %v6665_v2  ;;  %v7726_v2 = vld [vmem:[#allocation6 + $0x500] sm:$0xff]  }
 0x388   : > { %5275 = vmatmul.mubr.msk.bf16.gmra.mrb[68].mxu0 %vm7446_vm13, %v5274_v15  ;;  %6310 = vmatprep.subr.bf16.mxu1 %v6668_v12  ;;  %v6697_v15 = vld [vmem:[#allocation6 + $0x470] sm:$0xff]  }
 0x389   : > { %2699 = vmatprep.mubr.bf16.mxu0 %v7244_v55  ;;  %5857 = vmatpush3.bf16.msra.mxu0 %v6667_v18 }
 0x38a   : > { %5858 = vmatprep.subr.bf16.mxu0 %v6669_v41 }
 0x38b   : > { %6311 = vmatpush3.bf16.msra.mxu1 %v6668_v12  ;;  %v7731_v12 = vld [vmem:[#allocation7 + $0x3] ss:$0 sm:$0xff] }
 0x38c   : > { %6312 = vmatprep.subr.bf16.mxu1 %v6671_v35 }
 0x38d   : > { %5859 = vmatpush3.bf16.msra.mxu0 %v6670_v28 }
 0x38e   : > { %5896 = vmatprep.subr.bf16.mxu0 %v6673_v22 }
 0x38f   : > { %6313 = vmatpush3.bf16.msra.mxu1 %v6671_v35 }
 0x390   : > { %5315 = vmatmul.mubr.msk.bf16.vlgmr.msra.gmra.mrb[72].mxu0 %vm7254_vm8, %v7276_v7  ;;  %6314 = vmatprep.subr.bf16.mxu1 %v6672_v37 }
 0x391   : > { %2707 = vmatprep.mubr.bf16.mxu0 %v7294_v16  ;;  %5897 = vmatpush3.bf16.msra.mxu0 %v6674_v52 }
 0x392   : > { %5898 = vmatprep.subr.bf16.mxu0 %v6675_v21  ;;  %v1520_v21 = vadd.f32 %v7641_v53, %v7729_v44 }
 0x393   : > { %6315 = vmatpush3.bf16.msra.mxu1 %v6672_v37  ;;  %v1517_v37 = vadd.f32 %v7639_v8, %v7729_v44 }
 0x394   : > { %6324 = vmatprep.subr.bf16.mxu1 %v6680_v38 }
 0x395   : > { %5899 = vmatpush3.bf16.msra.mxu0 %v6676_v56 }
 0x396   : > { %6317 = vmatmul.mubr.msk.bf16.vlgmr.msra.gmra.mrb[32].mxu1 %vm7352_vm14, %v7357_v46  ;;  %5900 = vmatprep.subr.bf16.mxu0 %v6677_v9 }
 0x397   : > { %6320 = vmatprep.mubr.msk.bf16.mxu1 %vm7376_vm2, %v7387_v0  ;;  %6325 = vmatpush3.bf16.msra.mxu1 %v6680_v38 }
 0x398   : > { %5318 = vmatmul.mubr.msk.bf16.gmra.mrb[76].mxu0 %vm7363_vm15, %v7385_v62  ;;  %6326 = vmatprep.subr.bf16.mxu1 %v6683_v34 }
 0x399   : > { %2715 = vmatprep.mubr.bf16.mxu0 %v7394_v6  ;;  %5901 = vmatpush3.bf16.msra.mxu0 %v6678_v19 }
 0x39a   : > { %5902 = vmatprep.subr.bf16.mxu0 %v6679_v24 }
 0x39b   : > { %6327 = vmatpush3.bf16.msra.mxu1 %v6683_v34 }
 0x39c   : > { %6328 = vmatprep.subr.bf16.mxu1 %v6686_v13 }
 0x39d   : > { %5903 = vmatpush3.bf16.msra.mxu0 %v6681_v29 }
 0x39e   : > { %6321 = vmatmul.mubr.msk.bf16.gmra.mrb[36].mxu1 %vm7415_vm7, %v7420_v26  ;;  %5904 = vmatprep.subr.bf16.mxu0 %v6682_v11 }
 0x39f   : > { %6329 = vmatpush3.bf16.msra.mxu1 %v6686_v13 }
 0x3a0   : > { %5321 = vmatmul.mubr.msk.bf16.gmra.mrb[80].mxu0 %vm7425_vm10, %v7432_v36  ;;  %6330 = vmatprep.subr.bf16.mxu1 %v6689_v4 }
 0x3a1   : > { %2723 = vmatprep.mubr.bf16.mxu0 %v7437_v50  ;;  %5905 = vmatpush3.bf16.msra.mxu0 %v6684_v40 }
 0x3a2   : > { %5906 = vmatprep.subr.bf16.mxu0 %v6685_v63 }
 0x3a3   : > { %6331 = vmatpush3.bf16.msra.mxu1 %v6689_v4  ;;  %v1525_v4 = vadd.f32 %v7643_v48, %v7729_v44 }
 0x3a4   : > { %6332 = vmatprep.subr.bf16.mxu1 %v6692_v59 }
 0x3a5   : > { %5907 = vmatpush3.bf16.msra.mxu0 %v6687_v51 }
 0x3a6   : > { %5908 = vmatprep.subr.bf16.mxu0 %v6688_v61 }
 0x3a7   : > { %6333 = vmatpush3.bf16.msra.mxu1 %v6692_v59  ;;  %v1528_v59 = vadd.f32 %v7645_v32, %v7729_v44  ;;  %v1533_v32 = vadd.f32 %v7647_v5, %v7729_v44 }
 0x3a8   : > { %5324 = vmatmul.mubr.msk.bf16.gmra.mrb[84].mxu0 %vm7446_vm13, %v7450_v27  ;;  %6334 = vmatprep.subr.bf16.mxu1 %v6694_v42 }
 0x3a9   : > { %5909 = vmatpush3.bf16.msra.mxu0 %v6690_v17 }
 0x3aa   : > { %5910 = vmatprep.subr.bf16.mxu0 %v6691_v49 }
 0x3ab   : > { %6335 = vmatpush3.bf16.msra.mxu1 %v6694_v42 }
 0x3ac   : > { %6336 = vmatprep.subr.bf16.mxu1 %v6697_v15 }
 0x3ad   : > { %5911 = vmatpush3.bf16.msra.mxu0 %v6693_v58 }
 0x3ae   : > { %5948 = vmatprep.subr.bf16.mxu0 %v6695_v25 }
 0x3af   : > { %6337 = vmatpush3.bf16.msra.mxu1 %v6697_v15 }
 0x3b0   : > { %6338 = vmatprep.subr.bf16.mxu1 %v6700_v39 }
 0x3b3   : > { %6339 = vmatpush3.bf16.msra.mxu1 %v6700_v39 }
 0x3b4   : > { %6348 = vmatprep.subr.bf16.mxu1 %v7726_v2 }
 0x443   : > { %v5808_v1 = vpop.f32.mrb[56].mxu0 }
 0x444   : > { %v5809_v18 = vpop.f32.mrb[57].mxu0 }
 0x445   : > { %v5810_v41 = vadd.f32 %v5809_v18, %v5808_v1  ;;  %v5811_v35 = vpop.f32.mrb[58].mxu0 }
 0x446   : > { %v5812_v28 = vpop.f32.mrb[59].mxu0 }
 0x447   : > { %v2363_v22 = vadd.f32 %v5810_v41, %v7731_v12  ;;  %v5813_v52 = vadd.f32 %v5812_v28, %v5811_v35 }
 0x449   : > { %v2366_v56 = vadd.f32 %v5813_v52, %v7731_v12  ;;  %v6446_v9 = vadd.f32 %v2363_v22, %v1517_v37  ;;  %v6294_v19 = vpop.f32.mrb[16].mxu1 }
 0x44a   : > { %v2427_v24 = vpop.f32.mrb[17].mxu1 }
 0x44b   : > { %v5814_v38 = vpop.f32.mrb[60].mxu0  ;;  %v6450_v29 = vadd.f32 %v2366_v56, %v1520_v21  ;;  %v6447_v34 = vadd.f32 %v6446_v9, %v2427_v24  ;;  %v6295_v40 = vpop.f32.mrb[18].mxu1  ;;  %v1536_v56 = vadd.f32 %v7649_v45, %v7729_v44 }
 0x44c   : > { %v5815_v11 = vpop.f32.mrb[61].mxu0  ;;  %v2430_v8 = vpop.f32.mrb[19].mxu1 }
 0x44d   : > { %v5816_v13 = vadd.f32 %v5815_v11, %v5814_v38  ;;  %v5817_v63 = vpop.f32.mrb[62].mxu0  ;;  %4752 = vst [vmem:[%s7740_s21] sm:$0xff] %v6447_v34  ;;  %v6451_v51 = vadd.f32 %v6450_v29, %v2430_v8 }
 0x44e   : > { %v5818_v53 = vpop.f32.mrb[63].mxu0 }
 0x44f   : > { %v2371_v61 = vadd.f32 %v5816_v13, %v7731_v12  ;;  %v5819_v17 = vadd.f32 %v5818_v53, %v5817_v63  ;;  %4753 = vst [vmem:[%s7740_s21 + $0x8] sm:$0xff] %v6451_v51  ;;  %v1541_v63 = vadd.f32 %v7651_v33, %v7729_v44  ;;  %v1544_v51 = vadd.f32 %v7653_v57, %v7729_v44 }
 0x451   : > { %v6444_v49 = vadd.f32 %v2371_v61, %v1525_v4  ;;  %v2374_v58 = vadd.f32 %v5819_v17, %v7731_v12 }
 0x453   : > { %v6448_v42 = vadd.f32 %v2374_v58, %v1528_v59  ;;  %v5820_v25 = vpop.f32.mrb[64].mxu0  ;;  %v6445_v15 = vadd.f32 %v6444_v49, %v6294_v19  ;;  %v6298_v1 = vpop.f32.mrb[20].mxu1 }
 0x454   : > { %v5821_v39 = vpop.f32.mrb[65].mxu0  ;;  %v2443_v35 = vpop.f32.mrb[21].mxu1 }
 0x455   : > { %v5822_v18 = vadd.f32 %v5821_v39, %v5820_v25  ;;  %v5823_v41 = vpop.f32.mrb[66].mxu0  ;;  %4754 = vst [vmem:[%s7740_s21 + $0x10] sm:$0xff] %v6445_v15  ;;  %v6449_v48 = vadd.f32 %v6448_v42, %v6295_v40  ;;  %v6299_v37 = vpop.f32.mrb[22].mxu1  ;;  %v7768_v15 = vld [vmem:[#allocation7 + $0x4] ss:$0 sm:$0xff] }
 0x456   : > { %v5824_v28 = vpop.f32.mrb[67].mxu0  ;;  %v2446_v21 = vpop.f32.mrb[23].mxu1 }
 0x457   : > { %v2379_v22 = vadd.f32 %v5822_v18, %v7731_v12  ;;  %v5825_v52 = vadd.f32 %v5824_v28, %v5823_v41  ;;  %4755 = vst [vmem:[%s7740_s21 + $0x18] sm:$0xff] %v6449_v48 }
 0x459   : > { %v6454_v9 = vadd.f32 %v2379_v22, %v1533_v32  ;;  %v2382_v19 = vadd.f32 %v5825_v52, %v7731_v12 }
 0x45b   : > { %v6455_v38 = vadd.f32 %v6454_v9, %v2443_v35  ;;  %v6458_v24 = vadd.f32 %v2382_v19, %v1536_v56  ;;  %v5826_v29 = vpop.f32.mrb[68].mxu0 }
 0x45c   : > { %v5827_v34 = vpop.f32.mrb[69].mxu0 }
 0x45d   : > { %4756 = vst [vmem:[%s7740_s21 + $0x20] sm:$0xff] %v6455_v38  ;;  %v6459_v11 = vadd.f32 %v6458_v24, %v2446_v21  ;;  %v5828_v5 = vadd.f32 %v5827_v34, %v5826_v29  ;;  %v5829_v40 = vpop.f32.mrb[70].mxu0 }
 0x45e   : > { %v5830_v13 = vpop.f32.mrb[71].mxu0 }
 0x45f   : > { %4757 = vst [vmem:[%s7740_s21 + $0x28] sm:$0xff] %v6459_v11  ;;  %v2387_v45 = vadd.f32 %v5828_v5, %v7731_v12  ;;  %v5831_v8 = vadd.f32 %v5830_v13, %v5829_v40 }
 0x461   : > { %v6452_v53 = vadd.f32 %v2387_v45, %v1541_v63  ;;  %v2390_v4 = vadd.f32 %v5831_v8, %v7731_v12 }
 0x463   : > { %v6453_v61 = vadd.f32 %v6452_v53, %v6298_v1  ;;  %v6456_v17 = vadd.f32 %v2390_v4, %v1544_v51  ;;  %v5860_v59 = vpop.f32.mrb[72].mxu0 }
 0x464   : > { %v5861_v58 = vpop.f32.mrb[73].mxu0 }
 0x465   : > { %4758 = vst [vmem:[%s7740_s21 + $0x30] sm:$0xff] %v6453_v61  ;;  %v6457_v49 = vadd.f32 %v6456_v17, %v6299_v37  ;;  %v5862_v42 = vadd.f32 %v5861_v58, %v5860_v59  ;;  %v5863_v25 = vpop.f32.mrb[74].mxu0  ;;  %v6696_v61 = vld [vmem:[#allocation6 + $0x480] sm:$0xff]  }
 0x466   : > { %v5864_v33 = vpop.f32.mrb[75].mxu0 }
 0x467   : > { %4759 = vst [vmem:[%s7740_s21 + $0x38] sm:$0xff] %v6457_v49  ;;  %v5865_v39 = vadd.f32 %v5864_v33, %v5863_v25  ;;  %v2702_v41 = vadd.f32 %v5862_v42, %v7768_v15  ;;  %v6698_v25 = vld [vmem:[#allocation6 + $0x4c8] sm:$0xff]  }
 0x469   : > { %v6318_v18 = vpop.f32.mrb[32].mxu1  ;;  %v2705_v1 = vadd.f32 %v5865_v39, %v7768_v15 }
 0x46a   : > { %v2766_v57 = vpop.f32.mrb[33].mxu1 }
 0x46b   : > { %v2767_v44 = vadd.f32 %v2766_v57, %v2702_v41  ;;  %v5866_v35 = vpop.f32.mrb[76].mxu0  ;;  %v6319_v12 = vpop.f32.mrb[34].mxu1 }
 0x46c   : > { %v5867_v48 = vpop.f32.mrb[77].mxu0  ;;  %v2769_v28 = vpop.f32.mrb[35].mxu1 }
 0x46d   : > { %v2797_v37 = vmax.f32 %v2767_v44, 0.0  ;;  %v5868_v32 = vadd.f32 %v5867_v48, %v5866_v35  ;;  %v2770_v22 = vadd.f32 %v2769_v28, %v2705_v1  ;;  %v5869_v52 = vpop.f32.mrb[78].mxu0 }
 0x46e   : > { %v5870_v21 = vpop.f32.mrb[79].mxu0 }
 0x46f   : > { %v2813_v56 = vrot.slane %v2797_v37, 7  ;;  %v2710_v9 = vadd.f32 %v5868_v32, %v7768_v15  ;;  %v2798_v19 = vmax.f32 %v2770_v22, 0.0  ;;  %v5871_v38 = vadd.f32 %v5870_v21, %v5869_v52  ;;  %v6701_v21 = vld [vmem:[#allocation6 + $0x4d0] sm:$0xff]  }
 0x470   : > { %v2845_v24 = vrot.slane %v2797_v37, 1 }
 0x471   : > { %v2775_v29 = vadd.f32 %v6318_v18, %v2710_v9  ;;  %v2814_v34 = vrot.slane %v2798_v19, 7  ;;  %v2846_v11 = vrot.slane %v2798_v19, 1  ;;  %v7773_v5 = vpop.f32.mrb[36].mxu1  ;;  %v2713_v40 = vadd.f32 %v5871_v38, %v7768_v15 }
 0x472   : > { %v2782_v13 = vpop.f32.mrb[37].mxu1  ;;  %v2881_v63 = vpack.c.bf16 %v2798_v19, %v2797_v37  ;;  %v2836_v45 = vsel %vm782_vm0, 0.0, %v2813_v56 }
 0x473   : > { %v2799_v8 = vmax.f32 %v2775_v29, 0.0  ;;  %v2815_v51 = vsel %vm782_vm0, %v2813_v56, %v2814_v34  ;;  %v5872_v53 = vpop.f32.mrb[80].mxu0  ;;  %v7778_v4 = vpop.f32.mrb[38].mxu1  ;;  %v2847_v17 = vsel %vm815_vm1, %v2845_v24, %v2846_v11  ;;  %v2778_v49 = vadd.f32 %v6319_v12, %v2713_v40  ;;  %v6699_v12 = vld [vmem:[#allocation6 + $0x488] sm:$0xff]   ;;  %v6702_v40 = vld [vmem:[#allocation6 + $0x490] sm:$0xff]  }
 0x474   : > { %v5363_v59 = vpack.c.bf16 %v2815_v51, %v2836_v45  ;;  %3122 = vmatprep.mubr.bf16.mxu0 %v2881_v63  ;;  %v5873_v58 = vpop.f32.mrb[81].mxu0  ;;  %v2785_v42 = vpop.f32.mrb[39].mxu1  ;;  %v6703_v45 = vld [vmem:[#allocation6 + $0x4d8] sm:$0xff]  }
 0x475   : > { %v2816_v33 = vrot.slane %v2799_v8, 7  ;;  %v2848_v39 = vrot.slane %v2799_v8, 1  ;;  %v5874_v18 = vadd.f32 %v5873_v58, %v5872_v53  ;;  %v5875_v41 = vpop.f32.mrb[82].mxu0  ;;  %v2800_v57 = vmax.f32 %v2778_v49, 0.0 }
 0x476   : > { %v5876_v44 = vpop.f32.mrb[83].mxu0  ;;  %5364 = vmatmul.mubr.msk.bf16.vlgmr.msra.gmra.mrb[88].mxu0 %vm7254_vm8, %v5363_v59 }
 0x477   : > { %v2718_v35 = vadd.f32 %v5874_v18, %v7768_v15  ;;  %v5877_v1 = vadd.f32 %v5876_v44, %v5875_v41  ;;  %5949 = vmatpush3.bf16.msra.mxu0 %v6696_v61  ;;  %v2849_v48 = vsel %vm815_vm1, %v2846_v11, %v2848_v39  ;;  %v2817_v28 = vsel %vm782_vm0, %v2814_v34, %v2816_v33  ;;  %v6706_v41 = vld [vmem:[#allocation6 + $0x4e0] sm:$0xff]  }
 0x478   : > { %v2818_v37 = vrot.slane %v2800_v57, 7  ;;  %v2850_v32 = vrot.slane %v2800_v57, 1  ;;  %v2882_v22 = vpack.c.bf16 %v2800_v57, %v2799_v8  ;;  %5950 = vmatprep.subr.bf16.mxu0 %v6698_v25  ;;  %v5375_v52 = vpack.c.bf16 %v2849_v48, %v2847_v17  ;;  %v6705_v25 = vld [vmem:[#allocation6 + $0x498] sm:$0xff]   ;;  %v6707_v57 = vld [vmem:[#allocation6 + $0x508] sm:$0xff]  }
 0x479   : > { %v2783_v56 = vadd.f32 %v2782_v13, %v2718_v35  ;;  %v2721_v9 = vadd.f32 %v5877_v1, %v7768_v15 }
 0x47a   : > { %v2851_v19 = vsel %vm815_vm1, %v2848_v39, %v2850_v32  ;;  %3130 = vmatprep.mubr.bf16.mxu0 %v2882_v22  ;;  %6340 = vmatprep.mubr.msk.bf16.mxu1 %vm7269_vm9, %v5375_v52  ;;  %v2819_v38 = vsel %vm782_vm0, %v2816_v33, %v2818_v37  ;;  %v6708_v22 = vld [vmem:[#allocation6 + $0x4a0] sm:$0xff]   ;;  %v6710_v52 = vld [vmem:[#allocation6 + $0x510] sm:$0xff]  }
 0x47b   : > { %v2801_v24 = vmax.f32 %v2783_v56, 0.0  ;;  %v2786_v29 = vadd.f32 %v2785_v42, %v2721_v9  ;;  %5951 = vmatpush3.bf16.msra.mxu0 %v6699_v12  ;;  %v5878_v34 = vpop.f32.mrb[84].mxu0  ;;  %v5366_v11 = vpack.c.bf16 %v2819_v38, %v2817_v28 }
 0x47c   : > { %v5879_v63 = vpop.f32.mrb[85].mxu0  ;;  %5952 = vmatprep.subr.bf16.mxu0 %v6701_v21 }
 0x47d   : > { %v2820_v13 = vrot.slane %v2801_v24, 7  ;;  %v2852_v8 = vrot.slane %v2801_v24, 1  ;;  %v2802_v51 = vmax.f32 %v2786_v29, 0.0  ;;  %v5880_v53 = vadd.f32 %v5879_v63, %v5878_v34  ;;  %v5881_v61 = vpop.f32.mrb[86].mxu0  ;;  %v6712_v34 = vld [vmem:[#allocation6 + $0x4f0] sm:$0xff]  }
 0x47e   : > { %v5882_v17 = vpop.f32.mrb[87].mxu0  ;;  %5367 = vmatmul.mubr.msk.bf16.gmra.mrb[92].mxu0 %vm7363_vm15, %v5366_v11  ;;  %v6713_v11 = vld [vmem:[#allocation6 + $0x518] sm:$0xff]  }
 0x47f   : > { %v2853_v59 = vsel %vm815_vm1, %v2850_v32, %v2852_v8  ;;  %v2822_v49 = vrot.slane %v2802_v51, 7  ;;  %v2854_v58 = vrot.slane %v2802_v51, 1  ;;  %v2726_v42 = vadd.f32 %v5880_v53, %v7768_v15  ;;  %5953 = vmatpush3.bf16.msra.mxu0 %v6702_v40  ;;  %v6715_v53 = vld [vmem:[#allocation6 + $0x4f8] sm:$0xff]  }
 0x480   : > { %v5378_v33 = vpack.c.bf16 %v2853_v59, %v2851_v19  ;;  %v5883_v39 = vadd.f32 %v5882_v17, %v5881_v61  ;;  %v2883_v18 = vpack.c.bf16 %v2802_v51, %v2801_v24  ;;  %5954 = vmatprep.subr.bf16.mxu0 %v6703_v45  ;;  %v2821_v44 = vsel %vm782_vm0, %v2818_v37, %v2820_v13  ;;  %v6711_v19 = vld [vmem:[#allocation6 + $0x4a8] sm:$0xff]   ;;  %v6714_v51 = vld [vmem:[#allocation6 + $0x4b0] sm:$0xff]   ;;  %v6716_v61 = vld [vmem:[#allocation6 + $0x520] sm:$0xff]  }
 0x481   : > { %v2791_v35 = vadd.f32 %v7773_v5, %v2726_v42  ;;  %v2823_v1 = vsel %vm782_vm0, %v2820_v13, %v2822_v49  ;;  %v2855_v48 = vsel %vm815_vm1, %v2852_v8, %v2854_v58  ;;  %v6709_v5 = vld [vmem:[#allocation6 + $0x4e8] sm:$0xff]   ;;  %v6717_v17 = vld [vmem:[#allocation6 + $0x4b8] sm:$0xff]  }
 0x482   : > { %v2729_v12 = vadd.f32 %v5883_v39, %v7768_v15  ;;  %3138 = vmatprep.mubr.bf16.mxu0 %v2883_v18  ;;  %6341 = vmatmul.mubr.msk.bf16.vlgmr.msra.gmra.mrb[40].mxu1 %vm7352_vm14, %v5378_v33  ;;  %v5369_v28 = vpack.c.bf16 %v2823_v1, %v2821_v44  ;;  %v6718_v59 = vld [vmem:[#allocation6 + $0x528] sm:$0xff]   ;;  %v6720_v42 = vld [vmem:[#allocation6 + $0x538] sm:$0xff]   ;;  %v6722_v1 = vld [vmem:[#allocation6 + $0x540] sm:$0xff]  }
 0x483   : > { %v2803_v32 = vmax.f32 %v2791_v35, 0.0  ;;  %5955 = vmatpush3.bf16.msra.mxu0 %v6705_v25  ;;  %6349 = vmatpush3.bf16.msra.mxu1 %v7726_v2  ;;  %v8203_v25 = vld [vmem:[#allocation31_spill] sm:$0xff]  ;;  %v8205_v33 = vld [vmem:[#allocation33_spill] sm:$0xff]  ;;  %v8206_v39 = vld [vmem:[#allocation34_spill] sm:$0xff] }
 0x484   : > { %v2794_v37 = vadd.f32 %v7778_v4, %v2729_v12  ;;  %5956 = vmatprep.subr.bf16.mxu0 %v6706_v41  ;;  %6350 = vmatprep.subr.bf16.mxu1 %v6707_v57  ;;  %v8207_v18 = vld [vmem:[#allocation35_spill] sm:$0xff]  ;;  %v8208_v41 = vld [vmem:[#allocation36_spill] sm:$0xff]  ;;  %v8210_v44 = vld [vmem:[#allocation38_spill] sm:$0xff] }
 0x485   : > { %v2824_v21 = vrot.slane %v2803_v32, 7  ;;  %v2856_v56 = vrot.slane %v2803_v32, 1  ;;  %v6721_v35 = vld [vmem:[#allocation6 + $0x580] sm:$0xff]   ;;  %v6724_v12 = vld [vmem:[#allocation6 + $0x548] sm:$0xff]  }
 0x486   : > { %v2804_v9 = vmax.f32 %v2794_v37, 0.0  ;;  %5370 = vmatmul.mubr.msk.bf16.gmra.mrb[96].mxu0 %vm7425_vm10, %v5369_v28  ;;  %v6725_v28 = vld [vmem:[#allocation6 + $0x5c0] sm:$0xff]   ;;  %v6728_v37 = vld [vmem:[#allocation6 + $0x5c8] sm:$0xff]  }
 0x487   : > { %5957 = vmatpush3.bf16.msra.mxu0 %v6708_v22  ;;  %6351 = vmatpush3.bf16.msra.mxu1 %v6707_v57  ;;  %v2857_v15 = vsel %vm815_vm1, %v2854_v58, %v2856_v56  ;;  %v2825_v2 = vsel %vm782_vm0, %v2822_v49, %v2824_v21  ;;  %v6719_v49 = vld [vmem:[#allocation6 + $0x530] sm:$0xff]   ;;  %v8201_v58 = vld [vmem:[#allocation27_spill] sm:$0xff] }
 0x488   : > { %v2826_v38 = vrot.slane %v2804_v9, 7  ;;  %v2858_v24 = vrot.slane %v2804_v9, 1  ;;  %v2884_v4 = vpack.c.bf16 %v2804_v9, %v2803_v32  ;;  %5958 = vmatprep.subr.bf16.mxu0 %v6709_v5  ;;  %6352 = vmatprep.subr.bf16.mxu1 %v6710_v52  ;;  %v5381_v29 = vpack.c.bf16 %v2857_v15, %v2855_v48  ;;  %v8209_v57 = vld [vmem:[#allocation37_spill] sm:$0xff]  ;;  %v6729_v5 = vld [vmem:[#allocation6 + $0x598] sm:$0xff]   ;;  %v6733_v9 = vld [vmem:[#allocation6 + $0x560] sm:$0xff]  }
 0x489   : > { %v6723_v48 = vld [vmem:[#allocation6 + $0x588] sm:$0xff]   ;;  %v6726_v32 = vld [vmem:[#allocation6 + $0x590] sm:$0xff]   ;;  %v6734_v15 = vld [vmem:[#allocation6 + $0x5d8] sm:$0xff]  }
 0x48a   : > { %3146 = vmatprep.mubr.bf16.mxu0 %v2884_v4  ;;  %6344 = vmatprep.mubr.msk.bf16.mxu1 %vm7376_vm2, %v5381_v29  ;;  %v2859_v40 = vsel %vm815_vm1, %v2856_v56, %v2858_v24  ;;  %v2868_v63 = vsel %vm815_vm1, %v2858_v24, 0.0  ;;  %v2827_v45 = vsel %vm782_vm0, %v2824_v21, %v2826_v38  ;;  %v6727_v22 = vld [vmem:[#allocation6 + $0x550] sm:$0xff]   ;;  %v6732_v56 = vld [vmem:[#allocation6 + $0x5a0] sm:$0xff]   ;;  %v6740_v29 = vld [vmem:[#allocation6 + $0x5e8] sm:$0xff]  }
 0x48b   : > { %5959 = vmatpush3.bf16.msra.mxu0 %v6711_v19  ;;  %6353 = vmatpush3.bf16.msra.mxu1 %v6710_v52  ;;  %v5384_v13 = vpack.c.bf16 %v2868_v63, %v2859_v40  ;;  %v5372_v8 = vpack.c.bf16 %v2827_v45, %v2825_v2  ;;  %v6730_v52 = vld [vmem:[#allocation6 + $0x558] sm:$0xff]   ;;  %v6731_v21 = vld [vmem:[#allocation6 + $0x5d0] sm:$0xff]   ;;  %v6735_v19 = vld [vmem:[#allocation6 + $0x5a8] sm:$0xff]  }
 0x48c   : > { %5960 = vmatprep.subr.bf16.mxu0 %v6712_v34  ;;  %6354 = vmatprep.subr.bf16.mxu1 %v6713_v11  ;;  %v6736_v2 = vld [vmem:[#allocation6 + $0x568] sm:$0xff]   ;;  %v6737_v38 = vld [vmem:[#allocation6 + $0x5e0] sm:$0xff]   ;;  %v6738_v24 = vld [vmem:[#allocation6 + $0x5b0] sm:$0xff]  }
 0x48d   : > { %6345 = vmatmul.mubr.msk.bf16.gmra.mrb[44].mxu1 %vm7415_vm7, %v5384_v13  ;;  %v6739_v4 = vld [vmem:[#allocation6 + $0x570] sm:$0xff]   ;;  %v6741_v34 = vld [vmem:[#allocation6 + $0x5b8] sm:$0xff]   ;;  %v6744_v63 = vld [vmem:[#allocation6 + $0x640] sm:$0xff]  }
 0x48e   : > { %6364 = vmatprep.mubr.msk.bf16.mxu1 %vm7269_vm9, %v7533_v20  ;;  %5373 = vmatmul.mubr.msk.bf16.gmra.mrb[100].mxu0 %vm7446_vm13, %v5372_v8  ;;  %v8202_v20 = vld [vmem:[#allocation29_spill] sm:$0xff]  ;;  %v6746_v45 = vld [vmem:[#allocation6 + $0x5f8] sm:$0xff]   ;;  %v7845_v13 = vld [vmem:[#allocation6 + $0x680] sm:$0xff]  }
 0x48f   : > { %5961 = vmatpush3.bf16.msra.mxu0 %v6714_v51  ;;  %6355 = vmatpush3.bf16.msra.mxu1 %v6713_v11  ;;  %v6742_v11 = vld [vmem:[#allocation6 + $0x578] sm:$0xff]   ;;  %v6743_v40 = vld [vmem:[#allocation6 + $0x5f0] sm:$0xff]  }
 0x490   : > { %3461 = vmatprep.mubr.bf16.mxu0 %v7550_v14  ;;  %5962 = vmatprep.subr.bf16.mxu0 %v6715_v53  ;;  %v8204_v14 = vld [vmem:[#allocation32_spill] sm:$0xff] }
 0x491   : > { %6356 = vmatprep.subr.bf16.mxu1 %v6716_v61 }
 0x493   : > { %5963 = vmatpush3.bf16.msra.mxu0 %v6717_v17  ;;  %6357 = vmatpush3.bf16.msra.mxu1 %v6716_v61 }
 0x494   : > { %6358 = vmatprep.subr.bf16.mxu1 %v6718_v59  ;;  %6000 = vmatprep.subr.bf16.mxu0 %v6721_v35 }
 0x496   : > { %5413 = vmatmul.mubr.msk.bf16.vlgmr.msra.gmra.mrb[104].mxu0 %vm7254_vm8, %v8201_v58 }
 0x497   : > { %6359 = vmatpush3.bf16.msra.mxu1 %v6718_v59  ;;  %3469 = vmatprep.mubr.bf16.mxu0 %v8202_v20  ;;  %v5337_v20 = vld [vmem:[#allocation7 + $0x5] ss:$0 sm:$0xff] }
 0x498   : > { %6360 = vmatprep.subr.bf16.mxu1 %v6719_v49  ;;  %6001 = vmatpush3.bf16.msra.mxu0 %v6722_v1 }
 0x499   : > { %6002 = vmatprep.subr.bf16.mxu0 %v6723_v48 }
 0x49b   : > { %6361 = vmatpush3.bf16.msra.mxu1 %v6719_v49 }
 0x49c   : > { %6362 = vmatprep.subr.bf16.mxu1 %v6720_v42  ;;  %6003 = vmatpush3.bf16.msra.mxu0 %v6724_v12 }
 0x49d   : > { %6004 = vmatprep.subr.bf16.mxu0 %v6726_v32  ;;  %v8211_v32 = vld [vmem:[#allocation21_spill] sm:$0xff] }
 0x49e   : > { %5416 = vmatmul.mubr.msk.bf16.gmra.mrb[108].mxu0 %vm7363_vm15, %v8203_v25 }
 0x49f   : > { %6363 = vmatpush3.bf16.msra.mxu1 %v6720_v42  ;;  %3477 = vmatprep.mubr.bf16.mxu0 %v8204_v14 }
 0x4a0   : > { %6372 = vmatprep.subr.bf16.mxu1 %v6725_v28  ;;  %6005 = vmatpush3.bf16.msra.mxu0 %v6727_v22 }
 0x4a1   : > { %6006 = vmatprep.subr.bf16.mxu0 %v6729_v5 }
 0x4a2   : > { %6365 = vmatmul.mubr.msk.bf16.vlgmr.msra.gmra.mrb[48].mxu1 %vm7352_vm14, %v8205_v33 }
 0x4a3   : > { %6368 = vmatprep.mubr.msk.bf16.mxu1 %vm7376_vm2, %v8206_v39  ;;  %6373 = vmatpush3.bf16.msra.mxu1 %v6725_v28 }
 0x4a4   : > { %6374 = vmatprep.subr.bf16.mxu1 %v6728_v37  ;;  %6007 = vmatpush3.bf16.msra.mxu0 %v6730_v52 }
 0x4a5   : > { %6008 = vmatprep.subr.bf16.mxu0 %v6732_v56 }
 0x4a6   : > { %5419 = vmatmul.mubr.msk.bf16.gmra.mrb[112].mxu0 %vm7425_vm10, %v8207_v18 }
 0x4a7   : > { %3485 = vmatprep.mubr.bf16.mxu0 %v8208_v41  ;;  %6375 = vmatpush3.bf16.msra.mxu1 %v6728_v37  ;;  %v8212_v37 = vld [vmem:[#allocation22_spill] sm:$0xff] }
 0x4a8   : > { %6376 = vmatprep.subr.bf16.mxu1 %v6731_v21  ;;  %6009 = vmatpush3.bf16.msra.mxu0 %v6733_v9 }
 0x4a9   : > { %6010 = vmatprep.subr.bf16.mxu0 %v6735_v19 }
 0x4aa   : > { %6369 = vmatmul.mubr.msk.bf16.gmra.mrb[52].mxu1 %vm7415_vm7, %v8209_v57 }
 0x4ab   : > { %6377 = vmatpush3.bf16.msra.mxu1 %v6731_v21 }
 0x4ac   : > { %6378 = vmatprep.subr.bf16.mxu1 %v6734_v15  ;;  %6011 = vmatpush3.bf16.msra.mxu0 %v6736_v2  ;;  %v8214_v2 = vld [vmem:[#allocation23_spill] sm:$0xff] }
 0x4ad   : > { %6012 = vmatprep.subr.bf16.mxu0 %v6738_v24 }
 0x4ae   : > { %5422 = vmatmul.mubr.msk.bf16.gmra.mrb[116].mxu0 %vm7446_vm13, %v8210_v44 }
 0x4af   : > { %6379 = vmatpush3.bf16.msra.mxu1 %v6734_v15  ;;  %v8213_v15 = vld [vmem:[#allocation24_spill] sm:$0xff] }
 0x4b0   : > { %6380 = vmatprep.subr.bf16.mxu1 %v6737_v38  ;;  %6013 = vmatpush3.bf16.msra.mxu0 %v6739_v4 }
 0x4b1   : > { %6014 = vmatprep.subr.bf16.mxu0 %v6741_v34 }
 0x4b3   : > { %6381 = vmatpush3.bf16.msra.mxu1 %v6737_v38 }
 0x4b4   : > { %6382 = vmatprep.subr.bf16.mxu1 %v6740_v29  ;;  %6015 = vmatpush3.bf16.msra.mxu0 %v6742_v11 }
 0x4b5   : > { %6052 = vmatprep.subr.bf16.mxu0 %v6744_v63 }
 0x4b7   : > { %6383 = vmatpush3.bf16.msra.mxu1 %v6740_v29 }
 0x4b8   : > { %6384 = vmatprep.subr.bf16.mxu1 %v6743_v40 }
 0x4bb   : > { %6385 = vmatpush3.bf16.msra.mxu1 %v6743_v40 }
 0x4bc   : > { %6386 = vmatprep.subr.bf16.mxu1 %v6746_v45 }
 0x4bf   : > { %6387 = vmatpush3.bf16.msra.mxu1 %v6746_v45 }
 0x4c0   : > { %6396 = vmatprep.subr.bf16.mxu1 %v7845_v13 }
 0x549   : > { %v5912_v8 = vpop.f32.mrb[88].mxu0 }
 0x54a   : > { %v5913_v51 = vpop.f32.mrb[89].mxu0 }
 0x54b   : > { %v5914_v53 = vadd.f32 %v5913_v51, %v5912_v8  ;;  %v5915_v61 = vpop.f32.mrb[90].mxu0 }
 0x54c   : > { %v5916_v17 = vpop.f32.mrb[91].mxu0 }
 0x54d   : > { %v5917_v59 = vadd.f32 %v5916_v17, %v5915_v61  ;;  %v3125_v41 = vadd.f32 %v5914_v53, %v5337_v20 }
 0x54f   : > { %v3128_v12 = vadd.f32 %v5917_v59, %v5337_v20 }
 0x551   : > { %v5918_v49 = vpop.f32.mrb[92].mxu0 }
 0x552   : > { %v5919_v58 = vpop.f32.mrb[93].mxu0 }
 0x553   : > { %v5920_v42 = vadd.f32 %v5919_v58, %v5918_v49  ;;  %v5921_v25 = vpop.f32.mrb[94].mxu0  ;;  %v8215_v58 = vld [vmem:[#allocation25_spill] sm:$0xff] }
 0x554   : > { %v5922_v14 = vpop.f32.mrb[95].mxu0 }
 0x555   : > { %v5923_v33 = vadd.f32 %v5922_v14, %v5921_v25  ;;  %v3133_v39 = vadd.f32 %v5920_v42, %v5337_v20  ;;  %v6342_v18 = vpop.f32.mrb[40].mxu1 }
 0x556   : > { %v3189_v57 = vpop.f32.mrb[41].mxu1 }
 0x557   : > { %v3198_v44 = vadd.f32 %v6342_v18, %v3133_v39  ;;  %v3190_v35 = vadd.f32 %v3189_v57, %v3125_v41  ;;  %v3136_v1 = vadd.f32 %v5923_v33, %v5337_v20  ;;  %v6343_v48 = vpop.f32.mrb[42].mxu1  ;;  %v8216_v18 = vld [vmem:[#allocation28_spill] sm:$0xff] }
 0x558   : > { %v3192_v28 = vpop.f32.mrb[43].mxu1 }
 0x559   : > { %v3222_v22 = vadd.f32 %v3198_v44, %v8211_v32  ;;  %v3220_v5 = vadd.f32 %v3190_v35, %v8212_v37  ;;  %v3201_v52 = vadd.f32 %v6343_v48, %v3136_v1  ;;  %v3193_v21 = vadd.f32 %v3192_v28, %v3128_v12  ;;  %v5924_v56 = vpop.f32.mrb[96].mxu0  ;;  %v8217_v35 = vld [vmem:[#allocation26_spill] sm:$0xff] }
 0x55a   : > { %v5925_v9 = vpop.f32.mrb[97].mxu0  ;;  %v8218_v32 = vld [vmem:[#allocation30_spill] sm:$0xff] }
 0x55b   : > { %5584 = vst [vmem:[%s7740_s21 + $0x50] sm:$0xff] %v3222_v22  ;;  %5582 = vst [vmem:[%s7740_s21 + $0x40] sm:$0xff] %v3220_v5  ;;  %v3223_v19 = vadd.f32 %v3201_v52, %v8213_v15  ;;  %v3221_v38 = vadd.f32 %v3193_v21, %v8214_v2  ;;  %v5926_v24 = vadd.f32 %v5925_v9, %v5924_v56  ;;  %v5927_v4 = vpop.f32.mrb[98].mxu0  ;;  %v7864_v15 = vld [vmem:[#allocation7 + $0x6] ss:$0 sm:$0xff] }
 0x55c   : > { %v5928_v29 = vpop.f32.mrb[99].mxu0 }
 0x55d   : > { %5585 = vst [vmem:[%s7740_s21 + $0x58] sm:$0xff] %v3223_v19  ;;  %5583 = vst [vmem:[%s7740_s21 + $0x48] sm:$0xff] %v3221_v38  ;;  %v5929_v34 = vadd.f32 %v5928_v29, %v5927_v4  ;;  %v3141_v40 = vadd.f32 %v5926_v24, %v5337_v20 }
 0x55f   : > { %v3144_v61 = vadd.f32 %v5929_v34, %v5337_v20 }
 0x560   : > { %v6346_v11 = vpop.f32.mrb[44].mxu1 }
 0x561   : > { %v3205_v63 = vpop.f32.mrb[45].mxu1  ;;  %v5930_v45 = vpop.f32.mrb[100].mxu0 }
 0x562   : > { %v3206_v8 = vadd.f32 %v3205_v63, %v3141_v40  ;;  %v6347_v51 = vpop.f32.mrb[46].mxu1  ;;  %v5931_v53 = vpop.f32.mrb[101].mxu0 }
 0x563   : > { %v5932_v17 = vadd.f32 %v5931_v53, %v5930_v45  ;;  %v3208_v59 = vpop.f32.mrb[47].mxu1  ;;  %v5933_v49 = vpop.f32.mrb[102].mxu0 }
 0x564   : > { %v3224_v42 = vadd.f32 %v3206_v8, %v8215_v58  ;;  %v3209_v25 = vadd.f32 %v3208_v59, %v3144_v61  ;;  %v5934_v14 = vpop.f32.mrb[103].mxu0 }
 0x565   : > { %v3149_v33 = vadd.f32 %v5932_v17, %v5337_v20  ;;  %v5935_v39 = vadd.f32 %v5934_v14, %v5933_v49 }
 0x566   : > { %5586 = vst [vmem:[%s7740_s21 + $0x60] sm:$0xff] %v3224_v42  ;;  %v3225_v41 = vadd.f32 %v3209_v25, %v8216_v18 }
 0x567   : > { %v3214_v57 = vadd.f32 %v6346_v11, %v3149_v33  ;;  %v3152_v44 = vadd.f32 %v5935_v39, %v5337_v20 }
 0x568   : > { %5587 = vst [vmem:[%s7740_s21 + $0x68] sm:$0xff] %v3225_v41 }
 0x569   : > { %v3226_v1 = vadd.f32 %v3214_v57, %v8217_v35  ;;  %v3217_v48 = vadd.f32 %v6347_v51, %v3152_v44  ;;  %v5964_v12 = vpop.f32.mrb[104].mxu0 }
 0x56a   : > { %v5965_v28 = vpop.f32.mrb[105].mxu0 }
 0x56b   : > { %5588 = vst [vmem:[%s7740_s21 + $0x70] sm:$0xff] %v3226_v1  ;;  %v3227_v22 = vadd.f32 %v3217_v48, %v8218_v32  ;;  %v5966_v37 = vadd.f32 %v5965_v28, %v5964_v12  ;;  %v5967_v5 = vpop.f32.mrb[106].mxu0 }
 0x56c   : > { %v5968_v52 = vpop.f32.mrb[107].mxu0 }
 0x56d   : > { %5589 = vst [vmem:[%s7740_s21 + $0x78] sm:$0xff] %v3227_v22  ;;  %v5969_v21 = vadd.f32 %v5968_v52, %v5967_v5  ;;  %v3464_v29 = vadd.f32 %v5966_v37, %v7864_v15 }
 0x56f   : > { %v3467_v8 = vadd.f32 %v5969_v21, %v7864_v15 }
 0x571   : > { %v5970_v56 = vpop.f32.mrb[108].mxu0 }
 0x572   : > { %v5971_v9 = vpop.f32.mrb[109].mxu0 }
 0x573   : > { %v5972_v19 = vadd.f32 %v5971_v9, %v5970_v56  ;;  %v5973_v20 = vpop.f32.mrb[110].mxu0 }
 0x574   : > { %v5974_v2 = vpop.f32.mrb[111].mxu0 }
 0x575   : > { %v5975_v38 = vadd.f32 %v5974_v2, %v5973_v20  ;;  %v3472_v24 = vadd.f32 %v5972_v19, %v7864_v15  ;;  %v6366_v4 = vpop.f32.mrb[48].mxu1 }
 0x576   : > { %v3528_v34 = vpop.f32.mrb[49].mxu1 }
 0x577   : > { %v3537_v11 = vadd.f32 %v6366_v4, %v3472_v24  ;;  %v3529_v40 = vadd.f32 %v3528_v34, %v3464_v29  ;;  %v3475_v63 = vadd.f32 %v5975_v38, %v7864_v15  ;;  %v6367_v45 = vpop.f32.mrb[50].mxu1  ;;  %v6745_v4 = vld [vmem:[#allocation6 + $0x600] sm:$0xff]  }
 0x578   : > { %v3531_v51 = vpop.f32.mrb[51].mxu1 }
 0x579   : > { %v3561_v53 = vmax.f32 %v3537_v11, 0.0  ;;  %v3559_v61 = vmax.f32 %v3529_v40, 0.0  ;;  %v3540_v17 = vadd.f32 %v6367_v45, %v3475_v63  ;;  %v3532_v59 = vadd.f32 %v3531_v51, %v3467_v8  ;;  %v5976_v49 = vpop.f32.mrb[112].mxu0  ;;  %v6747_v45 = vld [vmem:[#allocation6 + $0x648] sm:$0xff]  }
 0x57a   : > { %v5977_v58 = vpop.f32.mrb[113].mxu0 }
 0x57b   : > { %v3575_v42 = vrot.slane %v3559_v61, 7  ;;  %v5979_v25 = vpop.f32.mrb[114].mxu0  ;;  %v3610_v14 = vrot.slane %v3561_v53, 1  ;;  %v3562_v33 = vmax.f32 %v3540_v17, 0.0  ;;  %v3560_v39 = vmax.f32 %v3532_v59, 0.0 }
 0x57c   : > { %v5978_v18 = vadd.f32 %v5977_v58, %v5976_v49  ;;  %v5980_v41 = vpop.f32.mrb[115].mxu0  ;;  %v3578_v57 = vrot.slane %v3561_v53, 7  ;;  %v3607_v35 = vrot.slane %v3559_v61, 1 }
 0x57d   : > { %v3598_v44 = vsel %vm782_vm0, 0.0, %v3575_v42  ;;  %v5981_v1 = vadd.f32 %v5980_v41, %v5979_v25  ;;  %v6370_v48 = vpop.f32.mrb[52].mxu1  ;;  %v3580_v12 = vrot.slane %v3562_v33, 7  ;;  %v3612_v28 = vrot.slane %v3562_v33, 1  ;;  %v6748_v25 = vld [vmem:[#allocation6 + $0x608] sm:$0xff]   ;;  %v6750_v41 = vld [vmem:[#allocation6 + $0x650] sm:$0xff]  }
 0x57e   : > { %v3576_v32 = vrot.slane %v3560_v39, 7  ;;  %v3608_v22 = vrot.slane %v3560_v39, 1  ;;  %v3544_v37 = vpop.f32.mrb[53].mxu1  ;;  %v3480_v5 = vadd.f32 %v5978_v18, %v7864_v15  ;;  %v3643_v21 = vpack.c.bf16 %v3560_v39, %v3559_v61 }
 0x57f   : > { %v6371_v52 = vpop.f32.mrb[54].mxu1  ;;  %v3483_v56 = vadd.f32 %v5981_v1, %v7864_v15  ;;  %v3644_v9 = vpack.c.bf16 %v3562_v33, %v3561_v53  ;;  %v3613_v19 = vsel %vm815_vm1, %v3610_v14, %v3612_v28  ;;  %v3581_v53 = vsel %vm782_vm0, %v3578_v57, %v3580_v12 }
 0x580   : > { %v3577_v20 = vsel %vm782_vm0, %v3575_v42, %v3576_v32  ;;  %v3547_v2 = vpop.f32.mrb[55].mxu1  ;;  %v3609_v38 = vsel %vm815_vm1, %v3607_v35, %v3608_v22  ;;  %v3611_v24 = vsel %vm815_vm1, %v3608_v22, %v3610_v14  ;;  %v3545_v34 = vadd.f32 %v3544_v37, %v3480_v5  ;;  %3884 = vmatprep.mubr.bf16.mxu0 %v3643_v21 }
 0x581   : > { %v5461_v29 = vpack.c.bf16 %v3577_v20, %v3598_v44  ;;  %v3548_v11 = vadd.f32 %v3547_v2, %v3483_v56  ;;  %v5982_v40 = vpop.f32.mrb[116].mxu0  ;;  %v5473_v63 = vpack.c.bf16 %v3611_v24, %v3609_v38  ;;  %v3579_v51 = vsel %vm782_vm0, %v3576_v32, %v3578_v57  ;;  %v6752_v2 = vld [vmem:[#allocation6 + $0x688] sm:$0xff]   ;;  %v6753_v38 = vld [vmem:[#allocation6 + $0x658] sm:$0xff]  }
 0x582   : > { %v5983_v8 = vpop.f32.mrb[117].mxu0  ;;  %v3563_v61 = vmax.f32 %v3545_v34, 0.0  ;;  %v5464_v58 = vpack.c.bf16 %v3581_v53, %v3579_v51 }
 0x583   : > { %v3564_v17 = vmax.f32 %v3548_v11, 0.0  ;;  %5462 = vmatmul.mubr.msk.bf16.vlgmr.msra.gmra.mrb[120].mxu0 %vm7254_vm8, %v5461_v29  ;;  %6388 = vmatprep.mubr.msk.bf16.mxu1 %vm7269_vm9, %v5473_v63  ;;  %v5984_v59 = vadd.f32 %v5983_v8, %v5982_v40  ;;  %v5985_v49 = vpop.f32.mrb[118].mxu0  ;;  %v6756_v29 = vld [vmem:[#allocation6 + $0x660] sm:$0xff]  }
 0x584   : > { %3892 = vmatprep.mubr.bf16.mxu0 %v3644_v9  ;;  %6053 = vmatpush3.bf16.msra.mxu0 %v6745_v4  ;;  %v5986_v42 = vpop.f32.mrb[119].mxu0  ;;  %v3582_v14 = vrot.slane %v3563_v61, 7  ;;  %v3614_v33 = vrot.slane %v3563_v61, 1  ;;  %v6751_v9 = vld [vmem:[#allocation6 + $0x610] sm:$0xff]  }
 0x585   : > { %v3584_v39 = vrot.slane %v3564_v17, 7  ;;  %v3616_v18 = vrot.slane %v3564_v17, 1  ;;  %6054 = vmatprep.subr.bf16.mxu0 %v6747_v45  ;;  %v3488_v57 = vadd.f32 %v5984_v59, %v7864_v15  ;;  %v5987_v44 = vadd.f32 %v5986_v42, %v5985_v49  ;;  %v6759_v49 = vld [vmem:[#allocation6 + $0x668] sm:$0xff]  }
 0x586   : > { %v3645_v35 = vpack.c.bf16 %v3564_v17, %v3563_v61  ;;  %v3615_v1 = vsel %vm815_vm1, %v3612_v28, %v3614_v33  ;;  %v3583_v22 = vsel %vm782_vm0, %v3580_v12, %v3582_v14  ;;  %v6757_v61 = vld [vmem:[#allocation6 + $0x620] sm:$0xff]   ;;  %v6758_v17 = vld [vmem:[#allocation6 + $0x698] sm:$0xff]   ;;  %v6760_v42 = vld [vmem:[#allocation6 + $0x628] sm:$0xff]  }
 0x587   : > { %v3617_v32 = vsel %vm815_vm1, %v3614_v33, %v3616_v18  ;;  %v3585_v37 = vsel %vm782_vm0, %v3582_v14, %v3584_v39  ;;  %v5476_v5 = vpack.c.bf16 %v3615_v1, %v3613_v19  ;;  %v3553_v21 = vadd.f32 %v6370_v48, %v3488_v57  ;;  %v6755_v19 = vld [vmem:[#allocation6 + $0x690] sm:$0xff]   ;;  %v6764_v14 = vld [vmem:[#allocation6 + $0x6a8] sm:$0xff]   ;;  %v6779_v57 = vld [vmem:[#allocation6 + $0x6e0] sm:$0xff]  }
 0x588   : > { %v3491_v56 = vadd.f32 %v5987_v44, %v7864_v15  ;;  %6055 = vmatpush3.bf16.msra.mxu0 %v6748_v25  ;;  %v5467_v20 = vpack.c.bf16 %v3585_v37, %v3583_v22  ;;  %v6754_v15 = vld [vmem:[#allocation6 + $0x618] sm:$0xff]   ;;  %v6762_v25 = vld [vmem:[#allocation6 + $0x670] sm:$0xff]   ;;  %v6781_v44 = vld [vmem:[#allocation6 + $0x728] sm:$0xff]  }
 0x589   : > { %6056 = vmatprep.subr.bf16.mxu0 %v6750_v41  ;;  %v3565_v24 = vmax.f32 %v3553_v21, 0.0  ;;  %6389 = vmatmul.mubr.msk.bf16.vlgmr.msra.gmra.mrb[56].mxu1 %vm7352_vm14, %v5476_v5  ;;  %v6763_v33 = vld [vmem:[#allocation6 + $0x630] sm:$0xff]   ;;  %v6766_v41 = vld [vmem:[#allocation6 + $0x638] sm:$0xff]   ;;  %v6782_v1 = vld [vmem:[#allocation6 + $0x6e8] sm:$0xff]  }
 0x58a   : > { %v3556_v4 = vadd.f32 %v6371_v52, %v3491_v56  ;;  %6397 = vmatpush3.bf16.msra.mxu1 %v7845_v13  ;;  %v6786_v22 = vld [vmem:[#allocation6 + $0x758] sm:$0xff]   ;;  %v6785_v37 = vld [vmem:[#allocation6 + $0x6f0] sm:$0xff]   ;;  %v6789_v21 = vld [vmem:[#allocation6 + $0x760] sm:$0xff]  }
 0x58b   : > { %5465 = vmatmul.mubr.msk.bf16.gmra.mrb[124].mxu0 %vm7363_vm15, %v5464_v58  ;;  %v3586_v12 = vrot.slane %v3565_v24, 7  ;;  %v3618_v48 = vrot.slane %v3565_v24, 1  ;;  %6398 = vmatprep.subr.bf16.mxu1 %v6752_v2  ;;  %v6761_v58 = vld [vmem:[#allocation6 + $0x6a0] sm:$0xff]   ;;  %v6787_v5 = vld [vmem:[#allocation6 + $0x738] sm:$0xff]  }
 0x58c   : > { %v3566_v28 = vmax.f32 %v3556_v4, 0.0  ;;  %3900 = vmatprep.mubr.bf16.mxu0 %v3645_v35  ;;  %6057 = vmatpush3.bf16.msra.mxu0 %v6751_v9  ;;  %v6783_v35 = vld [vmem:[#allocation6 + $0x750] sm:$0xff]   ;;  %v6788_v56 = vld [vmem:[#allocation6 + $0x6f8] sm:$0xff]   ;;  %v6790_v9 = vld [vmem:[#allocation6 + $0x768] sm:$0xff]  }
 0x58d   : > { %6058 = vmatprep.subr.bf16.mxu0 %v6753_v38  ;;  %v3619_v11 = vsel %vm815_vm1, %v3616_v18, %v3618_v48  ;;  %v3587_v63 = vsel %vm782_vm0, %v3584_v39, %v3586_v12  ;;  %v6765_v39 = vld [vmem:[#allocation6 + $0x678] sm:$0xff]   ;;  %v6767_v18 = vld [vmem:[#allocation6 + $0x6b0] sm:$0xff]  }
 0x58e   : > { %v3588_v34 = vrot.slane %v3566_v28, 7  ;;  %v3620_v52 = vrot.slane %v3566_v28, 1  ;;  %v3646_v40 = vpack.c.bf16 %v3566_v28, %v3565_v24  ;;  %6399 = vmatpush3.bf16.msra.mxu1 %v6752_v2  ;;  %v5479_v13 = vpack.c.bf16 %v3619_v11, %v3617_v32  ;;  %v6784_v32 = vld [vmem:[#allocation6 + $0x730] sm:$0xff]   ;;  %v6792_v2 = vld [vmem:[#allocation6 + $0x778] sm:$0xff]  }
 0x58f   : > { %6400 = vmatprep.subr.bf16.mxu1 %v6755_v19 }
 0x590   : > { %6059 = vmatpush3.bf16.msra.mxu0 %v6754_v15  ;;  %v3621_v45 = vsel %vm815_vm1, %v3618_v48, %v3620_v52  ;;  %v3630_v8 = vsel %vm815_vm1, %v3620_v52, 0.0  ;;  %v3589_v51 = vsel %vm782_vm0, %v3586_v12, %v3588_v34  ;;  %6392 = vmatprep.mubr.msk.bf16.mxu1 %vm7376_vm2, %v5479_v13  ;;  %v5435_v15 = vld [vmem:[#allocation7 + $0x7] ss:$0 sm:$0xff] }
 0x591   : > { %6060 = vmatprep.subr.bf16.mxu0 %v6756_v29  ;;  %v5482_v53 = vpack.c.bf16 %v3630_v8, %v3621_v45  ;;  %v5470_v59 = vpack.c.bf16 %v3589_v51, %v3587_v63 }
 0x592   : > { %6401 = vmatpush3.bf16.msra.mxu1 %v6755_v19 }
 0x593   : > { %5468 = vmatmul.mubr.msk.bf16.gmra.mrb[128].mxu0 %vm7425_vm10, %v5467_v20  ;;  %6393 = vmatmul.mubr.msk.bf16.gmra.mrb[60].mxu1 %vm7415_vm7, %v5482_v53  ;;  %v6791_v20 = vld [vmem:[#allocation6 + $0x770] sm:$0xff]  }
 0x594   : > { %3908 = vmatprep.mubr.bf16.mxu0 %v3646_v40  ;;  %6061 = vmatpush3.bf16.msra.mxu0 %v6757_v61  ;;  %v8219_v53 = vld [vmem:[#allocation14_spill] sm:$0xff] }
 0x595   : > { %6402 = vmatprep.subr.bf16.mxu1 %v6758_v17  ;;  %6412 = vmatprep.mubr.msk.bf16.mxu1 %vm7269_vm9, %v7280_v10  ;;  %v6768_v10 = vld [vmem:[#allocation6 + $0x6b8] sm:$0xff]  }
 0x596   : > { %6062 = vmatprep.subr.bf16.mxu0 %v6759_v49  ;;  %6403 = vmatpush3.bf16.msra.mxu1 %v6758_v17 }
 0x597   : > { %6404 = vmatprep.subr.bf16.mxu1 %v6761_v58 }
 0x598   : > { %6063 = vmatpush3.bf16.msra.mxu0 %v6760_v42  ;;  %v8220_v42 = vld [vmem:[#allocation16_spill] sm:$0xff] }
 0x599   : > { %6064 = vmatprep.subr.bf16.mxu0 %v6762_v25 }
 0x59a   : > { %6405 = vmatpush3.bf16.msra.mxu1 %v6761_v58 }
 0x59b   : > { %5471 = vmatmul.mubr.msk.bf16.gmra.mrb[132].mxu0 %vm7446_vm13, %v5470_v59  ;;  %6406 = vmatprep.subr.bf16.mxu1 %v6764_v14 }
 0x59c   : > { %4223 = vmatprep.mubr.bf16.mxu0 %v7244_v55  ;;  %6065 = vmatpush3.bf16.msra.mxu0 %v6763_v33  ;;  %v6769_v55 = vld [vmem:[#allocation6 + $0x700] sm:$0xff]  }
 0x59d   : > { %6066 = vmatprep.subr.bf16.mxu0 %v6765_v39  ;;  %v8221_v39 = vld [vmem:[#allocation13_spill] sm:$0xff] }
 0x59e   : > { %6407 = vmatpush3.bf16.msra.mxu1 %v6764_v14 }
 0x59f   : > { %6408 = vmatprep.subr.bf16.mxu1 %v6767_v18 }
 0x5a0   : > { %6067 = vmatpush3.bf16.msra.mxu0 %v6766_v41 }
 0x5a1   : > { %6104 = vmatprep.subr.bf16.mxu0 %v6769_v55 }
 0x5a2   : > { %6409 = vmatpush3.bf16.msra.mxu1 %v6767_v18 }
 0x5a3   : > { %5511 = vmatmul.mubr.msk.bf16.vlgmr.msra.gmra.mrb[136].mxu0 %vm7254_vm8, %v7276_v7  ;;  %6410 = vmatprep.subr.bf16.mxu1 %v6768_v10  ;;  %v6770_v7 = vld [vmem:[#allocation6 + $0x6c0] sm:$0xff]  }
 0x5a4   : > { %4231 = vmatprep.mubr.bf16.mxu0 %v7294_v16  ;;  %6105 = vmatpush3.bf16.msra.mxu0 %v6770_v7  ;;  %v6771_v16 = vld [vmem:[#allocation6 + $0x708] sm:$0xff]  }
 0x5a5   : > { %6106 = vmatprep.subr.bf16.mxu0 %v6771_v16  ;;  %v8222_v16 = vld [vmem:[#allocation15_spill] sm:$0xff] }
 0x5a6   : > { %6411 = vmatpush3.bf16.msra.mxu1 %v6768_v10 }
 0x5a9   : > { %6413 = vmatmul.mubr.msk.bf16.vlgmr.msra.gmra.mrb[64].mxu1 %vm7352_vm14, %v7357_v46  ;;  %v6772_v46 = vld [vmem:[#allocation6 + $0x6c8] sm:$0xff]  }
 0x5aa   : > { %6416 = vmatprep.mubr.msk.bf16.mxu1 %vm7376_vm2, %v7387_v0  ;;  %6107 = vmatpush3.bf16.msra.mxu0 %v6772_v46  ;;  %v6774_v0 = vld [vmem:[#allocation6 + $0x6d0] sm:$0xff]  }
 0x5ab   : > { %5514 = vmatmul.mubr.msk.bf16.gmra.mrb[140].mxu0 %vm7363_vm15, %v7385_v62  ;;  %v6773_v62 = vld [vmem:[#allocation6 + $0x710] sm:$0xff]  }
 0x5ac   : > { %4239 = vmatprep.mubr.bf16.mxu0 %v7394_v6  ;;  %6108 = vmatprep.subr.bf16.mxu0 %v6773_v62  ;;  %v6775_v6 = vld [vmem:[#allocation6 + $0x718] sm:$0xff]  }
 0x5ae   : > { %6109 = vmatpush3.bf16.msra.mxu0 %v6774_v0 }
 0x5af   : > { %6110 = vmatprep.subr.bf16.mxu0 %v6775_v6 }
 0x5b1   : > { %6417 = vmatmul.mubr.msk.bf16.gmra.mrb[68].mxu1 %vm7415_vm7, %v7420_v26  ;;  %v6777_v26 = vld [vmem:[#allocation6 + $0x740] sm:$0xff]  }
 0x5b2   : > { %6420 = vmatprep.subr.bf16.mxu1 %v6777_v26 }
 0x5b3   : > { %5517 = vmatmul.mubr.msk.bf16.gmra.mrb[144].mxu0 %vm7425_vm10, %v7432_v36  ;;  %v6776_v36 = vld [vmem:[#allocation6 + $0x6d8] sm:$0xff]   ;;  %6421 = vmatpush3.bf16.msra.mxu1 %v6777_v26 }
 0x5b4   : > { %4247 = vmatprep.mubr.bf16.mxu0 %v7437_v50  ;;  %6111 = vmatpush3.bf16.msra.mxu0 %v6776_v36  ;;  %v6778_v50 = vld [vmem:[#allocation6 + $0x720] sm:$0xff]  }
 0x5b5   : > { %6112 = vmatprep.subr.bf16.mxu0 %v6778_v50 }
 0x5b8   : > { %6113 = vmatpush3.bf16.msra.mxu0 %v6779_v57 }
 0x5b9   : > { %6114 = vmatprep.subr.bf16.mxu0 %v6781_v44 }
 0x5bb   : > { %5520 = vmatmul.mubr.msk.bf16.gmra.mrb[148].mxu0 %vm7446_vm13, %v7450_v27  ;;  %v6780_v27 = vld [vmem:[#allocation6 + $0x748] sm:$0xff]  }
 0x5bc   : > { %6422 = vmatprep.subr.bf16.mxu1 %v6780_v27  ;;  %6115 = vmatpush3.bf16.msra.mxu0 %v6782_v1  ;;  %v8223_v1 = vld [vmem:[#allocation18_spill] sm:$0xff] }
 0x5bd   : > { %6423 = vmatpush3.bf16.msra.mxu1 %v6780_v27  ;;  %6116 = vmatprep.subr.bf16.mxu0 %v6784_v32 }
 0x5be   : > { %6424 = vmatprep.subr.bf16.mxu1 %v6783_v35 }
 0x5c0   : > { %6117 = vmatpush3.bf16.msra.mxu0 %v6785_v37 }
 0x5c1   : > { %6425 = vmatpush3.bf16.msra.mxu1 %v6783_v35  ;;  %6118 = vmatprep.subr.bf16.mxu0 %v6787_v5 }
 0x5c2   : > { %6426 = vmatprep.subr.bf16.mxu1 %v6786_v22 }
 0x5c4   : > { %6119 = vmatpush3.bf16.msra.mxu0 %v6788_v56 }
 0x5c5   : > { %6427 = vmatpush3.bf16.msra.mxu1 %v6786_v22 }
 0x5c6   : > { %6428 = vmatprep.subr.bf16.mxu1 %v6789_v21 }
 0x5c9   : > { %6429 = vmatpush3.bf16.msra.mxu1 %v6789_v21  ;;  %v8224_v21 = vld [vmem:[#allocation20_spill] sm:$0xff] }
 0x5ca   : > { %6430 = vmatprep.subr.bf16.mxu1 %v6790_v9 }
 0x5cd   : > { %6431 = vmatpush3.bf16.msra.mxu1 %v6790_v9 }
 0x5ce   : > { %6432 = vmatprep.subr.bf16.mxu1 %v6791_v20 }
 0x5d1   : > { %6433 = vmatpush3.bf16.msra.mxu1 %v6791_v20 }
 0x5d2   : > { %6434 = vmatprep.subr.bf16.mxu1 %v6792_v2 }
 0x5d5   : > { %6435 = vmatpush3.bf16.msra.mxu1 %v6792_v2 }
 0x656   : > { %v6016_v38 = vpop.f32.mrb[120].mxu0 }
 0x657   : > { %v6017_v24 = vpop.f32.mrb[121].mxu0 }
 0x658   : > { %v6018_v4 = vadd.f32 %v6017_v24, %v6016_v38  ;;  %v6019_v12 = vpop.f32.mrb[122].mxu0 }
 0x659   : > { %v6020_v48 = vpop.f32.mrb[123].mxu0 }
 0x65a   : > { %v6021_v28 = vadd.f32 %v6020_v48, %v6019_v12  ;;  %v3887_v29 = vadd.f32 %v6018_v4, %v5435_v15  ;;  %v8225_v48 = vld [vmem:[#allocation17_spill] sm:$0xff] }
 0x65c   : > { %v6390_v19 = vpop.f32.mrb[56].mxu1  ;;  %v3890_v63 = vadd.f32 %v6021_v28, %v5435_v15 }
 0x65d   : > { %v3951_v52 = vpop.f32.mrb[57].mxu1 }
 0x65e   : > { %v6022_v34 = vpop.f32.mrb[124].mxu0  ;;  %v3952_v11 = vadd.f32 %v3951_v52, %v3887_v29  ;;  %v6391_v13 = vpop.f32.mrb[58].mxu1 }
 0x65f   : > { %v6023_v40 = vpop.f32.mrb[125].mxu0  ;;  %v3954_v51 = vpop.f32.mrb[59].mxu1 }
 0x660   : > { %v6024_v45 = vadd.f32 %v6023_v40, %v6022_v34  ;;  %v6025_v8 = vpop.f32.mrb[126].mxu0  ;;  %v3982_v61 = vadd.f32 %v3952_v11, %v8219_v53  ;;  %v3955_v17 = vadd.f32 %v3954_v51, %v3890_v63  ;;  %v8226_v34 = vld [vmem:[#allocation19_spill] sm:$0xff] }
 0x661   : > { %v6026_v59 = vpop.f32.mrb[127].mxu0 }
 0x662   : > { %v3895_v49 = vadd.f32 %v6024_v45, %v5435_v15  ;;  %v6027_v58 = vadd.f32 %v6026_v59, %v6025_v8  ;;  %5590 = vst [vmem:[%s7740_s21 + $0x80] sm:$0xff] %v3982_v61  ;;  %v3983_v25 = vadd.f32 %v3955_v17, %v8220_v42  ;;  %v7951_v45 = vld [vmem:[#allocation7 + $0x8] ss:$0 sm:$0xff] }
 0x664   : > { %v3960_v14 = vadd.f32 %v6390_v19, %v3895_v49  ;;  %v3898_v33 = vadd.f32 %v6027_v58, %v5435_v15  ;;  %5591 = vst [vmem:[%s7740_s21 + $0x88] sm:$0xff] %v3983_v25 }
 0x666   : > { %v3984_v18 = vadd.f32 %v3960_v14, %v8221_v39  ;;  %v3963_v41 = vadd.f32 %v6391_v13, %v3898_v33  ;;  %v6028_v10 = vpop.f32.mrb[128].mxu0  ;;  %v6394_v7 = vpop.f32.mrb[60].mxu1 }
 0x667   : > { %v6029_v55 = vpop.f32.mrb[129].mxu0  ;;  %v3967_v6 = vpop.f32.mrb[61].mxu1 }
 0x668   : > { %5592 = vst [vmem:[%s7740_s21 + $0x90] sm:$0xff] %v3984_v18  ;;  %v3985_v46 = vadd.f32 %v3963_v41, %v8222_v16  ;;  %v6030_v62 = vadd.f32 %v6029_v55, %v6028_v10  ;;  %v6031_v0 = vpop.f32.mrb[130].mxu0  ;;  %v6395_v36 = vpop.f32.mrb[62].mxu1 }
 0x669   : > { %v6032_v26 = vpop.f32.mrb[131].mxu0  ;;  %v3970_v57 = vpop.f32.mrb[63].mxu1 }
 0x66a   : > { %5593 = vst [vmem:[%s7740_s21 + $0x98] sm:$0xff] %v3985_v46  ;;  %v3903_v50 = vadd.f32 %v6030_v62, %v5435_v15  ;;  %v6033_v27 = vadd.f32 %v6032_v26, %v6031_v0 }
 0x66c   : > { %v3968_v44 = vadd.f32 %v3967_v6, %v3903_v50  ;;  %v3906_v35 = vadd.f32 %v6033_v27, %v5435_v15 }
 0x66e   : > { %v3986_v32 = vadd.f32 %v3968_v44, %v8223_v1  ;;  %v3971_v22 = vadd.f32 %v3970_v57, %v3906_v35  ;;  %v6034_v37 = vpop.f32.mrb[132].mxu0 }
 0x66f   : > { %v6035_v5 = vpop.f32.mrb[133].mxu0 }
 0x670   : > { %5594 = vst [vmem:[%s7740_s21 + $0xa0] sm:$0xff] %v3986_v32  ;;  %v3987_v56 = vadd.f32 %v3971_v22, %v8224_v21  ;;  %v6036_v9 = vadd.f32 %v6035_v5, %v6034_v37  ;;  %v6037_v20 = vpop.f32.mrb[134].mxu0 }
 0x671   : > { %v6038_v2 = vpop.f32.mrb[135].mxu0 }
 0x672   : > { %5595 = vst [vmem:[%s7740_s21 + $0xa8] sm:$0xff] %v3987_v56  ;;  %v3911_v38 = vadd.f32 %v6036_v9, %v5435_v15  ;;  %v6039_v24 = vadd.f32 %v6038_v2, %v6037_v20 }
 0x674   : > { %v3976_v4 = vadd.f32 %v6394_v7, %v3911_v38  ;;  %v3914_v12 = vadd.f32 %v6039_v24, %v5435_v15 }
 0x676   : > { %v3988_v28 = vadd.f32 %v3976_v4, %v8225_v48  ;;  %v3979_v19 = vadd.f32 %v6395_v36, %v3914_v12  ;;  %v6068_v29 = vpop.f32.mrb[136].mxu0 }
 0x677   : > { %v6069_v11 = vpop.f32.mrb[137].mxu0 }
 0x678   : > { %5596 = vst [vmem:[%s7740_s21 + $0xb0] sm:$0xff] %v3988_v28  ;;  %v3989_v52 = vadd.f32 %v3979_v19, %v8226_v34  ;;  %v6070_v40 = vadd.f32 %v6069_v11, %v6068_v29  ;;  %v6071_v13 = vpop.f32.mrb[138].mxu0 }
 0x679   : > { %v6072_v63 = vpop.f32.mrb[139].mxu0 }
 0x67a   : > { %5597 = vst [vmem:[%s7740_s21 + $0xb8] sm:$0xff] %v3989_v52  ;;  %v6073_v8 = vadd.f32 %v6072_v63, %v6071_v13  ;;  %v4226_v53 = vadd.f32 %v6070_v40, %v7951_v45 }
 0x67c   : > { %v6414_v51 = vpop.f32.mrb[64].mxu1  ;;  %v4229_v49 = vadd.f32 %v6073_v8, %v7951_v45 }
 0x67d   : > { %v4290_v61 = vpop.f32.mrb[65].mxu1 }
 0x67e   : > { %v4291_v15 = vadd.f32 %v4290_v61, %v4226_v53  ;;  %v6074_v17 = vpop.f32.mrb[140].mxu0  ;;  %v6415_v59 = vpop.f32.mrb[66].mxu1 }
 0x67f   : > { %v6075_v58 = vpop.f32.mrb[141].mxu0  ;;  %v4293_v42 = vpop.f32.mrb[67].mxu1 }
 0x680   : > { %v4321_v25 = vmax.f32 %v4291_v15, 0.0  ;;  %v6076_v14 = vadd.f32 %v6075_v58, %v6074_v17  ;;  %v4294_v33 = vadd.f32 %v4293_v42, %v4229_v49  ;;  %v6077_v39 = vpop.f32.mrb[142].mxu0 }
 0x681   : > { %v6078_v18 = vpop.f32.mrb[143].mxu0 }
 0x682   : > { %v4337_v41 = vrot.slane %v4321_v25, 7  ;;  %v4234_v10 = vadd.f32 %v6076_v14, %v7951_v45  ;;  %v4322_v55 = vmax.f32 %v4294_v33, 0.0  ;;  %v6079_v7 = vadd.f32 %v6078_v18, %v6077_v39 }
 0x683   : > { %v4369_v16 = vrot.slane %v4321_v25, 1 }
 0x684   : > { %v4299_v46 = vadd.f32 %v6414_v51, %v4234_v10  ;;  %v4338_v62 = vrot.slane %v4322_v55, 7  ;;  %v4370_v0 = vrot.slane %v4322_v55, 1  ;;  %v6418_v6 = vpop.f32.mrb[68].mxu1  ;;  %v4237_v26 = vadd.f32 %v6079_v7, %v7951_v45 }
 0x685   : > { %v4306_v36 = vpop.f32.mrb[69].mxu1  ;;  %v4405_v50 = vpack.c.bf16 %v4322_v55, %v4321_v25  ;;  %v4360_v27 = vsel %vm782_vm0, 0.0, %v4337_v41 }
 0x686   : > { %v4323_v57 = vmax.f32 %v4299_v46, 0.0  ;;  %v4339_v44 = vsel %vm782_vm0, %v4337_v41, %v4338_v62  ;;  %v6080_v35 = vpop.f32.mrb[144].mxu0  ;;  %v6419_v1 = vpop.f32.mrb[70].mxu1  ;;  %v4371_v32 = vsel %vm815_vm1, %v4369_v16, %v4370_v0  ;;  %v4302_v37 = vadd.f32 %v6415_v59, %v4237_v26 }
 0x687   : > { %v5559_v22 = vpack.c.bf16 %v4339_v44, %v4360_v27  ;;  %4646 = vmatprep.mubr.bf16.mxu0 %v4405_v50  ;;  %v6081_v5 = vpop.f32.mrb[145].mxu0  ;;  %v4309_v21 = vpop.f32.mrb[71].mxu1 }
 0x688   : > { %v4340_v56 = vrot.slane %v4323_v57, 7  ;;  %v4372_v9 = vrot.slane %v4323_v57, 1  ;;  %v6082_v20 = vadd.f32 %v6081_v5, %v6080_v35  ;;  %v6083_v2 = vpop.f32.mrb[146].mxu0  ;;  %v4324_v38 = vmax.f32 %v4302_v37, 0.0 }
 0x689   : > { %v6084_v24 = vpop.f32.mrb[147].mxu0  ;;  %5560 = vmatmul.mubr.msk.bf16.vlgmr.msra.gmra.mrb[152].mxu0 %vm7254_vm8, %v5559_v22 }
 0x68a   : > { %v4242_v4 = vadd.f32 %v6082_v20, %v7951_v45  ;;  %v6085_v12 = vadd.f32 %v6084_v24, %v6083_v2  ;;  %v4373_v48 = vsel %vm815_vm1, %v4370_v0, %v4372_v9  ;;  %v4341_v28 = vsel %vm782_vm0, %v4338_v62, %v4340_v56 }
 0x68b   : > { %v4342_v19 = vrot.slane %v4324_v38, 7  ;;  %v4374_v29 = vrot.slane %v4324_v38, 1  ;;  %v4406_v34 = vpack.c.bf16 %v4324_v38, %v4323_v57  ;;  %v5571_v52 = vpack.c.bf16 %v4373_v48, %v4371_v32  ;;  %v5533_v38 = vld [vmem:[#allocation7 + $0x9] ss:$0 sm:$0xff] }
 0x68c   : > { %v4307_v11 = vadd.f32 %v4306_v36, %v4242_v4  ;;  %v4245_v40 = vadd.f32 %v6085_v12, %v7951_v45 }
 0x68d   : > { %v4375_v13 = vsel %vm815_vm1, %v4372_v9, %v4374_v29  ;;  %4654 = vmatprep.mubr.bf16.mxu0 %v4406_v34  ;;  %6436 = vmatprep.mubr.msk.bf16.mxu1 %vm7269_vm9, %v5571_v52  ;;  %v4343_v60 = vsel %vm782_vm0, %v4340_v56, %v4342_v19 }
 0x68e   : > { %v4325_v63 = vmax.f32 %v4307_v11, 0.0  ;;  %v4310_v8 = vadd.f32 %v4309_v21, %v4245_v40  ;;  %v6086_v51 = vpop.f32.mrb[148].mxu0  ;;  %v5562_v53 = vpack.c.bf16 %v4343_v60, %v4341_v28  ;;  %v6793_v60 = vld [vmem:[%s7740_s21 + $0x10] sm:$0xff] }
 0x68f   : > { %v6087_v61 = vpop.f32.mrb[149].mxu0 }
 0x690   : > { %v4344_v15 = vrot.slane %v4325_v63, 7  ;;  %v4376_v17 = vrot.slane %v4325_v63, 1  ;;  %v4326_v59 = vmax.f32 %v4310_v8, 0.0  ;;  %v6088_v49 = vadd.f32 %v6087_v61, %v6086_v51  ;;  %v6089_v58 = vpop.f32.mrb[150].mxu0  ;;  %v6794_v8 = vld [vmem:[%s7740_s21] sm:$0xff] }
 0x691   : > { %v6090_v42 = vpop.f32.mrb[151].mxu0  ;;  %5563 = vmatmul.mubr.msk.bf16.gmra.mrb[156].mxu0 %vm7363_vm15, %v5562_v53 }
 0x692   : > { %v4377_v25 = vsel %vm815_vm1, %v4374_v29, %v4376_v17  ;;  %v4346_v3 = vrot.slane %v4326_v59, 7  ;;  %v4378_v14 = vrot.slane %v4326_v59, 1  ;;  %v4250_v33 = vadd.f32 %v6088_v49, %v7951_v45 }
 0x693   : > { %v5574_v39 = vpack.c.bf16 %v4377_v25, %v4375_v13  ;;  %v6091_v18 = vadd.f32 %v6090_v42, %v6089_v58  ;;  %v4407_v41 = vpack.c.bf16 %v4326_v59, %v4325_v63  ;;  %v4345_v10 = vsel %vm782_vm0, %v4342_v19, %v4344_v15  ;;  %v6795_v59 = vld [vmem:[%s7740_s21 + $0x18] sm:$0xff]  ;;  %v6796_v58 = vld [vmem:[%s7740_s21 + $0x8] sm:$0xff] }
 0x694   : > { %v4315_v55 = vadd.f32 %v6418_v6, %v4250_v33  ;;  %v4347_v7 = vsel %vm782_vm0, %v4344_v15, %v4346_v3  ;;  %v4379_v16 = vsel %vm815_vm1, %v4376_v17, %v4378_v14 }
 0x695   : > { %v4253_v46 = vadd.f32 %v6091_v18, %v7951_v45  ;;  %4662 = vmatprep.mubr.bf16.mxu0 %v4407_v41  ;;  %6437 = vmatmul.mubr.msk.bf16.vlgmr.msra.gmra.mrb[72].mxu1 %vm7352_vm14, %v5574_v39  ;;  %v5565_v47 = vpack.c.bf16 %v4347_v7, %v4345_v10 }
 0x696   : > { %v4327_v62 = vmax.f32 %v4315_v55, 0.0 }
 0x697   : > { %v4318_v0 = vadd.f32 %v6419_v1, %v4253_v46 }
 0x698   : > { %v4348_v26 = vrot.slane %v4327_v62, 7  ;;  %v4380_v36 = vrot.slane %v4327_v62, 1 }
 0x699   : > { %v4328_v50 = vmax.f32 %v4318_v0, 0.0  ;;  %5566 = vmatmul.mubr.msk.bf16.gmra.mrb[160].mxu0 %vm7425_vm10, %v5565_v47 }
 0x69a   : > { %v4381_v6 = vsel %vm815_vm1, %v4378_v14, %v4380_v36  ;;  %v4349_v27 = vsel %vm782_vm0, %v4346_v3, %v4348_v26 }
 0x69b   : > { %v4350_v57 = vrot.slane %v4328_v50, 7  ;;  %v4382_v44 = vrot.slane %v4328_v50, 1  ;;  %v4408_v45 = vpack.c.bf16 %v4328_v50, %v4327_v62  ;;  %v5577_v35 = vpack.c.bf16 %v4381_v6, %v4379_v16 }
 0x69d   : > { %4670 = vmatprep.mubr.bf16.mxu0 %v4408_v45  ;;  %6440 = vmatprep.mubr.msk.bf16.mxu1 %vm7376_vm2, %v5577_v35  ;;  %v4383_v43 = vsel %vm815_vm1, %v4380_v36, %v4382_v44  ;;  %v4392_v1 = vsel %vm815_vm1, %v4382_v44, 0.0  ;;  %v4351_v32 = vsel %vm782_vm0, %v4348_v26, %v4350_v57  ;;  %v6797_v26 = vld [vmem:[%s7740_s21 + $0x20] sm:$0xff]  ;;  %v6798_v44 = vld [vmem:[%s7740_s21 + $0x28] sm:$0xff] }
 0x69e   : > { %v5580_v30 = vpack.c.bf16 %v4392_v1, %v4383_v43  ;;  %v5568_v22 = vpack.c.bf16 %v4351_v32, %v4349_v27  ;;  %v6799_v1 = vld [vmem:[%s7740_s21 + $0x30] sm:$0xff] }
 0x6a0   : > { %6441 = vmatmul.mubr.msk.bf16.gmra.mrb[76].mxu1 %vm7415_vm7, %v5580_v30 }
 0x6a1   : > { %5569 = vmatmul.mubr.msk.bf16.gmra.mrb[164].mxu0 %vm7446_vm13, %v5568_v22  ;;  %v6800_v22 = vld [vmem:[%s7740_s21 + $0x38] sm:$0xff] }
 0x75c   : > { %v6120_v37 = vpop.f32.mrb[152].mxu0 }
 0x75d   : > { %v6121_v5 = vpop.f32.mrb[153].mxu0 }
 0x75e   : > { %v6122_v21 = vadd.f32 %v6121_v5, %v6120_v37  ;;  %v6123_v56 = vpop.f32.mrb[154].mxu0  ;;  %v4886_v5 = vld [vmem:[%s7740_s21] sm:$0xff] (%p8227_p0) }
 0x75f   : > { %v6124_v54 = vpop.f32.mrb[155].mxu0  ;;  %4887 = vst [vmem:[%s8018_s11] sm:$0xff] (%p8227_p0), %v4886_v5 }
 0x760   : > { %v6125_v9 = vadd.f32 %v6124_v54, %v6123_v56  ;;  %v4649_v19 = vadd.f32 %v6122_v21, %v5533_v38  ;;  %v4888_v21 = vld [vmem:[%s7740_s21 + $0x8] sm:$0xff] (%p8227_p0)  ;;  %v4890_v56 = vld [vmem:[%s7740_s21 + $0x10] sm:$0xff] (%p8227_p0)  ;;  %v4892_v54 = vld [vmem:[%s7740_s21 + $0x18] sm:$0xff] (%p8227_p0) }
 0x761   : > { %4889 = vst [vmem:[%s8018_s11 + $0x8] sm:$0xff] (%p8227_p0), %v4888_v21  ;;  %4891 = vst [vmem:[%s8018_s11 + $0x10] sm:$0xff] (%p8227_p0), %v4890_v56 }
 0x762   : > { %v4652_v40 = vadd.f32 %v6125_v9, %v5533_v38  ;;  %v4894_v9 = vld [vmem:[%s7740_s21 + $0x20] sm:$0xff] (%p8227_p0)  ;;  %4893 = vst [vmem:[%s8018_s11 + $0x18] sm:$0xff] (%p8227_p0), %v4892_v54 }
 0x763   : > { %4895 = vst [vmem:[%s8018_s11 + $0x20] sm:$0xff] (%p8227_p0), %v4894_v9 }
 0x764   : > { %v6126_v20 = vpop.f32.mrb[156].mxu0 }
 0x765   : > { %v6127_v2 = vpop.f32.mrb[157].mxu0 }
 0x766   : > { %v6128_v24 = vadd.f32 %v6127_v2, %v6126_v20  ;;  %v6129_v4 = vpop.f32.mrb[158].mxu0  ;;  %v4896_v20 = vld [vmem:[%s7740_s21 + $0x28] sm:$0xff] (%p8227_p0)  ;;  %v4898_v2 = vld [vmem:[%s7740_s21 + $0x30] sm:$0xff] (%p8227_p0) }
 0x767   : > { %v6130_v12 = vpop.f32.mrb[159].mxu0  ;;  %4897 = vst [vmem:[%s8018_s11 + $0x28] sm:$0xff] (%p8227_p0), %v4896_v20  ;;  %4899 = vst [vmem:[%s8018_s11 + $0x30] sm:$0xff] (%p8227_p0), %v4898_v2 }
 0x768   : > { %v6131_v48 = vadd.f32 %v6130_v12, %v6129_v4  ;;  %v4657_v23 = vadd.f32 %v6128_v24, %v5533_v38  ;;  %v6438_v28 = vpop.f32.mrb[72].mxu1  ;;  %v4902_v24 = vld [vmem:[%s7740_s21 + $0x40] sm:$0xff] (%p8227_p0)  ;;  %v4904_v4 = vld [vmem:[%s7740_s21 + $0x48] sm:$0xff] (%p8227_p0)  ;;  %v4906_v12 = vld [vmem:[%s7740_s21 + $0x50] sm:$0xff] (%p8227_p0) }
 0x769   : > { %v4713_v31 = vpop.f32.mrb[73].mxu1  ;;  %4903 = vst [vmem:[%s8018_s11 + $0x80] sm:$0xff] (%p8227_p0), %v4902_v24  ;;  %4905 = vst [vmem:[%s8018_s11 + $0x88] sm:$0xff] (%p8227_p0), %v4904_v4 }
 0x76a   : > { %v4722_v29 = vadd.f32 %v6438_v28, %v4657_v23  ;;  %v4714_v34 = vadd.f32 %v4713_v31, %v4649_v19  ;;  %v4660_v52 = vadd.f32 %v6131_v48, %v5533_v38  ;;  %v6439_v11 = vpop.f32.mrb[74].mxu1  ;;  %v4908_v48 = vld [vmem:[%s7740_s21 + $0x58] sm:$0xff] (%p8227_p0)  ;;  %4907 = vst [vmem:[%s8018_s11 + $0x90] sm:$0xff] (%p8227_p0), %v4906_v12  ;;  %v4910_v23 = vld [vmem:[%s7740_s21 + $0x60] sm:$0xff] (%p8227_p0)  ;;  %v4912_v28 = vld [vmem:[%s7740_s21 + $0x68] sm:$0xff] (%p8227_p0) }
 0x76b   : > { %v4716_v13 = vpop.f32.mrb[75].mxu1  ;;  %4909 = vst [vmem:[%s8018_s11 + $0x98] sm:$0xff] (%p8227_p0), %v4908_v48  ;;  %v4914_v19 = vld [vmem:[%s7740_s21 + $0x70] sm:$0xff] (%p8227_p0)  ;;  %4911 = vst [vmem:[%s8018_s11 + $0xa0] sm:$0xff] (%p8227_p0), %v4910_v23  ;;  %v4916_v31 = vld [vmem:[%s7740_s21 + $0x78] sm:$0xff] (%p8227_p0) }
 0x76c   : > { %v4746_v63 = vadd.f32 %v6793_v60, %v4722_v29  ;;  %v4744_v51 = vadd.f32 %v6794_v8, %v4714_v34  ;;  %v4725_v53 = vadd.f32 %v6439_v11, %v4660_v52  ;;  %v4717_v61 = vadd.f32 %v4716_v13, %v4652_v40  ;;  %v6132_v15 = vpop.f32.mrb[160].mxu0  ;;  %4913 = vst [vmem:[%s8018_s11 + $0xa8] sm:$0xff] (%p8227_p0), %v4912_v28  ;;  %v4918_v29 = vld [vmem:[%s7740_s21 + $0x80] sm:$0xff] (%p8227_p0)  ;;  %v4920_v34 = vld [vmem:[%s7740_s21 + $0x88] sm:$0xff] (%p8227_p0)  ;;  %v4922_v52 = vld [vmem:[%s7740_s21 + $0x90] sm:$0xff] (%p8227_p0) }
 0x76d   : > { %v6133_v17 = vpop.f32.mrb[161].mxu0  ;;  %4915 = vst [vmem:[%s8018_s11 + $0xb0] sm:$0xff] (%p8227_p0), %v4914_v19  ;;  %4917 = vst [vmem:[%s8018_s11 + $0xb8] sm:$0xff] (%p8227_p0), %v4916_v31  ;;  %v4924_v11 = vld [vmem:[%s7740_s21 + $0x98] sm:$0xff] (%p8227_p0)  ;;  %v4926_v40 = vld [vmem:[%s7740_s21 + $0xa0] sm:$0xff] (%p8227_p0) }
 0x76e   : > { %5600 = vst [vmem:[%s7740_s21 + $0xd0] sm:$0xff] %v4746_v63  ;;  %5598 = vst [vmem:[%s7740_s21 + $0xc0] sm:$0xff] %v4744_v51  ;;  %v4747_v49 = vadd.f32 %v6795_v59, %v4725_v53  ;;  %v4745_v42 = vadd.f32 %v6796_v58, %v4717_v61  ;;  %v6134_v25 = vadd.f32 %v6133_v17, %v6132_v15  ;;  %v6135_v3 = vpop.f32.mrb[162].mxu0  ;;  %v4928_v13 = vld [vmem:[%s7740_s21 + $0xa8] sm:$0xff] (%p8227_p0)  ;;  %v4930_v60 = vld [vmem:[%s7740_s21 + $0xb0] sm:$0xff] (%p8227_p0) }
 0x76f   : > { %v6136_v14 = vpop.f32.mrb[163].mxu0  ;;  %4919 = vst [vmem:[%s8018_s11 + $0x100] sm:$0xff] (%p8227_p0), %v4918_v29  ;;  %4921 = vst [vmem:[%s8018_s11 + $0x108] sm:$0xff] (%p8227_p0), %v4920_v34  ;;  %v4932_v63 = vld [vmem:[%s7740_s21 + $0xb8] sm:$0xff] (%p8227_p0) }
 0x770   : > { %5601 = vst [vmem:[%s7740_s21 + $0xd8] sm:$0xff] %v4747_v49  ;;  %5599 = vst [vmem:[%s7740_s21 + $0xc8] sm:$0xff] %v4745_v42  ;;  %v6137_v33 = vadd.f32 %v6136_v14, %v6135_v3  ;;  %v4665_v18 = vadd.f32 %v6134_v25, %v5533_v38 }
 0x771   : > { %4923 = vst [vmem:[%s8018_s11 + $0x110] sm:$0xff] (%p8227_p0), %v4922_v52  ;;  %4925 = vst [vmem:[%s8018_s11 + $0x118] sm:$0xff] (%p8227_p0), %v4924_v11 }
 0x772   : > { %v4668_v46 = vadd.f32 %v6137_v33, %v5533_v38  ;;  %4927 = vst [vmem:[%s8018_s11 + $0x120] sm:$0xff] (%p8227_p0), %v4926_v40  ;;  %4929 = vst [vmem:[%s8018_s11 + $0x128] sm:$0xff] (%p8227_p0), %v4928_v13 }
 0x773   : > { %v6442_v39 = vpop.f32.mrb[76].mxu1  ;;  %4931 = vst [vmem:[%s8018_s11 + $0x130] sm:$0xff] (%p8227_p0), %v4930_v60  ;;  %4933 = vst [vmem:[%s8018_s11 + $0x138] sm:$0xff] (%p8227_p0), %v4932_v63 }
 0x774   : > { %v4729_v41 = vpop.f32.mrb[77].mxu1  ;;  %v6138_v10 = vpop.f32.mrb[164].mxu0 }
 0x775   : > { %v4730_v55 = vadd.f32 %v4729_v41, %v4665_v18  ;;  %v6443_v7 = vpop.f32.mrb[78].mxu1  ;;  %v6139_v16 = vpop.f32.mrb[165].mxu0  ;;  %v4934_v8 = vld [vmem:[%s7740_s21 + $0xc0] sm:$0xff] (%p8227_p0)  ;;  %v4938_v53 = vld [vmem:[%s7740_s21 + $0xd0] sm:$0xff] (%p8227_p0) }
 0x776   : > { %v6140_v47 = vadd.f32 %v6139_v16, %v6138_v10  ;;  %v4732_v62 = vpop.f32.mrb[79].mxu1  ;;  %v6141_v0 = vpop.f32.mrb[166].mxu0  ;;  %4935 = vst [vmem:[%s8018_s11 + $0x180] sm:$0xff] (%p8227_p0), %v4934_v8  ;;  %4939 = vst [vmem:[%s8018_s11 + $0x190] sm:$0xff] (%p8227_p0), %v4938_v53 }
 0x777   : > { %v4748_v36 = vadd.f32 %v6797_v26, %v4730_v55  ;;  %v4733_v50 = vadd.f32 %v4732_v62, %v4668_v46  ;;  %v6142_v6 = vpop.f32.mrb[167].mxu0  ;;  %v4936_v51 = vld [vmem:[%s7740_s21 + $0xc8] sm:$0xff] (%p8227_p0)  ;;  %v4940_v61 = vld [vmem:[%s7740_s21 + $0xd8] sm:$0xff] (%p8227_p0) }
 0x778   : > { %v4673_v27 = vadd.f32 %v6140_v47, %v5533_v38  ;;  %v6143_v57 = vadd.f32 %v6142_v6, %v6141_v0  ;;  %4937 = vst [vmem:[%s8018_s11 + $0x188] sm:$0xff] (%p8227_p0), %v4936_v51  ;;  %4941 = vst [vmem:[%s8018_s11 + $0x198] sm:$0xff] (%p8227_p0), %v4940_v61 }
 0x779   : > { %5602 = vst [vmem:[%s7740_s21 + $0xe0] sm:$0xff] %v4748_v36  ;;  %v4749_v45 = vadd.f32 %v6798_v44, %v4733_v50 }
 0x77a   : > { %v4738_v35 = vadd.f32 %v6442_v39, %v4673_v27  ;;  %v4676_v43 = vadd.f32 %v6143_v57, %v5533_v38  ;;  %4793 = sbr.rel (!%p8227_p0) target bundleno = 1929 (0x789), region = 64  ;;  %v4900_v38 = vld [vmem:[%s7740_s21 + $0x38] sm:$0xff] (%p8227_p0) }
 0x77b   : > { %5603 = vst [vmem:[%s7740_s21 + $0xe8] sm:$0xff] %v4749_v45  ;;  %4901 = vst [vmem:[%s8018_s11 + $0x38] sm:$0xff] (%p8227_p0), %v4900_v38 }
 0x77c   : > { %v4750_v32 = vadd.f32 %v6799_v1, %v4738_v35  ;;  %v4741_v30 = vadd.f32 %v6443_v7, %v4676_v43 }
 0x77e   : > { %5604 = vst [vmem:[%s7740_s21 + $0xf0] sm:$0xff] %v4750_v32  ;;  %v4751_v37 = vadd.f32 %v6800_v22, %v4741_v30 }
 0x780   : > { %5605 = vst [vmem:[%s7740_s21 + $0xf8] sm:$0xff] %v4751_v37  ;;  %v4942_v15 = vld [vmem:[%s7740_s21 + $0xe0] sm:$0xff] (%p8227_p0) }
 0x781   : > { %4943 = vst [vmem:[%s8018_s11 + $0x1a0] sm:$0xff] %v4942_v15 }
 0x782   : > { %v4944_v17 = vld [vmem:[%s7740_s21 + $0xe8] sm:$0xff] }
 0x783   : > { %4945 = vst [vmem:[%s8018_s11 + $0x1a8] sm:$0xff] %v4944_v17 }
 0x785   : > { %v4946_v59 = vld [vmem:[%s7740_s21 + $0xf0] sm:$0xff] }
 0x786   : > { %4947 = vst [vmem:[%s8018_s11 + $0x1b0] sm:$0xff] %v4946_v59 }
 0x787   : > { %v4948_v49 = vld [vmem:[%s7740_s21 + $0xf8] sm:$0xff] }
 0x788   : > { %4949 = vst [vmem:[%s8018_s11 + $0x1b8] sm:$0xff] %v4948_v49 }
 0x789 PF: > { %p16_p1 = scmp.ge.s32.totalorder %s7007_s25, 4   ;;  %s8228_s21 = smov %s6943_s22 }
 0x78a   : > { %s8229_s22 = smov %s7015_s28  ;;  %s8230_s23 = smov %s7007_s25 }
 0x78b   :  { %18 = sbr.rel (!%p16_p1) target bundleno = 4 (0x4), region = 155 }
 0x792   :  { %4965 = vsyncpa [#allocation3], 1 }
 0x793   :  { %4967 = vsyncpa [#allocation3 + $0x1], 1 }
 0x794   :  { %4968 = vsyncpa [#allocation5], 1 }
 0x795   :  { %4969 = vsyncpa [#allocation8], 1 }

</bundles_post_ra>
